<compile_context>
chip_gen: v7x
topology: tpu7x:2x2x1
jax: 0.10.0
libtpu: 0.0.40
codegen_flags: <defaults>
</compile_context>

<pallas_src>
import jax
import jax.numpy as jnp
from jax.experimental import pallas as pl
from jax.experimental.pallas import tpu as pltpu

LANES = 128                      # padded output-channel / feature width (lane-dense stores)
K1P, K2P = 80, 160               # conv1 / conv2 im2col K, padded to a bf16 sublane multiple
VMEM_LIMIT = 40 * 1024 * 1024    # explicit scoped-VMEM limit (fits v7x's 64 MiB physical)


def _round_up(n, m):
    return ((n + m - 1) // m) * m


def _pad_axis(x, axis, target):
    pad = target - x.shape[axis]
    if pad <= 0:
        return x
    widths = [(0, 0)] * x.ndim
    widths[axis] = (0, pad)
    return jnp.pad(x, widths)


def _pick_bt(bp, unit, target):
    """Images (rows) per grid step: a multiple of `unit` that divides `bp` and is
    <= `target`, preferring choices that leave >= 2 grid steps so the 'parallel'
    axis can be sharded across both v7x TensorCores."""
    cands = [d for d in range(unit, bp + 1, unit) if bp % d == 0 and d <= target]
    if not cands:
        return bp
    two_step = [d for d in cands if bp // d >= 2]
    return max(two_step) if two_step else max(cands)


# ----------------------------- Pallas kernels ------------------------------ #

def _conv_relu_pool_kernel(cols_ref, w_ref, b_ref, o_ref):
    """Fused conv (as one long matmul) + bias + ReLU + 2x2 maxpool for one batch tile.

    cols_ref: (4*M, Kp) bf16 -- im2col patches, corner-major: rows [c*M, (c+1)*M) are
                                pooling corner c, ordered (b, hq, wq) within the corner.
    w_ref:    (Kp, 128) bf16 -- conv weight, K and Cout zero-padded.
    b_ref:    (1, 128)  f32
    o_ref:    (M, 128)  bf16 =  relu(max_corner(cols @ w) + b)   (f32 math, bf16 store)
    """
    m = o_ref.shape[0]
    acc = jnp.dot(cols_ref[...], w_ref[...], preferred_element_type=jnp.float32)
    red = jnp.maximum(jnp.maximum(acc[0 * m:1 * m], acc[1 * m:2 * m]),
                      jnp.maximum(acc[2 * m:3 * m], acc[3 * m:4 * m]))
    o_ref[...] = jnp.maximum(red + b_ref[...], 0.0).astype(o_ref.dtype)


def _fc_stack_kernel(x_ref, w1_ref, b1_ref, w2_ref, b2_ref, w3_ref, b3_ref, o_ref):
    """fc1(ReLU) -> fc2(ReLU) -> fc3 fully in VMEM for one batch tile (f32 epilogues)."""
    h = jnp.dot(x_ref[...], w1_ref[...], preferred_element_type=jnp.float32)
    h = jnp.maximum(h + b1_ref[...], 0.0)
    h = jnp.dot(h.astype(w2_ref.dtype), w2_ref[...], preferred_element_type=jnp.float32)
    h = jnp.maximum(h + b2_ref[...], 0.0)
    h = jnp.dot(h.astype(w3_ref.dtype), w3_ref[...], preferred_element_type=jnp.float32)
    o_ref[...] = (h + b3_ref[...]).astype(o_ref.dtype)


# ------------------------------ Pallas wrappers ----------------------------- #

def conv_relu_pool(cols, w, b, *, mq_tile):
    """cols: (4*Mq, Kp) bf16 (tile-major, corner-major inside each tile),
    w: (Kp, 128) bf16, b: (1, 128) f32  ->  (Mq, 128) bf16."""
    rows, kp = cols.shape
    mq_total = rows // 4
    assert mq_total % mq_tile == 0
    grid = mq_total // mq_tile
    flops = 2 * rows * kp * LANES
    bytes_acc = rows * kp * 2 + kp * LANES * 2 + LANES * 4 + mq_total * LANES * 2
    return pl.pallas_call(
        _conv_relu_pool_kernel,
        out_shape=jax.ShapeDtypeStruct((mq_total, LANES), jnp.bfloat16),
        grid=(grid,),
        in_specs=[
            pl.BlockSpec((4 * mq_tile, kp), lambda i: (i, 0)),
            pl.BlockSpec(w.shape, lambda i: (0, 0)),       # resident weight
            pl.BlockSpec(b.shape, lambda i: (0, 0)),       # resident bias
        ],
        out_specs=pl.BlockSpec((mq_tile, LANES), lambda i: (i, 0)),
        compiler_params=pltpu.CompilerParams(
            dimension_semantics=("parallel",),
            vmem_limit_bytes=VMEM_LIMIT),
        cost_estimate=pl.CostEstimate(flops=flops, transcendentals=0,
                                      bytes_accessed=bytes_acc),
    )(cols, w, b)


def fc_stack(x, w1, b1, w2, b2, w3, b3, *, bt):
    """x: (Bp, 400) bf16 -> logits slab (Bp, 128) f32 (fc3 output in cols [:10])."""
    bp, kin = x.shape
    assert bp % bt == 0
    grid = bp // bt
    flops = 2 * bp * (kin * LANES + LANES * LANES + LANES * LANES)
    bytes_acc = (bp * kin * 2 + (w1.size + w2.size + w3.size) * 2
                 + (b1.size + b2.size + b3.size) * 4 + bp * LANES * 4)
    return pl.pallas_call(
        _fc_stack_kernel,
        out_shape=jax.ShapeDtypeStruct((bp, LANES), jnp.float32),
        grid=(grid,),
        in_specs=[
            pl.BlockSpec((bt, kin), lambda i: (i, 0)),
            pl.BlockSpec(w1.shape, lambda i: (0, 0)),
            pl.BlockSpec(b1.shape, lambda i: (0, 0)),
            pl.BlockSpec(w2.shape, lambda i: (0, 0)),
            pl.BlockSpec(b2.shape, lambda i: (0, 0)),
            pl.BlockSpec(w3.shape, lambda i: (0, 0)),
            pl.BlockSpec(b3.shape, lambda i: (0, 0)),
        ],
        out_specs=pl.BlockSpec((bt, LANES), lambda i: (i, 0)),
        compiler_params=pltpu.CompilerParams(
            dimension_semantics=("parallel",),
            vmem_limit_bytes=VMEM_LIMIT),
        cost_estimate=pl.CostEstimate(flops=flops, transcendentals=0,
                                      bytes_accessed=bytes_acc),
    )(x, w1, b1, w2, b2, w3, b3)


# ------------------------------ JAX index glue ------------------------------ #

def _im2col_pooled(x, k, kpad, bt):
    """x: (B, H, W, C) NHWC bf16 -> cols (4*B*Hq*Wq, kpad) bf16, plus (Hq, Wq).

    Rows are grouped per batch tile of `bt` images; inside each tile they are
    corner-major: rows [c*M, (c+1)*M) (M = bt*Hq*Wq) belong to pool corner c and are
    ordered (b, hq, wq).  Columns are (kh, kw, cin), zero-padded to `kpad`.  Corner
    (dh, dw) row (b, hq, wq) equals the conv output at (2*hq+dh, 2*wq+dw), so the
    4-way max in the kernel implements the 2x2 maxpool.
    """
    B, H, W, C = x.shape
    assert B % bt == 0
    G = B // bt
    Hq, Wq = (H - k + 1) // 2, (W - k + 1) // 2
    corners = []
    for dh in range(2):
        for dw in range(2):
            patches = [
                x[:, dh + i: dh + i + 2 * Hq - 1: 2,
                     dw + j: dw + j + 2 * Wq - 1: 2, :]
                for i in range(k) for j in range(k)
            ]
            cols = jnp.concatenate(patches, axis=-1)            # (B, Hq, Wq, k*k*C)
            corners.append(cols.reshape(G, bt, Hq * Wq, k * k * C))
    cols4 = jnp.stack(corners, axis=1)                          # (G, 4, bt, M', K)
    cols4 = _pad_axis(cols4, 4, kpad)                           # (G, 4, bt, M', Kp)
    return cols4.reshape(G * 4 * bt * Hq * Wq, kpad), (Hq, Wq)


def init_params(key):
    """Parameters in the original torch layouts."""
    ks = jax.random.split(key, 10)
    return {
        "conv1_w": jax.random.normal(ks[0], (6, 3, 5, 5), jnp.float32) * 0.1,
        "conv1_b": jax.random.normal(ks[1], (6,), jnp.float32) * 0.1,
        "conv2_w": jax.random.normal(ks[2], (16, 6, 5, 5), jnp.float32) * 0.1,
        "conv2_b": jax.random.normal(ks[3], (16,), jnp.float32) * 0.1,
        "fc1_w": jax.random.normal(ks[4], (120, 400), jnp.float32) * 0.05,
        "fc1_b": jax.random.normal(ks[5], (120,), jnp.float32) * 0.05,
        "fc2_w": jax.random.normal(ks[6], (84, 120), jnp.float32) * 0.05,
        "fc2_b": jax.random.normal(ks[7], (84,), jnp.float32) * 0.05,
        "fc3_w": jax.random.normal(ks[8], (10, 84), jnp.float32) * 0.05,
        "fc3_b": jax.random.normal(ks[9], (10,), jnp.float32) * 0.05,
    }


def prepare_params(p):
    """One-time weight repack: transpose, zero-pad to aligned shapes, bf16 operands."""
    def conv_w(w, kpad):                      # torch (Cout,Cin,kh,kw) -> (Kp, 128)
        cout, cin, kh, kw = w.shape
        wc = jnp.transpose(w, (2, 3, 1, 0)).reshape(kh * kw * cin, cout)
        return _pad_axis(_pad_axis(wc, 0, kpad), 1, LANES).astype(jnp.bfloat16)

    def fc_w(w, kpad):                        # torch (out, in) -> (in_pad, 128)
        wc = jnp.transpose(w, (1, 0))
        return _pad_axis(_pad_axis(wc, 0, kpad), 1, LANES).astype(jnp.bfloat16)

    def bias(b):
        return _pad_axis(b.reshape(1, -1), 1, LANES).astype(jnp.float32)

    # Fold torch's NCHW flatten (c,h,w) into fc1's input rows so the NHWC-ordered
    # conv2 output slab feeds fc1 with a plain reshape (no runtime transpose).
    f1 = jnp.transpose(p["fc1_w"].reshape(120, 16, 5, 5), (0, 2, 3, 1)).reshape(120, 400)

    return {
        "c1w": conv_w(p["conv1_w"], K1P), "c1b": bias(p["conv1_b"]),
        "c2w": conv_w(p["conv2_w"], K2P), "c2b": bias(p["conv2_b"]),
        "f1w": fc_w(f1, 400), "f1b": bias(p["fc1_b"]),
        "f2w": fc_w(p["fc2_w"], 128), "f2b": bias(p["fc2_b"]),
        "f3w": fc_w(p["fc3_w"], 128), "f3b": bias(p["fc3_b"]),
    }


def net_forward(x_nchw, kp):
    """x_nchw: (B, 3, 32, 32) f32 -> logits (B, 10), matching the torch Net."""
    B = x_nchw.shape[0]
    Bp = _round_up(B, 8)
    # Images per grid step.  conv1 ~16/step (~18 MiB VMEM with the single long matmul),
    # conv2 up to 64/step, fc up to 256 rows/step; all chosen so grid >= 2 when possible.
    bt1 = _pick_bt(Bp, 2, 16)
    bt2 = _pick_bt(Bp, 8, 64)
    bt3 = _pick_bt(Bp, 8, 256)

    x = jnp.transpose(x_nchw.astype(jnp.bfloat16), (0, 2, 3, 1))   # NHWC bf16
    x = _pad_axis(x, 0, Bp)

    # conv1 (5x5, 3->6) + ReLU + 2x2 maxpool, fused
    cols, (h1, w1) = _im2col_pooled(x, 5, K1P, bt1)          # (4*Bp*196, 80) bf16
    y = conv_relu_pool(cols, kp["c1w"], kp["c1b"], mq_tile=bt1 * h1 * w1)
    y = y[:, :6].reshape(Bp, h1, w1, 6)                      # (Bp, 14, 14, 6) bf16

    # conv2 (5x5, 6->16) + ReLU + 2x2 maxpool, fused
    cols, (h2, w2) = _im2col_pooled(y, 5, K2P, bt2)          # (4*Bp*25, 160) bf16
    y = conv_relu_pool(cols, kp["c2w"], kp["c2b"], mq_tile=bt2 * h2 * w2)

    # Flatten (NHWC order; the NCHW permutation is folded into fc1's weights).
    xf = y[:, :16].reshape(Bp, h2 * w2 * 16)                 # (Bp, 400) bf16

    # fc1 -> relu -> fc2 -> relu -> fc3, single fused kernel
    logits = fc_stack(xf, kp["f1w"], kp["f1b"], kp["f2w"], kp["f2b"],
                      kp["f3w"], kp["f3b"], bt=bt3)          # (Bp, 128) f32
    return logits[:B, :10]


if __name__ == "__main__":
    key = jax.random.PRNGKey(0)
    k_x, k_p = jax.random.split(key)
    # Spatial size must be 32x32 for the 16*5*5 flatten of the original Net to hold.
    x = jax.random.normal(k_x, (2, 3, 32, 32), jnp.float32)
    params = init_params(k_p)
    kparams = prepare_params(params)

    fwd = jax.jit(net_forward)
    out = jax.block_until_ready(fwd(x, kparams))
    assert out.shape == (2, 10), out.shape
    assert bool(jnp.all(jnp.isfinite(out)))
    print("KERNEL_OK")
</pallas_src>

<mosaic_0001>
module attributes {stable_mosaic.version = 11 : i64} {
  func.func @_conv_relu_pool_kernel(%arg0: i32, %arg1: memref<3136x80xbf16, #tpu.memory_space<vmem>>, %arg2: memref<80x128xbf16, #tpu.memory_space<vmem>>, %arg3: memref<1x128xf32, #tpu.memory_space<vmem>>, %arg4: memref<784x128xbf16, #tpu.memory_space<vmem>>) attributes {dimension_semantics = [#tpu.dimension_semantics<parallel>], iteration_bounds = array<i64: 2>, scalar_prefetch = 0 : i64, scratch_operands = 0 : i64, tpu.core_type = #tpu.core_type<tc>, window_params = [{transform_indices = @transform_0, window_bounds = array<i64: 3136, 80>}, {pipeline_mode = #tpu.pipeline_mode<synchronous>, transform_indices = @transform_1, window_bounds = array<i64: 80, 128>}, {pipeline_mode = #tpu.pipeline_mode<synchronous>, transform_indices = @transform_2, window_bounds = array<i64: 1, 128>}, {transform_indices = @transform_3, window_bounds = array<i64: 784, 128>}]} {
    %c0 = arith.constant 0 : index
    %c0_0 = arith.constant 0 : index
    %0 = vector.load %arg1[%c0, %c0_0] : memref<3136x80xbf16, #tpu.memory_space<vmem>>, vector<3136x80xbf16>
    %c0_1 = arith.constant 0 : index
    %c0_2 = arith.constant 0 : index
    %1 = vector.load %arg2[%c0_1, %c0_2] : memref<80x128xbf16, #tpu.memory_space<vmem>>, vector<80x128xbf16>
    %cst = arith.constant dense<0.000000e+00> : vector<3136x128xf32>
    %2 = tpu.matmul %0, %1, %cst {dimension_numbers = #tpu.dot_dimension_numbers<[1], [0], [0], [1], [0, 0, 1, 1], [], []>} : vector<3136x80xbf16>, vector<80x128xbf16>, vector<3136x128xf32> -> vector<3136x128xf32>
    %3 = vector.extract_strided_slice %2 {offsets = [0, 0], sizes = [784, 128], strides = [1, 1]} : vector<3136x128xf32> to vector<784x128xf32>
    %4 = vector.extract_strided_slice %2 {offsets = [784, 0], sizes = [784, 128], strides = [1, 1]} : vector<3136x128xf32> to vector<784x128xf32>
    %5 = arith.maximumf %3, %4 : vector<784x128xf32>
    %6 = vector.extract_strided_slice %2 {offsets = [1568, 0], sizes = [784, 128], strides = [1, 1]} : vector<3136x128xf32> to vector<784x128xf32>
    %7 = vector.extract_strided_slice %2 {offsets = [2352, 0], sizes = [784, 128], strides = [1, 1]} : vector<3136x128xf32> to vector<784x128xf32>
    %8 = arith.maximumf %6, %7 : vector<784x128xf32>
    %9 = arith.maximumf %5, %8 : vector<784x128xf32>
    %c0_3 = arith.constant 0 : index
    %c0_4 = arith.constant 0 : index
    %10 = vector.load %arg3[%c0_3, %c0_4] : memref<1x128xf32, #tpu.memory_space<vmem>>, vector<1x128xf32>
    %11 = vector.broadcast %10 : vector<1x128xf32> to vector<784x128xf32>
    %12 = arith.addf %9, %11 : vector<784x128xf32>
    %cst_5 = arith.constant 0.000000e+00 : f32
    %13 = vector.broadcast %cst_5 : f32 to vector<784x128xf32>
    %14 = arith.maximumf %12, %13 : vector<784x128xf32>
    %15 = arith.truncf %14 : vector<784x128xf32> to vector<784x128xbf16>
    %c0_6 = arith.constant 0 : index
    %c0_7 = arith.constant 0 : index
    %16 = vector.load %arg4[%c0_6, %c0_7] : memref<784x128xbf16, #tpu.memory_space<vmem>>, vector<784x128xbf16>
    tpu.vector_store %arg4[%c0_6, %c0_7], %15 {strides = array<i32>} : memref<784x128xbf16, #tpu.memory_space<vmem>>, vector<784x128xbf16>,
    return
  }
  func.func @transform_0(%arg0: i32) -> (i32, i32) {
    %c0_i32 = arith.constant 0 : i32
    %c0_i32_0 = arith.constant 0 : i32
    return %arg0, %c0_i32 : i32, i32
  }
  func.func @transform_1(%arg0: i32) -> (i32, i32) {
    %c0_i32 = arith.constant 0 : i32
    %c0_i32_0 = arith.constant 0 : i32
    %c0_i32_1 = arith.constant 0 : i32
    return %c0_i32, %c0_i32_0 : i32, i32
  }
  func.func @transform_2(%arg0: i32) -> (i32, i32) {
    %c0_i32 = arith.constant 0 : i32
    %c0_i32_0 = arith.constant 0 : i32
    %c0_i32_1 = arith.constant 0 : i32
    return %c0_i32, %c0_i32_0 : i32, i32
  }
  func.func @transform_3(%arg0: i32) -> (i32, i32) {
    %c0_i32 = arith.constant 0 : i32
    %c0_i32_0 = arith.constant 0 : i32
    return %arg0, %c0_i32 : i32, i32
  }
}

module attributes {stable_mosaic.version = 11 : i64} {
  func.func @_conv_relu_pool_kernel(%arg0: i32, %arg1: memref<800x160xbf16, #tpu.memory_space<vmem>>, %arg2: memref<160x128xbf16, #tpu.memory_space<vmem>>, %arg3: memref<1x128xf32, #tpu.memory_space<vmem>>, %arg4: memref<200x128xbf16, #tpu.memory_space<vmem>>) attributes {dimension_semantics = [#tpu.dimension_semantics<parallel>], iteration_bounds = array<i64: 1>, scalar_prefetch = 0 : i64, scratch_operands = 0 : i64, tpu.core_type = #tpu.core_type<tc>, window_params = [{transform_indices = @transform_0, window_bounds = array<i64: 800, 160>}, {pipeline_mode = #tpu.pipeline_mode<synchronous>, transform_indices = @transform_1, window_bounds = array<i64: 160, 128>}, {pipeline_mode = #tpu.pipeline_mode<synchronous>, transform_indices = @transform_2, window_bounds = array<i64: 1, 128>}, {transform_indices = @transform_3, window_bounds = array<i64: 200, 128>}]} {
    %c0 = arith.constant 0 : index
    %c0_0 = arith.constant 0 : index
    %0 = vector.load %arg1[%c0, %c0_0] : memref<800x160xbf16, #tpu.memory_space<vmem>>, vector<800x160xbf16>
    %c0_1 = arith.constant 0 : index
    %c0_2 = arith.constant 0 : index
    %1 = vector.load %arg2[%c0_1, %c0_2] : memref<160x128xbf16, #tpu.memory_space<vmem>>, vector<160x128xbf16>
    %cst = arith.constant dense<0.000000e+00> : vector<800x128xf32>
    %2 = tpu.matmul %0, %1, %cst {dimension_numbers = #tpu.dot_dimension_numbers<[1], [0], [0], [1], [0, 0, 1, 1], [], []>} : vector<800x160xbf16>, vector<160x128xbf16>, vector<800x128xf32> -> vector<800x128xf32>
    %3 = vector.extract_strided_slice %2 {offsets = [0, 0], sizes = [200, 128], strides = [1, 1]} : vector<800x128xf32> to vector<200x128xf32>
    %4 = vector.extract_strided_slice %2 {offsets = [200, 0], sizes = [200, 128], strides = [1, 1]} : vector<800x128xf32> to vector<200x128xf32>
    %5 = arith.maximumf %3, %4 : vector<200x128xf32>
    %6 = vector.extract_strided_slice %2 {offsets = [400, 0], sizes = [200, 128], strides = [1, 1]} : vector<800x128xf32> to vector<200x128xf32>
    %7 = vector.extract_strided_slice %2 {offsets = [600, 0], sizes = [200, 128], strides = [1, 1]} : vector<800x128xf32> to vector<200x128xf32>
    %8 = arith.maximumf %6, %7 : vector<200x128xf32>
    %9 = arith.maximumf %5, %8 : vector<200x128xf32>
    %c0_3 = arith.constant 0 : index
    %c0_4 = arith.constant 0 : index
    %10 = vector.load %arg3[%c0_3, %c0_4] : memref<1x128xf32, #tpu.memory_space<vmem>>, vector<1x128xf32>
    %11 = vector.broadcast %10 : vector<1x128xf32> to vector<200x128xf32>
    %12 = arith.addf %9, %11 : vector<200x128xf32>
    %cst_5 = arith.constant 0.000000e+00 : f32
    %13 = vector.broadcast %cst_5 : f32 to vector<200x128xf32>
    %14 = arith.maximumf %12, %13 : vector<200x128xf32>
    %15 = arith.truncf %14 : vector<200x128xf32> to vector<200x128xbf16>
    %c0_6 = arith.constant 0 : index
    %c0_7 = arith.constant 0 : index
    %16 = vector.load %arg4[%c0_6, %c0_7] : memref<200x128xbf16, #tpu.memory_space<vmem>>, vector<200x128xbf16>
    tpu.vector_store %arg4[%c0_6, %c0_7], %15 {strides = array<i32>} : memref<200x128xbf16, #tpu.memory_space<vmem>>, vector<200x128xbf16>,
    return
  }
  func.func @transform_0(%arg0: i32) -> (i32, i32) {
    %c0_i32 = arith.constant 0 : i32
    %c0_i32_0 = arith.constant 0 : i32
    return %arg0, %c0_i32 : i32, i32
  }
  func.func @transform_1(%arg0: i32) -> (i32, i32) {
    %c0_i32 = arith.constant 0 : i32
    %c0_i32_0 = arith.constant 0 : i32
    %c0_i32_1 = arith.constant 0 : i32
    return %c0_i32, %c0_i32_0 : i32, i32
  }
  func.func @transform_2(%arg0: i32) -> (i32, i32) {
    %c0_i32 = arith.constant 0 : i32
    %c0_i32_0 = arith.constant 0 : i32
    %c0_i32_1 = arith.constant 0 : i32
    return %c0_i32, %c0_i32_0 : i32, i32
  }
  func.func @transform_3(%arg0: i32) -> (i32, i32) {
    %c0_i32 = arith.constant 0 : i32
    %c0_i32_0 = arith.constant 0 : i32
    return %arg0, %c0_i32 : i32, i32
  }
}

module attributes {stable_mosaic.version = 11 : i64} {
  func.func @_fc_stack_kernel(%arg0: i32, %arg1: memref<8x400xbf16, #tpu.memory_space<vmem>>, %arg2: memref<400x128xbf16, #tpu.memory_space<vmem>>, %arg3: memref<1x128xf32, #tpu.memory_space<vmem>>, %arg4: memref<128x128xbf16, #tpu.memory_space<vmem>>, %arg5: memref<1x128xf32, #tpu.memory_space<vmem>>, %arg6: memref<128x128xbf16, #tpu.memory_space<vmem>>, %arg7: memref<1x128xf32, #tpu.memory_space<vmem>>, %arg8: memref<8x128xf32, #tpu.memory_space<vmem>>) attributes {dimension_semantics = [#tpu.dimension_semantics<parallel>], iteration_bounds = array<i64: 1>, scalar_prefetch = 0 : i64, scratch_operands = 0 : i64, tpu.core_type = #tpu.core_type<tc>, window_params = [{transform_indices = @transform_0, window_bounds = array<i64: 8, 400>}, {pipeline_mode = #tpu.pipeline_mode<synchronous>, transform_indices = @transform_1, window_bounds = array<i64: 400, 128>}, {pipeline_mode = #tpu.pipeline_mode<synchronous>, transform_indices = @transform_2, window_bounds = array<i64: 1, 128>}, {pipeline_mode = #tpu.pipeline_mode<synchronous>, transform_indices = @transform_3, window_bounds = array<i64: 128, 128>}, {pipeline_mode = #tpu.pipeline_mode<synchronous>, transform_indices = @transform_4, window_bounds = array<i64: 1, 128>}, {pipeline_mode = #tpu.pipeline_mode<synchronous>, transform_indices = @transform_5, window_bounds = array<i64: 128, 128>}, {pipeline_mode = #tpu.pipeline_mode<synchronous>, transform_indices = @transform_6, window_bounds = array<i64: 1, 128>}, {transform_indices = @transform_7, window_bounds = array<i64: 8, 128>}]} {
    %c0 = arith.constant 0 : index
    %c0_0 = arith.constant 0 : index
    %0 = vector.load %arg1[%c0, %c0_0] : memref<8x400xbf16, #tpu.memory_space<vmem>>, vector<8x400xbf16>
    %c0_1 = arith.constant 0 : index
    %c0_2 = arith.constant 0 : index
    %1 = vector.load %arg2[%c0_1, %c0_2] : memref<400x128xbf16, #tpu.memory_space<vmem>>, vector<400x128xbf16>
    %cst = arith.constant dense<0.000000e+00> : vector<8x128xf32>
    %2 = tpu.matmul %0, %1, %cst {dimension_numbers = #tpu.dot_dimension_numbers<[1], [0], [0], [1], [0, 0, 1, 1], [], []>} : vector<8x400xbf16>, vector<400x128xbf16>, vector<8x128xf32> -> vector<8x128xf32>
    %c0_3 = arith.constant 0 : index
    %c0_4 = arith.constant 0 : index
    %3 = vector.load %arg3[%c0_3, %c0_4] : memref<1x128xf32, #tpu.memory_space<vmem>>, vector<1x128xf32>
    %4 = vector.broadcast %3 : vector<1x128xf32> to vector<8x128xf32>
    %5 = arith.addf %2, %4 : vector<8x128xf32>
    %cst_5 = arith.constant 0.000000e+00 : f32
    %6 = vector.broadcast %cst_5 : f32 to vector<8x128xf32>
    %7 = arith.maximumf %5, %6 : vector<8x128xf32>
    %8 = arith.truncf %7 : vector<8x128xf32> to vector<8x128xbf16>
    %c0_6 = arith.constant 0 : index
    %c0_7 = arith.constant 0 : index
    %9 = vector.load %arg4[%c0_6, %c0_7] : memref<128x128xbf16, #tpu.memory_space<vmem>>, vector<128x128xbf16>
    %cst_8 = arith.constant dense<0.000000e+00> : vector<8x128xf32>
    %10 = tpu.matmul %8, %9, %cst_8 {dimension_numbers = #tpu.dot_dimension_numbers<[1], [0], [0], [1], [0, 0, 1, 1], [], []>} : vector<8x128xbf16>, vector<128x128xbf16>, vector<8x128xf32> -> vector<8x128xf32>
    %c0_9 = arith.constant 0 : index
    %c0_10 = arith.constant 0 : index
    %11 = vector.load %arg5[%c0_9, %c0_10] : memref<1x128xf32, #tpu.memory_space<vmem>>, vector<1x128xf32>
    %12 = vector.broadcast %11 : vector<1x128xf32> to vector<8x128xf32>
    %13 = arith.addf %10, %12 : vector<8x128xf32>
    %cst_11 = arith.constant 0.000000e+00 : f32
    %14 = vector.broadcast %cst_11 : f32 to vector<8x128xf32>
    %15 = arith.maximumf %13, %14 : vector<8x128xf32>
    %16 = arith.truncf %15 : vector<8x128xf32> to vector<8x128xbf16>
    %c0_12 = arith.constant 0 : index
    %c0_13 = arith.constant 0 : index
    %17 = vector.load %arg6[%c0_12, %c0_13] : memref<128x128xbf16, #tpu.memory_space<vmem>>, vector<128x128xbf16>
    %cst_14 = arith.constant dense<0.000000e+00> : vector<8x128xf32>
    %18 = tpu.matmul %16, %17, %cst_14 {dimension_numbers = #tpu.dot_dimension_numbers<[1], [0], [0], [1], [0, 0, 1, 1], [], []>} : vector<8x128xbf16>, vector<128x128xbf16>, vector<8x128xf32> -> vector<8x128xf32>
    %c0_15 = arith.constant 0 : index
    %c0_16 = arith.constant 0 : index
    %19 = vector.load %arg7[%c0_15, %c0_16] : memref<1x128xf32, #tpu.memory_space<vmem>>, vector<1x128xf32>
    %20 = vector.broadcast %19 : vector<1x128xf32> to vector<8x128xf32>
    %21 = arith.addf %18, %20 : vector<8x128xf32>
    %c0_17 = arith.constant 0 : index
    %c0_18 = arith.constant 0 : index
    %22 = vector.load %arg8[%c0_17, %c0_18] : memref<8x128xf32, #tpu.memory_space<vmem>>, vector<8x128xf32>
    tpu.vector_store %arg8[%c0_17, %c0_18], %21 {strides = array<i32>} : memref<8x128xf32, #tpu.memory_space<vmem>>, vector<8x128xf32>,
    return
  }
  func.func @transform_0(%arg0: i32) -> (i32, i32) {
    %c0_i32 = arith.constant 0 : i32
    %c0_i32_0 = arith.constant 0 : i32
    return %arg0, %c0_i32 : i32, i32
  }
  func.func @transform_1(%arg0: i32) -> (i32, i32) {
    %c0_i32 = arith.constant 0 : i32
    %c0_i32_0 = arith.constant 0 : i32
    %c0_i32_1 = arith.constant 0 : i32
    return %c0_i32, %c0_i32_0 : i32, i32
  }
  func.func @transform_2(%arg0: i32) -> (i32, i32) {
    %c0_i32 = arith.constant 0 : i32
    %c0_i32_0 = arith.constant 0 : i32
    %c0_i32_1 = arith.constant 0 : i32
    return %c0_i32, %c0_i32_0 : i32, i32
  }
  func.func @transform_3(%arg0: i32) -> (i32, i32) {
    %c0_i32 = arith.constant 0 : i32
    %c0_i32_0 = arith.constant 0 : i32
    %c0_i32_1 = arith.constant 0 : i32
    return %c0_i32, %c0_i32_0 : i32, i32
  }
  func.func @transform_4(%arg0: i32) -> (i32, i32) {
    %c0_i32 = arith.constant 0 : i32
    %c0_i32_0 = arith.constant 0 : i32
    %c0_i32_1 = arith.constant 0 : i32
    return %c0_i32, %c0_i32_0 : i32, i32
  }
  func.func @transform_5(%arg0: i32) -> (i32, i32) {
    %c0_i32 = arith.constant 0 : i32
    %c0_i32_0 = arith.constant 0 : i32
    %c0_i32_1 = arith.constant 0 : i32
    return %c0_i32, %c0_i32_0 : i32, i32
  }
  func.func @transform_6(%arg0: i32) -> (i32, i32) {
    %c0_i32 = arith.constant 0 : i32
    %c0_i32_0 = arith.constant 0 : i32
    %c0_i32_1 = arith.constant 0 : i32
    return %c0_i32, %c0_i32_0 : i32, i32
  }
  func.func @transform_7(%arg0: i32) -> (i32, i32) {
    %c0_i32 = arith.constant 0 : i32
    %c0_i32_0 = arith.constant 0 : i32
    return %arg0, %c0_i32 : i32, i32
  }
}

</mosaic_0001>

<bundles_post_ra>
// kernel: net_forward.3
= control target key start
LH: loop header
LB: loop body
LE: loop exit
PB: predicated region body
PF: predicated region fallthrough
CT: control target
= control target key end

     0   :  { %s6567_s12 = smov 0   ;;  %s7744_s0 = inlined_call_operand.vmem [shape: bf16[6272,80], index: 0, kind: input, shape index: {}]   ;;  %s7745_s1 = inlined_call_operand.vmem [shape: bf16[80,128], index: 1, kind: input, shape index: {}]   ;;  %s7746_s2 = inlined_call_operand.vmem [shape: f32[1,128], index: 2, kind: input, shape index: {}]   ;;  %s7747_s3 = inlined_call_operand.vmem [shape: bf16[1568,128], index: 3, kind: output, shape index: {}]  }
   0x1 LB: > { %s4820_s13 = sadd.s32 4294967295, %s6545_s12   ;;  %p4824_p0 = scmp.ge.s32.totalorder %s6545_s12, 1  ;;  %s6545_s12 = sphi %s6567_s12, %s13_s12  }
   0x2   : > { %p138_p1 = scmp.lt.s32.totalorder %s6545_s12, 3 }
   0x4   : > { %p139_p2 = pnand %p4824_p0, %p138_p1 }
   0x6   : > { %142 = sbr.rel (%p139_p2) target bundleno = 644 (0x284), region = 32 }
   0xd   : > { %v6337_v0 = vld [vmem:[%s7745_s1] sm:$0xff]   ;;  %s162_s16 = smul.u32 392, %s4820_s13  ;;  %v6338_v1 = vld [vmem:[%s7745_s1 + $0x8] sm:$0xff]   ;;  %v6339_v2 = vld [vmem:[%s7745_s1 + $0x10] sm:$0xff]   ;;  %vm1587_vm0 = vcmask 654336  }
   0xe   : > { %5917 = vmatprep.subr.bf16.mxu0 %v6337_v0  ;;  %6319 = vmatprep.subr.bf16.mxu1 %v6337_v0  ;;  %v6340_v3 = vld [vmem:[%s7745_s1 + $0x18] sm:$0xff]   ;;  %v6341_v6 = vld [vmem:[%s7745_s1 + $0x20] sm:$0xff]   ;;  %s168_s29 = smul.u32 98, %s4820_s13 }
   0xf   : > { %p163_p3 = scmp.lt.s32.totalorder %s162_s16, 783  ;;  %5918 = vmatpush3.bf16.msra.mxu0 %v6337_v0  ;;  %6324 = vmatpush3.bf16.msra.mxu1 %v6337_v0 }
  0x10   : > { %5919 = vmatprep.subr.bf16.mxu0 %v6338_v1  ;;  %6320 = vmatprep.subr.bf16.mxu1 %v6338_v1  ;;  %p169_p4 = scmp.lt.s32.totalorder %s168_s29, 195 }
  0x11   : > { %s8041_s16 = smov (!%p163_p3, %s162_s16), 783 }
  0x12   : > { %s4825_s21 = sshll.u32 %s8041_s16, 2  ;;  %s8043_s29 = smov (!%p169_p4, %s168_s29), 195 }
  0x13   : > { %5920 = vmatpush3.bf16.msra.mxu0 %v6338_v1  ;;  %6325 = vmatpush3.bf16.msra.mxu1 %v6338_v1  ;;  %s6592_s26 = scalar_lea.vmem %s7744_s0, %s4825_s21  ;;  %s4826_s5 = sshll.u32 %s8043_s29, 2 }
  0x14   : > { %5921 = vmatprep.subr.bf16.mxu0 %v6339_v2  ;;  %6321 = vmatprep.subr.bf16.mxu1 %v6339_v2  ;;  %v6342_v4 = vld [vmem:[%s6592_s26] sm:$0xff]   ;;  %v6343_v5 = vld [vmem:[%s6592_s26 + $0x310] sm:$0xff]   ;;  %v6344_v7 = vld [vmem:[%s6592_s26 + $0x8] sm:$0xff]   ;;  %s7399_s8 = scalar_lea.vmem %s7747_s3, %s4826_s5 }
  0x15   : > { %5927 = vmatprep.mubr.msk.bf16.mxu0 %vm1587_vm0, %v6342_v4  ;;  %6123 = vmatprep.mubr.msk.bf16.mxu1 %vm1587_vm0, %v6343_v5  ;;  %v6345_v8 = vld [vmem:[%s6592_s26 + $0x318] sm:$0xff]   ;;  %v6346_v9 = vld [vmem:[%s6592_s26 + $0x10] sm:$0xff]   ;;  %v6347_v10 = vld [vmem:[%s6592_s26 + $0x320] sm:$0xff]  }
  0x16   : > { %v6348_v11 = vld [vmem:[%s6592_s26 + $0x18] sm:$0xff]   ;;  %v6349_v12 = vld [vmem:[%s6592_s26 + $0x328] sm:$0xff]   ;;  %v6350_v13 = vld [vmem:[%s6592_s26 + $0x20] sm:$0xff]  }
  0x17   : > { %5922 = vmatpush3.bf16.msra.mxu0 %v6339_v2  ;;  %6326 = vmatpush3.bf16.msra.mxu1 %v6339_v2  ;;  %v6351_v14 = vld [vmem:[%s6592_s26 + $0x330] sm:$0xff]   ;;  %v6352_v15 = vld [vmem:[%s6592_s26 + $0x28] sm:$0xff]   ;;  %v6353_v16 = vld [vmem:[%s6592_s26 + $0x338] sm:$0xff]  }
  0x18   : > { %5923 = vmatprep.subr.bf16.mxu0 %v6340_v3  ;;  %6322 = vmatprep.subr.bf16.mxu1 %v6340_v3  ;;  %v6354_v17 = vld [vmem:[%s6592_s26 + $0x30] sm:$0xff]   ;;  %v6355_v18 = vld [vmem:[%s6592_s26 + $0x340] sm:$0xff]   ;;  %v6356_v19 = vld [vmem:[%s6592_s26 + $0x38] sm:$0xff]  }
  0x19   : > { %v6357_v20 = vld [vmem:[%s6592_s26 + $0x348] sm:$0xff]   ;;  %v6358_v21 = vld [vmem:[%s6592_s26 + $0x40] sm:$0xff]   ;;  %v6359_v22 = vld [vmem:[%s6592_s26 + $0x350] sm:$0xff]  }
  0x1a   : > { %v6360_v23 = vld [vmem:[%s6592_s26 + $0x48] sm:$0xff]   ;;  %v6361_v24 = vld [vmem:[%s6592_s26 + $0x358] sm:$0xff]   ;;  %v6362_v25 = vld [vmem:[%s6592_s26 + $0x50] sm:$0xff]  }
  0x1b   : > { %5924 = vmatpush3.bf16.msra.mxu0 %v6340_v3  ;;  %6327 = vmatpush3.bf16.msra.mxu1 %v6340_v3  ;;  %v6363_v26 = vld [vmem:[%s6592_s26 + $0x360] sm:$0xff]   ;;  %v6364_v27 = vld [vmem:[%s6592_s26 + $0x58] sm:$0xff]   ;;  %v6365_v28 = vld [vmem:[%s6592_s26 + $0x368] sm:$0xff]  }
  0x1c   : > { %5925 = vmatprep.subr.bf16.mxu0 %v6341_v6  ;;  %6323 = vmatprep.subr.bf16.mxu1 %v6341_v6  ;;  %v6366_v29 = vld [vmem:[%s6592_s26 + $0x60] sm:$0xff]   ;;  %v6367_v30 = vld [vmem:[%s6592_s26 + $0x370] sm:$0xff]   ;;  %v6368_v31 = vld [vmem:[%s6592_s26 + $0x68] sm:$0xff]  }
  0x1d   : > { %v6369_v32 = vld [vmem:[%s6592_s26 + $0x378] sm:$0xff]   ;;  %v6370_v33 = vld [vmem:[%s6592_s26 + $0x70] sm:$0xff]   ;;  %v6371_v34 = vld [vmem:[%s6592_s26 + $0x380] sm:$0xff]  }
  0x1e   : > { %v6372_v35 = vld [vmem:[%s6592_s26 + $0x78] sm:$0xff]   ;;  %v6373_v36 = vld [vmem:[%s6592_s26 + $0x388] sm:$0xff]   ;;  %v6374_v37 = vld [vmem:[%s6592_s26 + $0x80] sm:$0xff]  }
  0x1f   : > { %5926 = vmatpush3.bf16.msra.mxu0 %v6341_v6  ;;  %6328 = vmatpush3.bf16.msra.mxu1 %v6341_v6  ;;  %v6375_v38 = vld [vmem:[%s6592_s26 + $0x390] sm:$0xff]   ;;  %v6376_v39 = vld [vmem:[%s6592_s26 + $0x88] sm:$0xff]   ;;  %v6377_v40 = vld [vmem:[%s6592_s26 + $0x398] sm:$0xff]  }
  0x20   : > { %v6378_v41 = vld [vmem:[%s6592_s26 + $0x90] sm:$0xff]   ;;  %v6379_v42 = vld [vmem:[%s6592_s26 + $0x3a0] sm:$0xff]   ;;  %v6380_v43 = vld [vmem:[%s6592_s26 + $0x98] sm:$0xff]  }
  0x21   : > { %v6381_v44 = vld [vmem:[%s6592_s26 + $0x3a8] sm:$0xff]   ;;  %v6382_v45 = vld [vmem:[%s6592_s26 + $0xa0] sm:$0xff]   ;;  %v6383_v46 = vld [vmem:[%s6592_s26 + $0x3b0] sm:$0xff]  }
  0x22   : > { %5928 = vmatmul.mubr.msk.bf16.vlgmr.msra.gmra.mrb[0].mxu0 %vm1587_vm0, %v6344_v7  ;;  %6124 = vmatmul.mubr.msk.bf16.vlgmr.msra.gmra.mrb[0].mxu1 %vm1587_vm0, %v6345_v8  ;;  %v6384_v47 = vld [vmem:[%s6592_s26 + $0xa8] sm:$0xff]   ;;  %v6385_v48 = vld [vmem:[%s6592_s26 + $0x3b8] sm:$0xff]   ;;  %v6386_v49 = vld [vmem:[%s6592_s26 + $0xb0] sm:$0xff]  }
  0x23   : > { %5931 = vmatprep.mubr.msk.bf16.mxu0 %vm1587_vm0, %v6346_v9  ;;  %6127 = vmatprep.mubr.msk.bf16.mxu1 %vm1587_vm0, %v6347_v10  ;;  %v6387_v50 = vld [vmem:[%s6592_s26 + $0x3c0] sm:$0xff]   ;;  %v6388_v51 = vld [vmem:[%s6592_s26 + $0xb8] sm:$0xff]   ;;  %v6389_v52 = vld [vmem:[%s6592_s26 + $0x3c8] sm:$0xff]  }
  0x24   : > { %v6390_v53 = vld [vmem:[%s6592_s26 + $0xc0] sm:$0xff]   ;;  %v6391_v54 = vld [vmem:[%s6592_s26 + $0x3d0] sm:$0xff]   ;;  %v6392_v55 = vld [vmem:[%s6592_s26 + $0xc8] sm:$0xff]  }
  0x25   : > { %v6393_v56 = vld [vmem:[%s6592_s26 + $0x3d8] sm:$0xff]   ;;  %v6394_v57 = vld [vmem:[%s6592_s26 + $0xd0] sm:$0xff]   ;;  %v6395_v58 = vld [vmem:[%s6592_s26 + $0x3e0] sm:$0xff]  }
  0x26   : > { %v6396_v59 = vld [vmem:[%s6592_s26 + $0xd8] sm:$0xff]   ;;  %v6397_v60 = vld [vmem:[%s6592_s26 + $0x3e8] sm:$0xff]   ;;  %v6398_v61 = vld [vmem:[%s6592_s26 + $0xe0] sm:$0xff]  }
  0x27   : > { %v6399_v62 = vld [vmem:[%s6592_s26 + $0x3f0] sm:$0xff]   ;;  %v6400_v63 = vld [vmem:[%s6592_s26 + $0xe8] sm:$0xff]   ;;  %v6401_v0 = vld [vmem:[%s6592_s26 + $0x3f8] sm:$0xff]  }
  0x28   : > { %v6402_v1 = vld [vmem:[%s6592_s26 + $0xf0] sm:$0xff]   ;;  %v6403_v2 = vld [vmem:[%s6592_s26 + $0x400] sm:$0xff]   ;;  %v6404_v3 = vld [vmem:[%s6592_s26 + $0xf8] sm:$0xff]  }
  0x29   : > { %v6405_v4 = vld [vmem:[%s6592_s26 + $0x408] sm:$0xff]   ;;  %v6406_v5 = vld [vmem:[%s6592_s26 + $0x100] sm:$0xff]   ;;  %v6407_v6 = vld [vmem:[%s6592_s26 + $0x410] sm:$0xff]  }
  0x2a   : > { %5932 = vmatmul.mubr.msk.bf16.gmra.mrb[4].mxu0 %vm1587_vm0, %v6348_v11  ;;  %6128 = vmatmul.mubr.msk.bf16.gmra.mrb[4].mxu1 %vm1587_vm0, %v6349_v12  ;;  %v6408_v7 = vld [vmem:[%s6592_s26 + $0x108] sm:$0xff]   ;;  %v6409_v8 = vld [vmem:[%s6592_s26 + $0x418] sm:$0xff]   ;;  %v6410_v9 = vld [vmem:[%s6592_s26 + $0x110] sm:$0xff]  }
  0x2b   : > { %5935 = vmatprep.mubr.msk.bf16.mxu0 %vm1587_vm0, %v6350_v13  ;;  %6131 = vmatprep.mubr.msk.bf16.mxu1 %vm1587_vm0, %v6351_v14  ;;  %v6411_v10 = vld [vmem:[%s6592_s26 + $0x420] sm:$0xff]   ;;  %v6412_v11 = vld [vmem:[%s6592_s26 + $0x118] sm:$0xff]   ;;  %v6413_v12 = vld [vmem:[%s6592_s26 + $0x428] sm:$0xff]  }
  0x2c   : > { %v6414_v13 = vld [vmem:[%s6592_s26 + $0x120] sm:$0xff]   ;;  %v6415_v14 = vld [vmem:[%s6592_s26 + $0x430] sm:$0xff]  }
  0x32   : > { %5936 = vmatmul.mubr.msk.bf16.gmra.mrb[8].mxu0 %vm1587_vm0, %v6352_v15  ;;  %6132 = vmatmul.mubr.msk.bf16.gmra.mrb[8].mxu1 %vm1587_vm0, %v6353_v16  ;;  %v6416_v15 = vld [vmem:[%s6592_s26 + $0x128] sm:$0xff]   ;;  %v6417_v16 = vld [vmem:[%s6592_s26 + $0x438] sm:$0xff]  }
  0x33   : > { %5939 = vmatprep.mubr.msk.bf16.mxu0 %vm1587_vm0, %v6354_v17  ;;  %6135 = vmatprep.mubr.msk.bf16.mxu1 %vm1587_vm0, %v6355_v18  ;;  %v6418_v17 = vld [vmem:[%s6592_s26 + $0x130] sm:$0xff]   ;;  %v6419_v18 = vld [vmem:[%s6592_s26 + $0x440] sm:$0xff]  }
  0x3a   : > { %5940 = vmatmul.mubr.msk.bf16.gmra.mrb[12].mxu0 %vm1587_vm0, %v6356_v19  ;;  %6136 = vmatmul.mubr.msk.bf16.gmra.mrb[12].mxu1 %vm1587_vm0, %v6357_v20  ;;  %v6420_v19 = vld [vmem:[%s6592_s26 + $0x138] sm:$0xff]   ;;  %v6421_v20 = vld [vmem:[%s6592_s26 + $0x448] sm:$0xff]  }
  0x3b   : > { %5943 = vmatprep.mubr.msk.bf16.mxu0 %vm1587_vm0, %v6358_v21  ;;  %6139 = vmatprep.mubr.msk.bf16.mxu1 %vm1587_vm0, %v6359_v22  ;;  %v6422_v21 = vld [vmem:[%s6592_s26 + $0x140] sm:$0xff]   ;;  %v6423_v22 = vld [vmem:[%s6592_s26 + $0x450] sm:$0xff]  }
  0x42   : > { %5944 = vmatmul.mubr.msk.bf16.gmra.mrb[16].mxu0 %vm1587_vm0, %v6360_v23  ;;  %6140 = vmatmul.mubr.msk.bf16.gmra.mrb[16].mxu1 %vm1587_vm0, %v6361_v24  ;;  %v6424_v23 = vld [vmem:[%s6592_s26 + $0x148] sm:$0xff]   ;;  %v6425_v24 = vld [vmem:[%s6592_s26 + $0x458] sm:$0xff]  }
  0x43   : > { %5947 = vmatprep.mubr.msk.bf16.mxu0 %vm1587_vm0, %v6362_v25  ;;  %6143 = vmatprep.mubr.msk.bf16.mxu1 %vm1587_vm0, %v6363_v26  ;;  %v6426_v25 = vld [vmem:[%s6592_s26 + $0x150] sm:$0xff]   ;;  %v6427_v26 = vld [vmem:[%s6592_s26 + $0x460] sm:$0xff]  }
  0x4a   : > { %5948 = vmatmul.mubr.msk.bf16.gmra.mrb[20].mxu0 %vm1587_vm0, %v6364_v27  ;;  %6144 = vmatmul.mubr.msk.bf16.gmra.mrb[20].mxu1 %vm1587_vm0, %v6365_v28  ;;  %v6428_v27 = vld [vmem:[%s6592_s26 + $0x158] sm:$0xff]   ;;  %v6429_v28 = vld [vmem:[%s6592_s26 + $0x468] sm:$0xff]  }
  0x4b   : > { %5951 = vmatprep.mubr.msk.bf16.mxu0 %vm1587_vm0, %v6366_v29  ;;  %6147 = vmatprep.mubr.msk.bf16.mxu1 %vm1587_vm0, %v6367_v30  ;;  %v6430_v29 = vld [vmem:[%s6592_s26 + $0x160] sm:$0xff]   ;;  %v6431_v30 = vld [vmem:[%s6592_s26 + $0x470] sm:$0xff]  }
  0x52   : > { %5952 = vmatmul.mubr.msk.bf16.gmra.mrb[24].mxu0 %vm1587_vm0, %v6368_v31  ;;  %6148 = vmatmul.mubr.msk.bf16.gmra.mrb[24].mxu1 %vm1587_vm0, %v6369_v32  ;;  %v6432_v31 = vld [vmem:[%s6592_s26 + $0x168] sm:$0xff]   ;;  %v6433_v32 = vld [vmem:[%s6592_s26 + $0x478] sm:$0xff]  }
  0x53   : > { %5955 = vmatprep.mubr.msk.bf16.mxu0 %vm1587_vm0, %v6370_v33  ;;  %6151 = vmatprep.mubr.msk.bf16.mxu1 %vm1587_vm0, %v6371_v34  ;;  %v6434_v33 = vld [vmem:[%s6592_s26 + $0x170] sm:$0xff]   ;;  %v6435_v34 = vld [vmem:[%s6592_s26 + $0x480] sm:$0xff]  }
  0x5a   : > { %5956 = vmatmul.mubr.msk.bf16.gmra.mrb[28].mxu0 %vm1587_vm0, %v6372_v35  ;;  %6152 = vmatmul.mubr.msk.bf16.gmra.mrb[28].mxu1 %vm1587_vm0, %v6373_v36  ;;  %v6436_v35 = vld [vmem:[%s6592_s26 + $0x178] sm:$0xff]   ;;  %v6437_v36 = vld [vmem:[%s6592_s26 + $0x488] sm:$0xff]  }
  0x5b   : > { %5959 = vmatprep.mubr.msk.bf16.mxu0 %vm1587_vm0, %v6374_v37  ;;  %6155 = vmatprep.mubr.msk.bf16.mxu1 %vm1587_vm0, %v6375_v38  ;;  %v6438_v37 = vld [vmem:[%s6592_s26 + $0x180] sm:$0xff]   ;;  %v6439_v38 = vld [vmem:[%s6592_s26 + $0x490] sm:$0xff]  }
  0x62   : > { %5960 = vmatmul.mubr.msk.bf16.gmra.mrb[32].mxu0 %vm1587_vm0, %v6376_v39  ;;  %6156 = vmatmul.mubr.msk.bf16.gmra.mrb[32].mxu1 %vm1587_vm0, %v6377_v40  ;;  %v6440_v39 = vld [vmem:[%s6592_s26 + $0x188] sm:$0xff]   ;;  %v6441_v40 = vld [vmem:[%s6592_s26 + $0x498] sm:$0xff]  }
  0x63   : > { %5963 = vmatprep.mubr.msk.bf16.mxu0 %vm1587_vm0, %v6378_v41  ;;  %6159 = vmatprep.mubr.msk.bf16.mxu1 %vm1587_vm0, %v6379_v42  ;;  %v6442_v41 = vld [vmem:[%s6592_s26 + $0x190] sm:$0xff]   ;;  %v6443_v42 = vld [vmem:[%s6592_s26 + $0x4a0] sm:$0xff]  }
  0x6a   : > { %5964 = vmatmul.mubr.msk.bf16.gmra.mrb[36].mxu0 %vm1587_vm0, %v6380_v43  ;;  %6160 = vmatmul.mubr.msk.bf16.gmra.mrb[36].mxu1 %vm1587_vm0, %v6381_v44  ;;  %v6444_v43 = vld [vmem:[%s6592_s26 + $0x198] sm:$0xff]   ;;  %v6445_v44 = vld [vmem:[%s6592_s26 + $0x4a8] sm:$0xff]  }
  0x6b   : > { %5967 = vmatprep.mubr.msk.bf16.mxu0 %vm1587_vm0, %v6382_v45  ;;  %6163 = vmatprep.mubr.msk.bf16.mxu1 %vm1587_vm0, %v6383_v46  ;;  %v6446_v45 = vld [vmem:[%s6592_s26 + $0x1a0] sm:$0xff]   ;;  %v6447_v46 = vld [vmem:[%s6592_s26 + $0x4b0] sm:$0xff]  }
  0x72   : > { %5968 = vmatmul.mubr.msk.bf16.gmra.mrb[40].mxu0 %vm1587_vm0, %v6384_v47  ;;  %6164 = vmatmul.mubr.msk.bf16.gmra.mrb[40].mxu1 %vm1587_vm0, %v6385_v48  ;;  %v6448_v47 = vld [vmem:[%s6592_s26 + $0x1a8] sm:$0xff]   ;;  %v6449_v48 = vld [vmem:[%s6592_s26 + $0x4b8] sm:$0xff]  }
  0x73   : > { %5971 = vmatprep.mubr.msk.bf16.mxu0 %vm1587_vm0, %v6386_v49  ;;  %6167 = vmatprep.mubr.msk.bf16.mxu1 %vm1587_vm0, %v6387_v50  ;;  %v6450_v49 = vld [vmem:[%s6592_s26 + $0x1b0] sm:$0xff]   ;;  %v6451_v50 = vld [vmem:[%s6592_s26 + $0x4c0] sm:$0xff]  }
  0x7a   : > { %5972 = vmatmul.mubr.msk.bf16.gmra.mrb[44].mxu0 %vm1587_vm0, %v6388_v51  ;;  %6168 = vmatmul.mubr.msk.bf16.gmra.mrb[44].mxu1 %vm1587_vm0, %v6389_v52 }
  0x7b   : > { %5975 = vmatprep.mubr.msk.bf16.mxu0 %vm1587_vm0, %v6390_v53  ;;  %6171 = vmatprep.mubr.msk.bf16.mxu1 %vm1587_vm0, %v6391_v54 }
  0x82   : > { %5976 = vmatmul.mubr.msk.bf16.gmra.mrb[48].mxu0 %vm1587_vm0, %v6392_v55  ;;  %6172 = vmatmul.mubr.msk.bf16.gmra.mrb[48].mxu1 %vm1587_vm0, %v6393_v56  ;;  %v6452_v55 = vld [vmem:[%s6592_s26 + $0x1b8] sm:$0xff]   ;;  %v6453_v56 = vld [vmem:[%s6592_s26 + $0x4c8] sm:$0xff]  }
  0x83   : > { %5979 = vmatprep.mubr.msk.bf16.mxu0 %vm1587_vm0, %v6394_v57  ;;  %6175 = vmatprep.mubr.msk.bf16.mxu1 %vm1587_vm0, %v6395_v58 }
  0x8a   : > { %5980 = vmatmul.mubr.msk.bf16.gmra.mrb[52].mxu0 %vm1587_vm0, %v6396_v59  ;;  %6176 = vmatmul.mubr.msk.bf16.gmra.mrb[52].mxu1 %vm1587_vm0, %v6397_v60  ;;  %v6454_v59 = vld [vmem:[%s6592_s26 + $0x1c0] sm:$0xff]   ;;  %v6455_v60 = vld [vmem:[%s6592_s26 + $0x4d0] sm:$0xff]  }
  0x8b   : > { %5983 = vmatprep.mubr.msk.bf16.mxu0 %vm1587_vm0, %v6398_v61  ;;  %6179 = vmatprep.mubr.msk.bf16.mxu1 %vm1587_vm0, %v6399_v62 }
  0x92   : > { %5984 = vmatmul.mubr.msk.bf16.gmra.mrb[56].mxu0 %vm1587_vm0, %v6400_v63  ;;  %6180 = vmatmul.mubr.msk.bf16.gmra.mrb[56].mxu1 %vm1587_vm0, %v6401_v0 }
  0x93   : > { %5987 = vmatprep.mubr.msk.bf16.mxu0 %vm1587_vm0, %v6402_v1  ;;  %6183 = vmatprep.mubr.msk.bf16.mxu1 %vm1587_vm0, %v6403_v2 }
  0x9a   : > { %5988 = vmatmul.mubr.msk.bf16.gmra.mrb[60].mxu0 %vm1587_vm0, %v6404_v3  ;;  %6184 = vmatmul.mubr.msk.bf16.gmra.mrb[60].mxu1 %vm1587_vm0, %v6405_v4  ;;  %v6456_v3 = vld [vmem:[%s6592_s26 + $0x1c8] sm:$0xff]   ;;  %v6457_v4 = vld [vmem:[%s6592_s26 + $0x4d8] sm:$0xff]  }
  0x9b   : > { %5991 = vmatprep.mubr.msk.bf16.mxu0 %vm1587_vm0, %v6406_v5  ;;  %6187 = vmatprep.mubr.msk.bf16.mxu1 %vm1587_vm0, %v6407_v6 }
  0xa2   : > { %5992 = vmatmul.mubr.msk.bf16.gmra.mrb[64].mxu0 %vm1587_vm0, %v6408_v7  ;;  %6188 = vmatmul.mubr.msk.bf16.gmra.mrb[64].mxu1 %vm1587_vm0, %v6409_v8  ;;  %v6458_v7 = vld [vmem:[%s6592_s26 + $0x1d0] sm:$0xff]   ;;  %v6459_v8 = vld [vmem:[%s6592_s26 + $0x4e0] sm:$0xff]  }
  0xa3   : > { %5995 = vmatprep.mubr.msk.bf16.mxu0 %vm1587_vm0, %v6410_v9  ;;  %6191 = vmatprep.mubr.msk.bf16.mxu1 %vm1587_vm0, %v6411_v10 }
  0xaa   : > { %5996 = vmatmul.mubr.msk.bf16.gmra.mrb[68].mxu0 %vm1587_vm0, %v6412_v11  ;;  %6192 = vmatmul.mubr.msk.bf16.gmra.mrb[68].mxu1 %vm1587_vm0, %v6413_v12 }
  0xab   : > { %5999 = vmatprep.mubr.msk.bf16.mxu0 %vm1587_vm0, %v6414_v13  ;;  %6195 = vmatprep.mubr.msk.bf16.mxu1 %vm1587_vm0, %v6415_v14 }
  0xb2   : > { %6000 = vmatmul.mubr.msk.bf16.gmra.mrb[72].mxu0 %vm1587_vm0, %v6416_v15  ;;  %6196 = vmatmul.mubr.msk.bf16.gmra.mrb[72].mxu1 %vm1587_vm0, %v6417_v16  ;;  %v6460_v15 = vld [vmem:[%s6592_s26 + $0x1d8] sm:$0xff]   ;;  %v6461_v16 = vld [vmem:[%s6592_s26 + $0x4e8] sm:$0xff]  }
  0xb3   : > { %6003 = vmatprep.mubr.msk.bf16.mxu0 %vm1587_vm0, %v6418_v17  ;;  %6199 = vmatprep.mubr.msk.bf16.mxu1 %vm1587_vm0, %v6419_v18 }
  0xba   : > { %6004 = vmatmul.mubr.msk.bf16.gmra.mrb[76].mxu0 %vm1587_vm0, %v6420_v19  ;;  %6200 = vmatmul.mubr.msk.bf16.gmra.mrb[76].mxu1 %vm1587_vm0, %v6421_v20  ;;  %v6462_v19 = vld [vmem:[%s6592_s26 + $0x1e0] sm:$0xff]   ;;  %v6463_v20 = vld [vmem:[%s6592_s26 + $0x4f0] sm:$0xff]  }
  0xbb   : > { %6007 = vmatprep.mubr.msk.bf16.mxu0 %vm1587_vm0, %v6422_v21  ;;  %6203 = vmatprep.mubr.msk.bf16.mxu1 %vm1587_vm0, %v6423_v22 }
  0xc2   : > { %6008 = vmatmul.mubr.msk.bf16.gmra.mrb[80].mxu0 %vm1587_vm0, %v6424_v23  ;;  %6204 = vmatmul.mubr.msk.bf16.gmra.mrb[80].mxu1 %vm1587_vm0, %v6425_v24 }
  0xc3   : > { %6011 = vmatprep.mubr.msk.bf16.mxu0 %vm1587_vm0, %v6426_v25  ;;  %6207 = vmatprep.mubr.msk.bf16.mxu1 %vm1587_vm0, %v6427_v26 }
  0xca   : > { %6012 = vmatmul.mubr.msk.bf16.gmra.mrb[84].mxu0 %vm1587_vm0, %v6428_v27  ;;  %6208 = vmatmul.mubr.msk.bf16.gmra.mrb[84].mxu1 %vm1587_vm0, %v6429_v28  ;;  %v6464_v27 = vld [vmem:[%s6592_s26 + $0x1e8] sm:$0xff]   ;;  %v6465_v28 = vld [vmem:[%s6592_s26 + $0x4f8] sm:$0xff]  }
  0xcb   : > { %6015 = vmatprep.mubr.msk.bf16.mxu0 %vm1587_vm0, %v6430_v29  ;;  %6211 = vmatprep.mubr.msk.bf16.mxu1 %vm1587_vm0, %v6431_v30 }
  0xd2   : > { %6016 = vmatmul.mubr.msk.bf16.gmra.mrb[88].mxu0 %vm1587_vm0, %v6432_v31  ;;  %6212 = vmatmul.mubr.msk.bf16.gmra.mrb[88].mxu1 %vm1587_vm0, %v6433_v32  ;;  %v6466_v31 = vld [vmem:[%s6592_s26 + $0x1f0] sm:$0xff]   ;;  %v6467_v32 = vld [vmem:[%s6592_s26 + $0x500] sm:$0xff]  }
  0xd3   : > { %6019 = vmatprep.mubr.msk.bf16.mxu0 %vm1587_vm0, %v6434_v33  ;;  %6215 = vmatprep.mubr.msk.bf16.mxu1 %vm1587_vm0, %v6435_v34 }
  0xda   : > { %6020 = vmatmul.mubr.msk.bf16.gmra.mrb[92].mxu0 %vm1587_vm0, %v6436_v35  ;;  %6216 = vmatmul.mubr.msk.bf16.gmra.mrb[92].mxu1 %vm1587_vm0, %v6437_v36 }
  0xdb   : > { %6023 = vmatprep.mubr.msk.bf16.mxu0 %vm1587_vm0, %v6438_v37  ;;  %6219 = vmatprep.mubr.msk.bf16.mxu1 %vm1587_vm0, %v6439_v38 }
  0xe2   : > { %6024 = vmatmul.mubr.msk.bf16.gmra.mrb[96].mxu0 %vm1587_vm0, %v6440_v39  ;;  %6220 = vmatmul.mubr.msk.bf16.gmra.mrb[96].mxu1 %vm1587_vm0, %v6441_v40  ;;  %v6468_v39 = vld [vmem:[%s6592_s26 + $0x1f8] sm:$0xff]   ;;  %v6469_v40 = vld [vmem:[%s6592_s26 + $0x508] sm:$0xff]  }
  0xe3   : > { %6027 = vmatprep.mubr.msk.bf16.mxu0 %vm1587_vm0, %v6442_v41  ;;  %6223 = vmatprep.mubr.msk.bf16.mxu1 %vm1587_vm0, %v6443_v42 }
  0xea   : > { %6028 = vmatmul.mubr.msk.bf16.gmra.mrb[100].mxu0 %vm1587_vm0, %v6444_v43  ;;  %6224 = vmatmul.mubr.msk.bf16.gmra.mrb[100].mxu1 %vm1587_vm0, %v6445_v44  ;;  %v6470_v43 = vld [vmem:[%s6592_s26 + $0x200] sm:$0xff]   ;;  %v6471_v44 = vld [vmem:[%s6592_s26 + $0x510] sm:$0xff]  }
  0xeb   : > { %6031 = vmatprep.mubr.msk.bf16.mxu0 %vm1587_vm0, %v6446_v45  ;;  %6227 = vmatprep.mubr.msk.bf16.mxu1 %vm1587_vm0, %v6447_v46 }
  0xf2   : > { %6032 = vmatmul.mubr.msk.bf16.gmra.mrb[104].mxu0 %vm1587_vm0, %v6448_v47  ;;  %6228 = vmatmul.mubr.msk.bf16.gmra.mrb[104].mxu1 %vm1587_vm0, %v6449_v48 }
  0xf3   : > { %6035 = vmatprep.mubr.msk.bf16.mxu0 %vm1587_vm0, %v6450_v49  ;;  %6231 = vmatprep.mubr.msk.bf16.mxu1 %vm1587_vm0, %v6451_v50 }
  0xf5   : > { %v6817_v51 = vpop.f32.mrb[0].mxu0  ;;  %v6819_v52 = vpop.f32.mrb[0].mxu1 }
  0xf6   : > { %v6821_v53 = vpop.f32.mrb[1].mxu0  ;;  %v6823_v54 = vpop.f32.mrb[1].mxu1 }
  0xf7   : > { %v6827_v57 = vpop.f32.mrb[2].mxu0  ;;  %v6829_v58 = vpop.f32.mrb[2].mxu1 }
  0xf8   : > { %v6833_v61 = vpop.f32.mrb[3].mxu0  ;;  %v6835_v62 = vpop.f32.mrb[3].mxu1 }
  0xfa   : > { %6036 = vmatmul.mubr.msk.bf16.gmra.mrb[108].mxu0 %vm1587_vm0, %v6452_v55  ;;  %6232 = vmatmul.mubr.msk.bf16.gmra.mrb[108].mxu1 %vm1587_vm0, %v6453_v56  ;;  %v6472_v55 = vld [vmem:[%s6592_s26 + $0x208] sm:$0xff]   ;;  %v6473_v56 = vld [vmem:[%s6592_s26 + $0x518] sm:$0xff]  }
  0xfb   : > { %6039 = vmatprep.mubr.msk.bf16.mxu0 %vm1587_vm0, %v6454_v59  ;;  %6235 = vmatprep.mubr.msk.bf16.mxu1 %vm1587_vm0, %v6455_v60 }
  0xfd   : > { %v6841_v63 = vpop.f32.mrb[4].mxu0  ;;  %v6843_v0 = vpop.f32.mrb[4].mxu1 }
  0xfe   : > { %v6845_v1 = vpop.f32.mrb[5].mxu0  ;;  %v6847_v2 = vpop.f32.mrb[5].mxu1 }
  0xff   : > { %v6851_v5 = vpop.f32.mrb[6].mxu0  ;;  %v6853_v6 = vpop.f32.mrb[6].mxu1 }
 0x100   : > { %v6857_v9 = vpop.f32.mrb[7].mxu0  ;;  %v6859_v10 = vpop.f32.mrb[7].mxu1 }
 0x102   : > { %6040 = vmatmul.mubr.msk.bf16.gmra.mrb[112].mxu0 %vm1587_vm0, %v6456_v3  ;;  %6236 = vmatmul.mubr.msk.bf16.gmra.mrb[112].mxu1 %vm1587_vm0, %v6457_v4  ;;  %v6474_v3 = vld [vmem:[%s6592_s26 + $0x210] sm:$0xff]   ;;  %v6475_v4 = vld [vmem:[%s6592_s26 + $0x520] sm:$0xff]  }
 0x103   : > { %6043 = vmatprep.mubr.msk.bf16.mxu0 %vm1587_vm0, %v6458_v7  ;;  %6239 = vmatprep.mubr.msk.bf16.mxu1 %vm1587_vm0, %v6459_v8 }
 0x105   : > { %v6865_v11 = vpop.f32.mrb[8].mxu0  ;;  %v6867_v12 = vpop.f32.mrb[8].mxu1 }
 0x106   : > { %v6869_v13 = vpop.f32.mrb[9].mxu0  ;;  %v6871_v14 = vpop.f32.mrb[9].mxu1 }
 0x107   : > { %v6875_v17 = vpop.f32.mrb[10].mxu0  ;;  %v6877_v18 = vpop.f32.mrb[10].mxu1 }
 0x108   : > { %v6881_v21 = vpop.f32.mrb[11].mxu0  ;;  %v6883_v22 = vpop.f32.mrb[11].mxu1 }
 0x10a   : > { %6044 = vmatmul.mubr.msk.bf16.gmra.mrb[116].mxu0 %vm1587_vm0, %v6460_v15  ;;  %6240 = vmatmul.mubr.msk.bf16.gmra.mrb[116].mxu1 %vm1587_vm0, %v6461_v16 }
 0x10b   : > { %6047 = vmatprep.mubr.msk.bf16.mxu0 %vm1587_vm0, %v6462_v19  ;;  %6243 = vmatprep.mubr.msk.bf16.mxu1 %vm1587_vm0, %v6463_v20 }
 0x10d   : > { %v6889_v23 = vpop.f32.mrb[12].mxu0  ;;  %v6891_v24 = vpop.f32.mrb[12].mxu1 }
 0x10e   : > { %v6893_v25 = vpop.f32.mrb[13].mxu0  ;;  %v6895_v26 = vpop.f32.mrb[13].mxu1 }
 0x10f   : > { %v6899_v29 = vpop.f32.mrb[14].mxu0  ;;  %v6901_v30 = vpop.f32.mrb[14].mxu1 }
 0x110   : > { %v6905_v33 = vpop.f32.mrb[15].mxu0  ;;  %v6907_v34 = vpop.f32.mrb[15].mxu1 }
 0x112   : > { %6048 = vmatmul.mubr.msk.bf16.gmra.mrb[120].mxu0 %vm1587_vm0, %v6464_v27  ;;  %6244 = vmatmul.mubr.msk.bf16.gmra.mrb[120].mxu1 %vm1587_vm0, %v6465_v28  ;;  %v6476_v27 = vld [vmem:[%s6592_s26 + $0x218] sm:$0xff]   ;;  %v6477_v28 = vld [vmem:[%s6592_s26 + $0x528] sm:$0xff]  }
 0x113   : > { %6051 = vmatprep.mubr.msk.bf16.mxu0 %vm1587_vm0, %v6466_v31  ;;  %6247 = vmatprep.mubr.msk.bf16.mxu1 %vm1587_vm0, %v6467_v32 }
 0x115   : > { %v6913_v35 = vpop.f32.mrb[16].mxu0  ;;  %v6915_v36 = vpop.f32.mrb[16].mxu1 }
 0x116   : > { %v6917_v37 = vpop.f32.mrb[17].mxu0  ;;  %v6919_v38 = vpop.f32.mrb[17].mxu1 }
 0x117   : > { %v6923_v41 = vpop.f32.mrb[18].mxu0  ;;  %v6925_v42 = vpop.f32.mrb[18].mxu1 }
 0x118   : > { %v6929_v45 = vpop.f32.mrb[19].mxu0  ;;  %v6931_v46 = vpop.f32.mrb[19].mxu1 }
 0x11a   : > { %6052 = vmatmul.mubr.msk.bf16.gmra.mrb[124].mxu0 %vm1587_vm0, %v6468_v39  ;;  %6248 = vmatmul.mubr.msk.bf16.gmra.mrb[124].mxu1 %vm1587_vm0, %v6469_v40  ;;  %v6478_v39 = vld [vmem:[%s6592_s26 + $0x220] sm:$0xff]   ;;  %v6479_v40 = vld [vmem:[%s6592_s26 + $0x530] sm:$0xff]  }
 0x11b   : > { %6055 = vmatprep.mubr.msk.bf16.mxu0 %vm1587_vm0, %v6470_v43  ;;  %6251 = vmatprep.mubr.msk.bf16.mxu1 %vm1587_vm0, %v6471_v44 }
 0x11d   : > { %v6937_v47 = vpop.f32.mrb[20].mxu0  ;;  %v6939_v48 = vpop.f32.mrb[20].mxu1 }
 0x11e   : > { %v6941_v49 = vpop.f32.mrb[21].mxu0  ;;  %v6943_v50 = vpop.f32.mrb[21].mxu1 }
 0x11f   : > { %v6947_v59 = vpop.f32.mrb[22].mxu0  ;;  %v6949_v60 = vpop.f32.mrb[22].mxu1 }
 0x120   : > { %7748 = vst [vmem:[#allocation2_spill] sm:$0xff] %v6947_v59  ;;  %7749 = vst [vmem:[#allocation3_spill] sm:$0xff] %v6949_v60  ;;  %v6953_v7 = vpop.f32.mrb[23].mxu0  ;;  %v6955_v8 = vpop.f32.mrb[23].mxu1 }
 0x122   : > { %6056 = vmatmul.mubr.msk.bf16.gmra.mrb[128].mxu0 %vm1587_vm0, %v6472_v55  ;;  %6252 = vmatmul.mubr.msk.bf16.gmra.mrb[128].mxu1 %vm1587_vm0, %v6473_v56 }
 0x123   : > { %6059 = vmatprep.mubr.msk.bf16.mxu0 %vm1587_vm0, %v6474_v3  ;;  %6255 = vmatprep.mubr.msk.bf16.mxu1 %vm1587_vm0, %v6475_v4 }
 0x125   : > { %v6961_v15 = vpop.f32.mrb[24].mxu0  ;;  %v6963_v16 = vpop.f32.mrb[24].mxu1 }
 0x126   : > { %7750 = vst [vmem:[#allocation4_spill] sm:$0xff] %v6961_v15  ;;  %7751 = vst [vmem:[#allocation5_spill] sm:$0xff] %v6963_v16  ;;  %v6965_v19 = vpop.f32.mrb[25].mxu0  ;;  %v6967_v20 = vpop.f32.mrb[25].mxu1 }
 0x127   : > { %v6971_v31 = vpop.f32.mrb[26].mxu0  ;;  %v6973_v32 = vpop.f32.mrb[26].mxu1 }
 0x128   : > { %7752 = vst [vmem:[#allocation6_spill] sm:$0xff] %v6971_v31  ;;  %7753 = vst [vmem:[#allocation7_spill] sm:$0xff] %v6973_v32  ;;  %v6977_v43 = vpop.f32.mrb[27].mxu0  ;;  %v6979_v44 = vpop.f32.mrb[27].mxu1  ;;  %v6480_v32 = vld [vmem:[%s6592_s26 + $0x228] sm:$0xff]   ;;  %v6481_v31 = vld [vmem:[%s6592_s26 + $0x538] sm:$0xff]  }
 0x129   : > { %7754 = vst [vmem:[#allocation8_spill] sm:$0xff] %v6979_v44 }
 0x12a   : > { %6060 = vmatmul.mubr.msk.bf16.gmra.mrb[132].mxu0 %vm1587_vm0, %v6476_v27  ;;  %6256 = vmatmul.mubr.msk.bf16.gmra.mrb[132].mxu1 %vm1587_vm0, %v6477_v28  ;;  %v6482_v28 = vld [vmem:[%s6592_s26 + $0x230] sm:$0xff]  }
 0x12b   : > { %6063 = vmatprep.mubr.msk.bf16.mxu0 %vm1587_vm0, %v6478_v39  ;;  %6259 = vmatprep.mubr.msk.bf16.mxu1 %vm1587_vm0, %v6479_v40  ;;  %v6483_v39 = vld [vmem:[%s6592_s26 + $0x540] sm:$0xff]  }
 0x12d   : > { %v6985_v55 = vpop.f32.mrb[28].mxu0  ;;  %v6987_v56 = vpop.f32.mrb[28].mxu1 }
 0x12e   : > { %7755 = vst [vmem:[#allocation9_spill] sm:$0xff] %v6985_v55  ;;  %7756 = vst [vmem:[#allocation10_spill] sm:$0xff] %v6987_v56  ;;  %v6989_v3 = vpop.f32.mrb[29].mxu0  ;;  %v6991_v4 = vpop.f32.mrb[29].mxu1 }
 0x12f   : > { %7757 = vst [vmem:[#allocation11_spill] sm:$0xff] %v6989_v3  ;;  %7758 = vst [vmem:[#allocation12_spill] sm:$0xff] %v6991_v4  ;;  %v6995_v16 = vpop.f32.mrb[30].mxu0  ;;  %v6997_v27 = vpop.f32.mrb[30].mxu1  ;;  %v6484_v4 = vld [vmem:[%s6592_s26 + $0x238] sm:$0xff]  }
 0x130   : > { %7759 = vst [vmem:[#allocation13_spill] sm:$0xff] %v6995_v16  ;;  %7760 = vst [vmem:[#allocation14_spill] sm:$0xff] %v6997_v27  ;;  %v7001_v40 = vpop.f32.mrb[31].mxu0  ;;  %v7003_v55 = vpop.f32.mrb[31].mxu1 }
 0x131   : > { %7761 = vst [vmem:[#allocation15_spill] sm:$0xff] %v7001_v40  ;;  %7762 = vst [vmem:[#allocation16_spill] sm:$0xff] %v7003_v55  ;;  %v6485_v40 = vld [vmem:[%s6592_s26 + $0x548] sm:$0xff]  }
 0x132   : > { %6064 = vmatmul.mubr.msk.bf16.gmra.mrb[136].mxu0 %vm1587_vm0, %v6480_v32  ;;  %6260 = vmatmul.mubr.msk.bf16.gmra.mrb[136].mxu1 %vm1587_vm0, %v6481_v31  ;;  %v6486_v31 = vld [vmem:[%s6592_s26 + $0x240] sm:$0xff]  }
 0x133   : > { %6067 = vmatprep.mubr.msk.bf16.mxu0 %vm1587_vm0, %v6482_v28  ;;  %6263 = vmatprep.mubr.msk.bf16.mxu1 %vm1587_vm0, %v6483_v39  ;;  %v6487_v28 = vld [vmem:[%s6592_s26 + $0x550] sm:$0xff]  }
 0x135   : > { %v7009_v56 = vpop.f32.mrb[32].mxu0  ;;  %v7011_v16 = vpop.f32.mrb[32].mxu1 }
 0x136   : > { %7763 = vst [vmem:[#allocation17_spill] sm:$0xff] %v7009_v56  ;;  %7764 = vst [vmem:[#allocation18_spill] sm:$0xff] %v7011_v16  ;;  %v7013_v27 = vpop.f32.mrb[33].mxu0  ;;  %v7015_v15 = vpop.f32.mrb[33].mxu1 }
 0x137   : > { %7765 = vst [vmem:[#allocation19_spill] sm:$0xff] %v7013_v27  ;;  %7766 = vst [vmem:[#allocation20_spill] sm:$0xff] %v7015_v15  ;;  %v7019_v55 = vpop.f32.mrb[34].mxu0  ;;  %v7021_v32 = vpop.f32.mrb[34].mxu1  ;;  %v6488_v27 = vld [vmem:[%s6592_s26 + $0x248] sm:$0xff]  }
 0x138   : > { %7767 = vst [vmem:[#allocation21_spill] sm:$0xff] %v7019_v55  ;;  %7768 = vst [vmem:[#allocation22_spill] sm:$0xff] %v7021_v32  ;;  %v7025_v39 = vpop.f32.mrb[35].mxu0  ;;  %v7027_v56 = vpop.f32.mrb[35].mxu1 }
 0x139   : > { %7769 = vst [vmem:[#allocation23_spill] sm:$0xff] %v7025_v39  ;;  %7770 = vst [vmem:[#allocation24_spill] sm:$0xff] %v7027_v56  ;;  %v6489_v39 = vld [vmem:[%s6592_s26 + $0x558] sm:$0xff]  }
 0x13a   : > { %6068 = vmatmul.mubr.msk.bf16.gmra.mrb[140].mxu0 %vm1587_vm0, %v6484_v4  ;;  %6264 = vmatmul.mubr.msk.bf16.gmra.mrb[140].mxu1 %vm1587_vm0, %v6485_v40  ;;  %v6490_v40 = vld [vmem:[%s6592_s26 + $0x250] sm:$0xff]  }
 0x13b   : > { %6071 = vmatprep.mubr.msk.bf16.mxu0 %vm1587_vm0, %v6486_v31  ;;  %6267 = vmatprep.mubr.msk.bf16.mxu1 %vm1587_vm0, %v6487_v28  ;;  %v6491_v31 = vld [vmem:[%s6592_s26 + $0x560] sm:$0xff]  }
 0x13d   : > { %v7033_v16 = vpop.f32.mrb[36].mxu0  ;;  %v7035_v55 = vpop.f32.mrb[36].mxu1 }
 0x13e   : > { %7771 = vst [vmem:[#allocation25_spill] sm:$0xff] %v7033_v16  ;;  %7772 = vst [vmem:[#allocation26_spill] sm:$0xff] %v7035_v55  ;;  %v7037_v32 = vpop.f32.mrb[37].mxu0  ;;  %v7039_v15 = vpop.f32.mrb[37].mxu1 }
 0x13f   : > { %7773 = vst [vmem:[#allocation27_spill] sm:$0xff] %v7037_v32  ;;  %7774 = vst [vmem:[#allocation28_spill] sm:$0xff] %v7039_v15  ;;  %v7043_v56 = vpop.f32.mrb[38].mxu0  ;;  %v7045_v4 = vpop.f32.mrb[38].mxu1  ;;  %v6492_v32 = vld [vmem:[%s6592_s26 + $0x258] sm:$0xff]  }
 0x140   : > { %7775 = vst [vmem:[#allocation29_spill] sm:$0xff] %v7043_v56  ;;  %7776 = vst [vmem:[#allocation30_spill] sm:$0xff] %v7045_v4  ;;  %v7049_v28 = vpop.f32.mrb[39].mxu0  ;;  %v7051_v16 = vpop.f32.mrb[39].mxu1 }
 0x141   : > { %7777 = vst [vmem:[#allocation31_spill] sm:$0xff] %v7049_v28  ;;  %7778 = vst [vmem:[#allocation32_spill] sm:$0xff] %v7051_v16  ;;  %v6493_v28 = vld [vmem:[%s6592_s26 + $0x568] sm:$0xff]  }
 0x142   : > { %6072 = vmatmul.mubr.msk.bf16.gmra.mrb[144].mxu0 %vm1587_vm0, %v6488_v27  ;;  %6268 = vmatmul.mubr.msk.bf16.gmra.mrb[144].mxu1 %vm1587_vm0, %v6489_v39  ;;  %v6494_v39 = vld [vmem:[%s6592_s26 + $0x260] sm:$0xff]  }
 0x143   : > { %6075 = vmatprep.mubr.msk.bf16.mxu0 %vm1587_vm0, %v6490_v40  ;;  %6271 = vmatprep.mubr.msk.bf16.mxu1 %vm1587_vm0, %v6491_v31  ;;  %v6495_v40 = vld [vmem:[%s6592_s26 + $0x570] sm:$0xff]  }
 0x145   : > { %v7057_v55 = vpop.f32.mrb[40].mxu0  ;;  %v7059_v56 = vpop.f32.mrb[40].mxu1 }
 0x146   : > { %7779 = vst [vmem:[#allocation33_spill] sm:$0xff] %v7057_v55  ;;  %7780 = vst [vmem:[#allocation34_spill] sm:$0xff] %v7059_v56  ;;  %v7061_v4 = vpop.f32.mrb[41].mxu0  ;;  %v7063_v15 = vpop.f32.mrb[41].mxu1 }
 0x147   : > { %7781 = vst [vmem:[#allocation35_spill] sm:$0xff] %v7061_v4  ;;  %7782 = vst [vmem:[#allocation36_spill] sm:$0xff] %v7063_v15  ;;  %v7067_v16 = vpop.f32.mrb[42].mxu0  ;;  %v7069_v27 = vpop.f32.mrb[42].mxu1  ;;  %v6496_v4 = vld [vmem:[%s6592_s26 + $0x268] sm:$0xff]  }
 0x148   : > { %7783 = vst [vmem:[#allocation37_spill] sm:$0xff] %v7067_v16  ;;  %7784 = vst [vmem:[#allocation38_spill] sm:$0xff] %v7069_v27  ;;  %v7073_v31 = vpop.f32.mrb[43].mxu0  ;;  %v7075_v55 = vpop.f32.mrb[43].mxu1 }
 0x149   : > { %7785 = vst [vmem:[#allocation39_spill] sm:$0xff] %v7073_v31  ;;  %7786 = vst [vmem:[#allocation40_spill] sm:$0xff] %v7075_v55  ;;  %v6497_v31 = vld [vmem:[%s6592_s26 + $0x578] sm:$0xff]  }
 0x14a   : > { %6076 = vmatmul.mubr.msk.bf16.gmra.mrb[148].mxu0 %vm1587_vm0, %v6492_v32  ;;  %6272 = vmatmul.mubr.msk.bf16.gmra.mrb[148].mxu1 %vm1587_vm0, %v6493_v28  ;;  %v6498_v28 = vld [vmem:[%s6592_s26 + $0x270] sm:$0xff]  }
 0x14b   : > { %6079 = vmatprep.mubr.msk.bf16.mxu0 %vm1587_vm0, %v6494_v39  ;;  %6275 = vmatprep.mubr.msk.bf16.mxu1 %vm1587_vm0, %v6495_v40  ;;  %v6499_v39 = vld [vmem:[%s6592_s26 + $0x580] sm:$0xff]  }
 0x14d   : > { %v7081_v56 = vpop.f32.mrb[44].mxu0  ;;  %v7083_v16 = vpop.f32.mrb[44].mxu1 }
 0x14e   : > { %7787 = vst [vmem:[#allocation41_spill] sm:$0xff] %v7081_v56  ;;  %7788 = vst [vmem:[#allocation42_spill] sm:$0xff] %v7083_v16  ;;  %v7085_v27 = vpop.f32.mrb[45].mxu0  ;;  %v7087_v15 = vpop.f32.mrb[45].mxu1 }
 0x14f   : > { %7789 = vst [vmem:[#allocation43_spill] sm:$0xff] %v7085_v27  ;;  %7790 = vst [vmem:[#allocation44_spill] sm:$0xff] %v7087_v15  ;;  %v7091_v55 = vpop.f32.mrb[46].mxu0  ;;  %v7093_v32 = vpop.f32.mrb[46].mxu1  ;;  %v6500_v27 = vld [vmem:[%s6592_s26 + $0x278] sm:$0xff]  }
 0x150   : > { %7791 = vst [vmem:[#allocation45_spill] sm:$0xff] %v7091_v55  ;;  %7792 = vst [vmem:[#allocation46_spill] sm:$0xff] %v7093_v32  ;;  %v7097_v40 = vpop.f32.mrb[47].mxu0  ;;  %v7099_v56 = vpop.f32.mrb[47].mxu1 }
 0x151   : > { %7793 = vst [vmem:[#allocation47_spill] sm:$0xff] %v7097_v40  ;;  %7794 = vst [vmem:[#allocation48_spill] sm:$0xff] %v7099_v56  ;;  %v6501_v40 = vld [vmem:[%s6592_s26 + $0x588] sm:$0xff]  }
 0x152   : > { %6080 = vmatmul.mubr.msk.bf16.gmra.mrb[152].mxu0 %vm1587_vm0, %v6496_v4  ;;  %6276 = vmatmul.mubr.msk.bf16.gmra.mrb[152].mxu1 %vm1587_vm0, %v6497_v31  ;;  %v6502_v31 = vld [vmem:[%s6592_s26 + $0x280] sm:$0xff]  }
 0x153   : > { %6083 = vmatprep.mubr.msk.bf16.mxu0 %vm1587_vm0, %v6498_v28  ;;  %6279 = vmatprep.mubr.msk.bf16.mxu1 %vm1587_vm0, %v6499_v39  ;;  %v6503_v28 = vld [vmem:[%s6592_s26 + $0x590] sm:$0xff]  }
 0x155   : > { %v7105_v16 = vpop.f32.mrb[48].mxu0  ;;  %v7107_v55 = vpop.f32.mrb[48].mxu1 }
 0x156   : > { %7795 = vst [vmem:[#allocation49_spill] sm:$0xff] %v7105_v16  ;;  %7796 = vst [vmem:[#allocation50_spill] sm:$0xff] %v7107_v55  ;;  %v7109_v32 = vpop.f32.mrb[49].mxu0  ;;  %v7111_v15 = vpop.f32.mrb[49].mxu1 }
 0x157   : > { %7797 = vst [vmem:[#allocation51_spill] sm:$0xff] %v7109_v32  ;;  %7798 = vst [vmem:[#allocation52_spill] sm:$0xff] %v7111_v15  ;;  %v7115_v56 = vpop.f32.mrb[50].mxu0  ;;  %v7117_v4 = vpop.f32.mrb[50].mxu1  ;;  %v6504_v32 = vld [vmem:[%s6592_s26 + $0x288] sm:$0xff]  }
 0x158   : > { %7799 = vst [vmem:[#allocation53_spill] sm:$0xff] %v7115_v56  ;;  %7800 = vst [vmem:[#allocation54_spill] sm:$0xff] %v7117_v4  ;;  %v7121_v39 = vpop.f32.mrb[51].mxu0  ;;  %v7123_v16 = vpop.f32.mrb[51].mxu1 }
 0x159   : > { %7801 = vst [vmem:[#allocation55_spill] sm:$0xff] %v7121_v39  ;;  %7802 = vst [vmem:[#allocation56_spill] sm:$0xff] %v7123_v16  ;;  %v6505_v39 = vld [vmem:[%s6592_s26 + $0x598] sm:$0xff]  }
 0x15a   : > { %6084 = vmatmul.mubr.msk.bf16.gmra.mrb[156].mxu0 %vm1587_vm0, %v6500_v27  ;;  %6280 = vmatmul.mubr.msk.bf16.gmra.mrb[156].mxu1 %vm1587_vm0, %v6501_v40  ;;  %v6506_v40 = vld [vmem:[%s6592_s26 + $0x290] sm:$0xff]  }
 0x15b   : > { %6087 = vmatprep.mubr.msk.bf16.mxu0 %vm1587_vm0, %v6502_v31  ;;  %6283 = vmatprep.mubr.msk.bf16.mxu1 %vm1587_vm0, %v6503_v28  ;;  %v6507_v31 = vld [vmem:[%s6592_s26 + $0x5a0] sm:$0xff]  }
 0x15d   : > { %v7129_v55 = vpop.f32.mrb[52].mxu0  ;;  %v7131_v56 = vpop.f32.mrb[52].mxu1 }
 0x15e   : > { %7803 = vst [vmem:[#allocation57_spill] sm:$0xff] %v7129_v55  ;;  %7804 = vst [vmem:[#allocation58_spill] sm:$0xff] %v7131_v56  ;;  %v7133_v4 = vpop.f32.mrb[53].mxu0  ;;  %v7135_v15 = vpop.f32.mrb[53].mxu1 }
 0x15f   : > { %7805 = vst [vmem:[#allocation59_spill] sm:$0xff] %v7133_v4  ;;  %7806 = vst [vmem:[#allocation60_spill] sm:$0xff] %v7135_v15  ;;  %v7139_v16 = vpop.f32.mrb[54].mxu0  ;;  %v7141_v27 = vpop.f32.mrb[54].mxu1  ;;  %v6508_v4 = vld [vmem:[%s6592_s26 + $0x298] sm:$0xff]  }
 0x160   : > { %7807 = vst [vmem:[#allocation61_spill] sm:$0xff] %v7139_v16  ;;  %7808 = vst [vmem:[#allocation62_spill] sm:$0xff] %v7141_v27  ;;  %v7145_v28 = vpop.f32.mrb[55].mxu0  ;;  %v7147_v55 = vpop.f32.mrb[55].mxu1 }
 0x161   : > { %7809 = vst [vmem:[#allocation63_spill] sm:$0xff] %v7145_v28  ;;  %7810 = vst [vmem:[#allocation64_spill] sm:$0xff] %v7147_v55  ;;  %v6509_v28 = vld [vmem:[%s6592_s26 + $0x5a8] sm:$0xff]  }
 0x162   : > { %6088 = vmatmul.mubr.msk.bf16.gmra.mrb[160].mxu0 %vm1587_vm0, %v6504_v32  ;;  %6284 = vmatmul.mubr.msk.bf16.gmra.mrb[160].mxu1 %vm1587_vm0, %v6505_v39  ;;  %v6510_v39 = vld [vmem:[%s6592_s26 + $0x2a0] sm:$0xff]  }
 0x163   : > { %6091 = vmatprep.mubr.msk.bf16.mxu0 %vm1587_vm0, %v6506_v40  ;;  %6287 = vmatprep.mubr.msk.bf16.mxu1 %vm1587_vm0, %v6507_v31  ;;  %v6511_v40 = vld [vmem:[%s6592_s26 + $0x5b0] sm:$0xff]  }
 0x165   : > { %v7153_v56 = vpop.f32.mrb[56].mxu0  ;;  %v7155_v16 = vpop.f32.mrb[56].mxu1 }
 0x166   : > { %7811 = vst [vmem:[#allocation65_spill] sm:$0xff] %v7153_v56  ;;  %7812 = vst [vmem:[#allocation66_spill] sm:$0xff] %v7155_v16  ;;  %v7157_v27 = vpop.f32.mrb[57].mxu0  ;;  %v7159_v15 = vpop.f32.mrb[57].mxu1 }
 0x167   : > { %7813 = vst [vmem:[#allocation67_spill] sm:$0xff] %v7157_v27  ;;  %7814 = vst [vmem:[#allocation68_spill] sm:$0xff] %v7159_v15  ;;  %v7163_v55 = vpop.f32.mrb[58].mxu0  ;;  %v7165_v32 = vpop.f32.mrb[58].mxu1  ;;  %v6512_v27 = vld [vmem:[%s6592_s26 + $0x2a8] sm:$0xff]  }
 0x168   : > { %7815 = vst [vmem:[#allocation69_spill] sm:$0xff] %v7163_v55  ;;  %7816 = vst [vmem:[#allocation70_spill] sm:$0xff] %v7165_v32  ;;  %v7169_v31 = vpop.f32.mrb[59].mxu0  ;;  %v7171_v56 = vpop.f32.mrb[59].mxu1 }
 0x169   : > { %7817 = vst [vmem:[#allocation71_spill] sm:$0xff] %v7169_v31  ;;  %7818 = vst [vmem:[#allocation72_spill] sm:$0xff] %v7171_v56  ;;  %v6513_v31 = vld [vmem:[%s6592_s26 + $0x5b8] sm:$0xff]  }
 0x16a   : > { %6092 = vmatmul.mubr.msk.bf16.gmra.mrb[164].mxu0 %vm1587_vm0, %v6508_v4  ;;  %6288 = vmatmul.mubr.msk.bf16.gmra.mrb[164].mxu1 %vm1587_vm0, %v6509_v28  ;;  %v6514_v28 = vld [vmem:[%s6592_s26 + $0x2b0] sm:$0xff]  }
 0x16b   : > { %6095 = vmatprep.mubr.msk.bf16.mxu0 %vm1587_vm0, %v6510_v39  ;;  %6291 = vmatprep.mubr.msk.bf16.mxu1 %vm1587_vm0, %v6511_v40  ;;  %v6515_v39 = vld [vmem:[%s6592_s26 + $0x5c0] sm:$0xff]  }
 0x16d   : > { %v7177_v16 = vpop.f32.mrb[60].mxu0  ;;  %v7179_v55 = vpop.f32.mrb[60].mxu1 }
 0x16e   : > { %7819 = vst [vmem:[#allocation73_spill] sm:$0xff] %v7177_v16  ;;  %7820 = vst [vmem:[#allocation74_spill] sm:$0xff] %v7179_v55  ;;  %v7181_v32 = vpop.f32.mrb[61].mxu0  ;;  %v7183_v15 = vpop.f32.mrb[61].mxu1 }
 0x16f   : > { %7821 = vst [vmem:[#allocation75_spill] sm:$0xff] %v7181_v32  ;;  %7822 = vst [vmem:[#allocation76_spill] sm:$0xff] %v7183_v15  ;;  %v7187_v56 = vpop.f32.mrb[62].mxu0  ;;  %v7189_v4 = vpop.f32.mrb[62].mxu1  ;;  %v6516_v32 = vld [vmem:[%s6592_s26 + $0x2b8] sm:$0xff]  }
 0x170   : > { %7823 = vst [vmem:[#allocation77_spill] sm:$0xff] %v7187_v56  ;;  %7824 = vst [vmem:[#allocation78_spill] sm:$0xff] %v7189_v4  ;;  %v7193_v40 = vpop.f32.mrb[63].mxu0  ;;  %v7195_v16 = vpop.f32.mrb[63].mxu1 }
 0x171   : > { %7825 = vst [vmem:[#allocation79_spill] sm:$0xff] %v7193_v40  ;;  %7826 = vst [vmem:[#allocation80_spill] sm:$0xff] %v7195_v16  ;;  %v6517_v40 = vld [vmem:[%s6592_s26 + $0x5c8] sm:$0xff]  }
 0x172   : > { %6096 = vmatmul.mubr.msk.bf16.gmra.mrb[168].mxu0 %vm1587_vm0, %v6512_v27  ;;  %6292 = vmatmul.mubr.msk.bf16.gmra.mrb[168].mxu1 %vm1587_vm0, %v6513_v31  ;;  %v6518_v31 = vld [vmem:[%s6592_s26 + $0x2c0] sm:$0xff]  }
 0x173   : > { %6099 = vmatprep.mubr.msk.bf16.mxu0 %vm1587_vm0, %v6514_v28  ;;  %6295 = vmatprep.mubr.msk.bf16.mxu1 %vm1587_vm0, %v6515_v39  ;;  %v6519_v28 = vld [vmem:[%s6592_s26 + $0x5d0] sm:$0xff]  }
 0x175   : > { %v7201_v55 = vpop.f32.mrb[64].mxu0  ;;  %v7203_v56 = vpop.f32.mrb[64].mxu1 }
 0x176   : > { %7827 = vst [vmem:[#allocation81_spill] sm:$0xff] %v7201_v55  ;;  %7828 = vst [vmem:[#allocation82_spill] sm:$0xff] %v7203_v56  ;;  %v7205_v4 = vpop.f32.mrb[65].mxu0  ;;  %v7207_v15 = vpop.f32.mrb[65].mxu1 }
 0x177   : > { %7829 = vst [vmem:[#allocation83_spill] sm:$0xff] %v7205_v4  ;;  %7830 = vst [vmem:[#allocation84_spill] sm:$0xff] %v7207_v15  ;;  %v7211_v16 = vpop.f32.mrb[66].mxu0  ;;  %v7213_v27 = vpop.f32.mrb[66].mxu1  ;;  %v6520_v4 = vld [vmem:[%s6592_s26 + $0x2c8] sm:$0xff]  }
 0x178   : > { %7831 = vst [vmem:[#allocation85_spill] sm:$0xff] %v7211_v16  ;;  %7832 = vst [vmem:[#allocation86_spill] sm:$0xff] %v7213_v27  ;;  %v7217_v39 = vpop.f32.mrb[67].mxu0  ;;  %v7219_v55 = vpop.f32.mrb[67].mxu1 }
 0x179   : > { %7833 = vst [vmem:[#allocation87_spill] sm:$0xff] %v7217_v39  ;;  %7834 = vst [vmem:[#allocation88_spill] sm:$0xff] %v7219_v55  ;;  %v6521_v39 = vld [vmem:[%s6592_s26 + $0x5d8] sm:$0xff]  }
 0x17a   : > { %6100 = vmatmul.mubr.msk.bf16.gmra.mrb[172].mxu0 %vm1587_vm0, %v6516_v32  ;;  %6296 = vmatmul.mubr.msk.bf16.gmra.mrb[172].mxu1 %vm1587_vm0, %v6517_v40  ;;  %v6522_v40 = vld [vmem:[%s6592_s26 + $0x2d0] sm:$0xff]  }
 0x17b   : > { %6103 = vmatprep.mubr.msk.bf16.mxu0 %vm1587_vm0, %v6518_v31  ;;  %6299 = vmatprep.mubr.msk.bf16.mxu1 %vm1587_vm0, %v6519_v28  ;;  %v6523_v31 = vld [vmem:[%s6592_s26 + $0x5e0] sm:$0xff]  }
 0x17d   : > { %v7225_v56 = vpop.f32.mrb[68].mxu0  ;;  %v7227_v16 = vpop.f32.mrb[68].mxu1 }
 0x17e   : > { %7835 = vst [vmem:[#allocation89_spill] sm:$0xff] %v7225_v56  ;;  %7836 = vst [vmem:[#allocation90_spill] sm:$0xff] %v7227_v16  ;;  %v7229_v27 = vpop.f32.mrb[69].mxu0  ;;  %v7231_v15 = vpop.f32.mrb[69].mxu1 }
 0x17f   : > { %7837 = vst [vmem:[#allocation91_spill] sm:$0xff] %v7229_v27  ;;  %7838 = vst [vmem:[#allocation92_spill] sm:$0xff] %v7231_v15  ;;  %v7235_v55 = vpop.f32.mrb[70].mxu0  ;;  %v7237_v32 = vpop.f32.mrb[70].mxu1  ;;  %v6524_v27 = vld [vmem:[%s6592_s26 + $0x2d8] sm:$0xff]  }
 0x180   : > { %7839 = vst [vmem:[#allocation93_spill] sm:$0xff] %v7235_v55  ;;  %7840 = vst [vmem:[#allocation94_spill] sm:$0xff] %v7237_v32  ;;  %v7241_v28 = vpop.f32.mrb[71].mxu0  ;;  %v7243_v56 = vpop.f32.mrb[71].mxu1 }
 0x181   : > { %7841 = vst [vmem:[#allocation95_spill] sm:$0xff] %v7241_v28  ;;  %7842 = vst [vmem:[#allocation96_spill] sm:$0xff] %v7243_v56  ;;  %v6525_v28 = vld [vmem:[%s6592_s26 + $0x5e8] sm:$0xff]  }
 0x182   : > { %6104 = vmatmul.mubr.msk.bf16.gmra.mrb[176].mxu0 %vm1587_vm0, %v6520_v4  ;;  %6300 = vmatmul.mubr.msk.bf16.gmra.mrb[176].mxu1 %vm1587_vm0, %v6521_v39  ;;  %v6526_v39 = vld [vmem:[%s6592_s26 + $0x2e0] sm:$0xff]  }
 0x183   : > { %6107 = vmatprep.mubr.msk.bf16.mxu0 %vm1587_vm0, %v6522_v40  ;;  %6303 = vmatprep.mubr.msk.bf16.mxu1 %vm1587_vm0, %v6523_v31  ;;  %v6527_v40 = vld [vmem:[%s6592_s26 + $0x5f0] sm:$0xff]  }
 0x185   : > { %v7249_v16 = vpop.f32.mrb[72].mxu0  ;;  %v7251_v55 = vpop.f32.mrb[72].mxu1 }
 0x186   : > { %7843 = vst [vmem:[#allocation97_spill] sm:$0xff] %v7249_v16  ;;  %7844 = vst [vmem:[#allocation98_spill] sm:$0xff] %v7251_v55  ;;  %v7253_v32 = vpop.f32.mrb[73].mxu0  ;;  %v7255_v15 = vpop.f32.mrb[73].mxu1 }
 0x187   : > { %7845 = vst [vmem:[#allocation99_spill] sm:$0xff] %v7253_v32  ;;  %7846 = vst [vmem:[#allocation100_spill] sm:$0xff] %v7255_v15  ;;  %v7259_v56 = vpop.f32.mrb[74].mxu0  ;;  %v7261_v4 = vpop.f32.mrb[74].mxu1  ;;  %v6528_v32 = vld [vmem:[%s6592_s26 + $0x2e8] sm:$0xff]  }
 0x188   : > { %7847 = vst [vmem:[#allocation101_spill] sm:$0xff] %v7259_v56  ;;  %7848 = vst [vmem:[#allocation102_spill] sm:$0xff] %v7261_v4  ;;  %v7265_v31 = vpop.f32.mrb[75].mxu0  ;;  %v7267_v16 = vpop.f32.mrb[75].mxu1 }
 0x189   : > { %7849 = vst [vmem:[#allocation103_spill] sm:$0xff] %v7265_v31  ;;  %7850 = vst [vmem:[#allocation104_spill] sm:$0xff] %v7267_v16  ;;  %v6529_v31 = vld [vmem:[%s6592_s26 + $0x5f8] sm:$0xff]  }
 0x18a   : > { %6108 = vmatmul.mubr.msk.bf16.gmra.mrb[180].mxu0 %vm1587_vm0, %v6524_v27  ;;  %6304 = vmatmul.mubr.msk.bf16.gmra.mrb[180].mxu1 %vm1587_vm0, %v6525_v28  ;;  %v6530_v28 = vld [vmem:[%s6592_s26 + $0x2f0] sm:$0xff]  }
 0x18b   : > { %6111 = vmatprep.mubr.msk.bf16.mxu0 %vm1587_vm0, %v6526_v39  ;;  %6307 = vmatprep.mubr.msk.bf16.mxu1 %vm1587_vm0, %v6527_v40  ;;  %v6531_v39 = vld [vmem:[%s6592_s26 + $0x600] sm:$0xff]  }
 0x18d   : > { %v7273_v55 = vpop.f32.mrb[76].mxu0  ;;  %v7275_v56 = vpop.f32.mrb[76].mxu1 }
 0x18e   : > { %7851 = vst [vmem:[#allocation105_spill] sm:$0xff] %v7273_v55  ;;  %7852 = vst [vmem:[#allocation106_spill] sm:$0xff] %v7275_v56  ;;  %v7277_v4 = vpop.f32.mrb[77].mxu0  ;;  %v7279_v15 = vpop.f32.mrb[77].mxu1 }
 0x18f   : > { %7853 = vst [vmem:[#allocation107_spill] sm:$0xff] %v7277_v4  ;;  %7854 = vst [vmem:[#allocation108_spill] sm:$0xff] %v7279_v15  ;;  %v7283_v16 = vpop.f32.mrb[78].mxu0  ;;  %v7285_v27 = vpop.f32.mrb[78].mxu1  ;;  %v6532_v4 = vld [vmem:[%s6592_s26 + $0x2f8] sm:$0xff]  }
 0x190   : > { %7855 = vst [vmem:[#allocation109_spill] sm:$0xff] %v7283_v16  ;;  %7856 = vst [vmem:[#allocation110_spill] sm:$0xff] %v7285_v27  ;;  %v7289_v40 = vpop.f32.mrb[79].mxu0  ;;  %v7291_v55 = vpop.f32.mrb[79].mxu1 }
 0x191   : > { %7857 = vst [vmem:[#allocation111_spill] sm:$0xff] %v7289_v40  ;;  %7858 = vst [vmem:[#allocation112_spill] sm:$0xff] %v7291_v55  ;;  %v6533_v40 = vld [vmem:[%s6592_s26 + $0x608] sm:$0xff]  }
 0x192   : > { %6112 = vmatmul.mubr.msk.bf16.gmra.mrb[184].mxu0 %vm1587_vm0, %v6528_v32  ;;  %6308 = vmatmul.mubr.msk.bf16.gmra.mrb[184].mxu1 %vm1587_vm0, %v6529_v31  ;;  %v6534_v31 = vld [vmem:[%s6592_s26 + $0x300] sm:$0xff]  }
 0x193   : > { %6115 = vmatprep.mubr.msk.bf16.mxu0 %vm1587_vm0, %v6530_v28  ;;  %6311 = vmatprep.mubr.msk.bf16.mxu1 %vm1587_vm0, %v6531_v39  ;;  %v6535_v28 = vld [vmem:[%s6592_s26 + $0x610] sm:$0xff]  }
 0x195   : > { %v7297_v56 = vpop.f32.mrb[80].mxu0  ;;  %v7299_v16 = vpop.f32.mrb[80].mxu1 }
 0x196   : > { %7859 = vst [vmem:[#allocation113_spill] sm:$0xff] %v7297_v56  ;;  %7860 = vst [vmem:[#allocation114_spill] sm:$0xff] %v7299_v16  ;;  %v7301_v27 = vpop.f32.mrb[81].mxu0  ;;  %v7303_v15 = vpop.f32.mrb[81].mxu1 }
 0x197   : > { %7861 = vst [vmem:[#allocation115_spill] sm:$0xff] %v7301_v27  ;;  %7862 = vst [vmem:[#allocation116_spill] sm:$0xff] %v7303_v15  ;;  %v7307_v55 = vpop.f32.mrb[82].mxu0  ;;  %v7309_v32 = vpop.f32.mrb[82].mxu1  ;;  %v6536_v15 = vld [vmem:[%s6592_s26 + $0x308] sm:$0xff]  }
 0x198   : > { %7863 = vst [vmem:[#allocation117_spill] sm:$0xff] %v7307_v55  ;;  %7864 = vst [vmem:[#allocation118_spill] sm:$0xff] %v7309_v32  ;;  %v7313_v3 = vpop.f32.mrb[83].mxu0  ;;  %v7315_v39 = vpop.f32.mrb[83].mxu1 }
 0x199   : > { %7865 = vst [vmem:[#allocation119_spill] sm:$0xff] %v7313_v3  ;;  %7866 = vst [vmem:[#allocation120_spill] sm:$0xff] %v7315_v39  ;;  %v6537_v3 = vld [vmem:[%s6592_s26 + $0x618] sm:$0xff]  }
 0x19a   : > { %6116 = vmatmul.mubr.msk.bf16.gmra.mrb[188].mxu0 %vm1587_vm0, %v6532_v4  ;;  %6312 = vmatmul.mubr.msk.bf16.gmra.mrb[188].mxu1 %vm1587_vm0, %v6533_v40 }
 0x19b   : > { %6119 = vmatprep.mubr.msk.bf16.mxu0 %vm1587_vm0, %v6534_v31  ;;  %6315 = vmatprep.mubr.msk.bf16.mxu1 %vm1587_vm0, %v6535_v28 }
 0x19d   : > { %v7321_v16 = vpop.f32.mrb[84].mxu0  ;;  %v7323_v56 = vpop.f32.mrb[84].mxu1 }
 0x19e   : > { %7867 = vst [vmem:[#allocation121_spill] sm:$0xff] %v7321_v16  ;;  %7868 = vst [vmem:[#allocation122_spill] sm:$0xff] %v7323_v56  ;;  %v7325_v55 = vpop.f32.mrb[85].mxu0  ;;  %v7327_v32 = vpop.f32.mrb[85].mxu1 }
 0x19f   : > { %7869 = vst [vmem:[#allocation123_spill] sm:$0xff] %v7325_v55  ;;  %7870 = vst [vmem:[#allocation124_spill] sm:$0xff] %v7327_v32  ;;  %v7331_v27 = vpop.f32.mrb[86].mxu0  ;;  %v7333_v39 = vpop.f32.mrb[86].mxu1 }
 0x1a0   : > { %7871 = vst [vmem:[#allocation125_spill] sm:$0xff] %v7331_v27  ;;  %7872 = vst [vmem:[#allocation126_spill] sm:$0xff] %v7333_v39  ;;  %v7335_v4 = vpop.f32.mrb[87].mxu0  ;;  %v7337_v40 = vpop.f32.mrb[87].mxu1 }
 0x1a1   : > { %7873 = vst [vmem:[#allocation127_spill] sm:$0xff] %v7335_v4  ;;  %7874 = vst [vmem:[#allocation128_spill] sm:$0xff] %v7337_v40 }
 0x1a2   : > { %6120 = vmatmul.mubr.msk.bf16.gmra.mrb[192].mxu0 %vm1587_vm0, %v6536_v15  ;;  %6316 = vmatmul.mubr.msk.bf16.gmra.mrb[192].mxu1 %vm1587_vm0, %v6537_v3 }
 0x1a5   : > { %v7341_v31 = vpop.f32.mrb[88].mxu0  ;;  %v7343_v28 = vpop.f32.mrb[88].mxu1 }
 0x1a6   : > { %7875 = vst [vmem:[#allocation129_spill] sm:$0xff] %v7341_v31  ;;  %7876 = vst [vmem:[#allocation130_spill] sm:$0xff] %v7343_v28  ;;  %v7345_v56 = vpop.f32.mrb[89].mxu0  ;;  %v7347_v16 = vpop.f32.mrb[89].mxu1 }
 0x1a7   : > { %7877 = vst [vmem:[#allocation131_spill] sm:$0xff] %v7345_v56  ;;  %7878 = vst [vmem:[#allocation132_spill] sm:$0xff] %v7347_v16  ;;  %v7349_v27 = vpop.f32.mrb[90].mxu0  ;;  %v7351_v39 = vpop.f32.mrb[90].mxu1 }
 0x1a8   : > { %7879 = vst [vmem:[#allocation133_spill] sm:$0xff] %v7349_v27  ;;  %7880 = vst [vmem:[#allocation134_spill] sm:$0xff] %v7351_v39  ;;  %v7353_v4 = vpop.f32.mrb[91].mxu0  ;;  %v7355_v40 = vpop.f32.mrb[91].mxu1 }
 0x1a9   : > { %7881 = vst [vmem:[#allocation135_spill] sm:$0xff] %v7353_v4  ;;  %7882 = vst [vmem:[#allocation136_spill] sm:$0xff] %v7355_v40 }
 0x1ad   : > { %v7357_v15 = vpop.f32.mrb[92].mxu0  ;;  %v7359_v3 = vpop.f32.mrb[92].mxu1 }
 0x1ae   : > { %7883 = vst [vmem:[#allocation137_spill] sm:$0xff] %v7357_v15  ;;  %7884 = vst [vmem:[#allocation138_spill] sm:$0xff] %v7359_v3  ;;  %v7361_v31 = vpop.f32.mrb[93].mxu0  ;;  %v7363_v32 = vpop.f32.mrb[93].mxu1 }
 0x1af   : > { %7885 = vst [vmem:[#allocation139_spill] sm:$0xff] %v7361_v31  ;;  %7886 = vst [vmem:[#allocation140_spill] sm:$0xff] %v7363_v32  ;;  %v7365_v28 = vpop.f32.mrb[94].mxu0  ;;  %v7367_v56 = vpop.f32.mrb[94].mxu1 }
 0x1b0   : > { %7887 = vst [vmem:[#allocation141_spill] sm:$0xff] %v7365_v28  ;;  %7888 = vst [vmem:[#allocation142_spill] sm:$0xff] %v7367_v56  ;;  %v7369_v16 = vpop.f32.mrb[95].mxu0  ;;  %v7371_v27 = vpop.f32.mrb[95].mxu1  ;;  %v7384_v56 = vld [vmem:[%s7746_s2] ss:$0 sm:$0xff] }
 0x1b1   : > { %7889 = vst [vmem:[#allocation143_spill] sm:$0xff] %v7369_v16  ;;  %7890 = vst [vmem:[#allocation144_spill] sm:$0xff] %v7371_v27 }
 0x1b5   : > { %v6025_v39 = vpop.f32.mrb[96].mxu0  ;;  %v6221_v40 = vpop.f32.mrb[96].mxu1 }
 0x1b6   : > { %v3777_v15 = vmax.f32 %v6821_v53, %v6025_v39  ;;  %v3875_v3 = vmax.f32 %v6823_v54, %v6221_v40  ;;  %v7377_v31 = vpop.f32.mrb[97].mxu0  ;;  %v7379_v32 = vpop.f32.mrb[97].mxu1 }
 0x1b7   : > { %7891 = vst [vmem:[#allocation145_spill] sm:$0xff] %v7377_v31  ;;  %7892 = vst [vmem:[#allocation146_spill] sm:$0xff] %v7379_v32  ;;  %v6026_v28 = vpop.f32.mrb[98].mxu0  ;;  %v6222_v27 = vpop.f32.mrb[98].mxu1 }
 0x1b8   : > { %v3973_v16 = vmax.f32 %v3777_v15, %v3875_v3  ;;  %v3778_v4 = vmax.f32 %v6833_v61, %v6026_v28  ;;  %v3876_v55 = vmax.f32 %v6835_v62, %v6222_v27  ;;  %v7388_v53 = vpop.f32.mrb[99].mxu0  ;;  %v7390_v54 = vpop.f32.mrb[99].mxu1 }
 0x1b9   : > { %7893 = vst [vmem:[#allocation147_spill] sm:$0xff] %v7390_v54 }
 0x1ba   : > { %v4078_v39 = vadd.f32 %v7384_v56, %v3973_v16  ;;  %v3974_v40 = vmax.f32 %v3778_v4, %v3876_v55 }
 0x1bc   : > { %v4079_v32 = vadd.f32 %v7384_v56, %v3974_v40  ;;  %v4176_v59 = vmax.f32 %v4078_v39, 0.0 }
 0x1bd   : > { %v6029_v31 = vpop.f32.mrb[100].mxu0  ;;  %v6225_v60 = vpop.f32.mrb[100].mxu1 }
 0x1be   : > { %v4177_v44 = vmax.f32 %v4079_v32, 0.0  ;;  %v3781_v15 = vmax.f32 %v6845_v1, %v6029_v31  ;;  %v3879_v61 = vmax.f32 %v6847_v2, %v6225_v60  ;;  %v2610_v28 = vpop.f32.mrb[101].mxu0  ;;  %v3394_v62 = vpop.f32.mrb[101].mxu1 }
 0x1bf   : > { %v3779_v16 = vmax.f32 %v6817_v51, %v2610_v28  ;;  %v3877_v55 = vmax.f32 %v6819_v52, %v3394_v62  ;;  %v6030_v27 = vpop.f32.mrb[102].mxu0  ;;  %v6226_v4 = vpop.f32.mrb[102].mxu1 }
 0x1c0   : > { %v5426_v3 = vpack.c.bf16 %v4177_v44, %v4176_v59  ;;  %v3977_v32 = vmax.f32 %v3781_v15, %v3879_v61  ;;  %v3782_v1 = vmax.f32 %v6857_v9, %v6030_v27  ;;  %v3880_v2 = vmax.f32 %v6859_v10, %v6226_v4  ;;  %v2613_v60 = vpop.f32.mrb[103].mxu0  ;;  %v3397_v31 = vpop.f32.mrb[103].mxu1 }
 0x1c1   : > { %v3975_v39 = vmax.f32 %v3779_v16, %v3877_v55  ;;  %v3780_v40 = vmax.f32 %v6827_v57, %v2613_v60  ;;  %v3878_v54 = vmax.f32 %v6829_v58, %v3397_v31 }
 0x1c2   : > { %5427 = vst [vmem:[%s7399_s8] sm:$0xff] %v5426_v3   ;;  %v4082_v51 = vadd.f32 %v7384_v56, %v3977_v32  ;;  %v3978_v28 = vmax.f32 %v3782_v1, %v3880_v2 }
 0x1c3   : > { %v4080_v52 = vadd.f32 %v7384_v56, %v3975_v39  ;;  %v3976_v62 = vmax.f32 %v3780_v40, %v3878_v54 }
 0x1c4   : > { %v4083_v59 = vadd.f32 %v7384_v56, %v3978_v28  ;;  %v4180_v15 = vmax.f32 %v4082_v51, 0.0 }
 0x1c5   : > { %v4081_v9 = vadd.f32 %v7384_v56, %v3976_v62  ;;  %v6033_v44 = vpop.f32.mrb[104].mxu0  ;;  %v6229_v10 = vpop.f32.mrb[104].mxu1  ;;  %v4178_v27 = vmax.f32 %v4080_v52, 0.0 }
 0x1c6   : > { %v4181_v61 = vmax.f32 %v4083_v59, 0.0  ;;  %v3785_v16 = vmax.f32 %v6869_v13, %v6033_v44  ;;  %v3883_v57 = vmax.f32 %v6871_v14, %v6229_v10  ;;  %v2626_v58 = vpop.f32.mrb[105].mxu0  ;;  %v3410_v55 = vpop.f32.mrb[105].mxu1 }
 0x1c7   : > { %v4179_v4 = vmax.f32 %v4081_v9, 0.0  ;;  %v3783_v3 = vmax.f32 %v6841_v63, %v2626_v58  ;;  %v3881_v54 = vmax.f32 %v6843_v0, %v3410_v55  ;;  %v6034_v32 = vpop.f32.mrb[106].mxu0  ;;  %v6230_v1 = vpop.f32.mrb[106].mxu1 }
 0x1c8   : > { %v5436_v2 = vpack.c.bf16 %v4181_v61, %v4180_v15  ;;  %v3981_v60 = vmax.f32 %v3785_v16, %v3883_v57  ;;  %v3786_v31 = vmax.f32 %v6881_v21, %v6034_v32  ;;  %v3884_v13 = vmax.f32 %v6883_v22, %v6230_v1  ;;  %v2629_v39 = vpop.f32.mrb[107].mxu0  ;;  %v3413_v14 = vpop.f32.mrb[107].mxu1 }
 0x1c9   : > { %v5431_v40 = vpack.c.bf16 %v4179_v4, %v4178_v27  ;;  %v3979_v51 = vmax.f32 %v3783_v3, %v3881_v54  ;;  %v3784_v28 = vmax.f32 %v6851_v5, %v2629_v39  ;;  %v3882_v52 = vmax.f32 %v6853_v6, %v3413_v14 }
 0x1ca   : > { %5669 = vst [vmem:[%s7399_s8 + $0x10] sm:$0xff] %v5436_v2   ;;  %v4086_v63 = vadd.f32 %v7384_v56, %v3981_v60  ;;  %v3982_v0 = vmax.f32 %v3786_v31, %v3884_v13 }
 0x1cb   : > { %5668 = vst [vmem:[%s7399_s8 + $0x8] sm:$0xff] %v5431_v40   ;;  %v4084_v62 = vadd.f32 %v7384_v56, %v3979_v51  ;;  %v3980_v59 = vmax.f32 %v3784_v28, %v3882_v52 }
 0x1cc   : > { %v4087_v21 = vadd.f32 %v7384_v56, %v3982_v0  ;;  %v4184_v10 = vmax.f32 %v4086_v63, 0.0 }
 0x1cd   : > { %v4085_v22 = vadd.f32 %v7384_v56, %v3980_v59  ;;  %v6037_v9 = vpop.f32.mrb[108].mxu0  ;;  %v6233_v44 = vpop.f32.mrb[108].mxu1  ;;  %v4182_v57 = vmax.f32 %v4084_v62, 0.0 }
 0x1ce   : > { %v4185_v15 = vmax.f32 %v4087_v21, 0.0  ;;  %v3789_v5 = vmax.f32 %v6893_v25, %v6037_v9  ;;  %v3887_v6 = vmax.f32 %v6895_v26, %v6233_v44  ;;  %v2642_v61 = vpop.f32.mrb[109].mxu0  ;;  %v3426_v16 = vpop.f32.mrb[109].mxu1 }
 0x1cf   : > { %v4183_v58 = vmax.f32 %v4085_v22, 0.0  ;;  %v3787_v55 = vmax.f32 %v6865_v11, %v2642_v61  ;;  %v3885_v27 = vmax.f32 %v6867_v12, %v3426_v16  ;;  %v6038_v4 = vpop.f32.mrb[110].mxu0  ;;  %v6234_v3 = vpop.f32.mrb[110].mxu1 }
 0x1d0   : > { %v5446_v54 = vpack.c.bf16 %v4185_v15, %v4184_v10  ;;  %v3985_v32 = vmax.f32 %v3789_v5, %v3887_v6  ;;  %v3790_v1 = vmax.f32 %v6905_v33, %v6038_v4  ;;  %v3888_v25 = vmax.f32 %v6907_v34, %v6234_v3  ;;  %v2645_v2 = vpop.f32.mrb[111].mxu0  ;;  %v3429_v26 = vpop.f32.mrb[111].mxu1 }
 0x1d1   : > { %v5441_v60 = vpack.c.bf16 %v4183_v58, %v4182_v57  ;;  %v3983_v31 = vmax.f32 %v3787_v55, %v3885_v27  ;;  %v3788_v13 = vmax.f32 %v6875_v17, %v2645_v2  ;;  %v3886_v39 = vmax.f32 %v6877_v18, %v3429_v26 }
 0x1d2   : > { %5671 = vst [vmem:[%s7399_s8 + $0x20] sm:$0xff] %v5446_v54   ;;  %v4090_v11 = vadd.f32 %v7384_v56, %v3985_v32  ;;  %v3986_v12 = vmax.f32 %v3790_v1, %v3888_v25 }
 0x1d3   : > { %5670 = vst [vmem:[%s7399_s8 + $0x18] sm:$0xff] %v5441_v60   ;;  %v4088_v14 = vadd.f32 %v7384_v56, %v3983_v31  ;;  %v3984_v40 = vmax.f32 %v3788_v13, %v3886_v39 }
 0x1d4   : > { %v4091_v33 = vadd.f32 %v7384_v56, %v3986_v12  ;;  %v4188_v52 = vmax.f32 %v4090_v11, 0.0 }
 0x1d5   : > { %v4089_v34 = vadd.f32 %v7384_v56, %v3984_v40  ;;  %v6041_v51 = vpop.f32.mrb[112].mxu0  ;;  %v6237_v28 = vpop.f32.mrb[112].mxu1  ;;  %v4186_v59 = vmax.f32 %v4088_v14, 0.0 }
 0x1d6   : > { %v4189_v63 = vmax.f32 %v4091_v33, 0.0  ;;  %v3793_v17 = vmax.f32 %v6917_v37, %v6041_v51  ;;  %v3891_v18 = vmax.f32 %v6919_v38, %v6237_v28  ;;  %v2658_v0 = vpop.f32.mrb[113].mxu0  ;;  %v3442_v62 = vpop.f32.mrb[113].mxu1 }
 0x1d7   : > { %v4187_v21 = vmax.f32 %v4089_v34, 0.0  ;;  %v3791_v22 = vmax.f32 %v6889_v23, %v2658_v0  ;;  %v3889_v9 = vmax.f32 %v6891_v24, %v3442_v62  ;;  %v6042_v44 = vpop.f32.mrb[114].mxu0  ;;  %v6238_v10 = vpop.f32.mrb[114].mxu1 }
 0x1d8   : > { %v5456_v15 = vpack.c.bf16 %v4189_v63, %v4188_v52  ;;  %v3989_v5 = vmax.f32 %v3793_v17, %v3891_v18  ;;  %v3794_v6 = vmax.f32 %v6929_v45, %v6042_v44  ;;  %v3892_v37 = vmax.f32 %v6931_v46, %v6238_v10  ;;  %v2661_v61 = vpop.f32.mrb[115].mxu0  ;;  %v3445_v38 = vpop.f32.mrb[115].mxu1 }
 0x1d9   : > { %v5451_v16 = vpack.c.bf16 %v4187_v21, %v4186_v59  ;;  %v3987_v57 = vmax.f32 %v3791_v22, %v3889_v9  ;;  %v3792_v58 = vmax.f32 %v6899_v29, %v2661_v61  ;;  %v3890_v55 = vmax.f32 %v6901_v30, %v3445_v38 }
 0x1da   : > { %5673 = vst [vmem:[%s7399_s8 + $0x30] sm:$0xff] %v5456_v15   ;;  %v4094_v23 = vadd.f32 %v7384_v56, %v3989_v5  ;;  %v3990_v24 = vmax.f32 %v3794_v6, %v3892_v37 }
 0x1db   : > { %5672 = vst [vmem:[%s7399_s8 + $0x28] sm:$0xff] %v5451_v16   ;;  %v4092_v27 = vadd.f32 %v7384_v56, %v3987_v57  ;;  %v3988_v4 = vmax.f32 %v3792_v58, %v3890_v55  ;;  %v7894_v16 = vld [vmem:[#allocation8_spill] sm:$0xff] }
 0x1dc   : > { %v4095_v45 = vadd.f32 %v7384_v56, %v3990_v24  ;;  %v4192_v32 = vmax.f32 %v4094_v23, 0.0  ;;  %v7895_v23 = vld [vmem:[#allocation2_spill] sm:$0xff] }
 0x1dd   : > { %v4093_v46 = vadd.f32 %v7384_v56, %v3988_v4  ;;  %v6045_v3 = vpop.f32.mrb[116].mxu0  ;;  %v6241_v54 = vpop.f32.mrb[116].mxu1  ;;  %v4190_v26 = vmax.f32 %v4092_v27, 0.0  ;;  %v7896_v27 = vld [vmem:[#allocation3_spill] sm:$0xff] }
 0x1de   : > { %v4193_v1 = vmax.f32 %v4095_v45, 0.0  ;;  %v3797_v29 = vmax.f32 %v6941_v49, %v6045_v3  ;;  %v3895_v30 = vmax.f32 %v6943_v50, %v6241_v54  ;;  %v2674_v25 = vpop.f32.mrb[117].mxu0  ;;  %v3458_v2 = vpop.f32.mrb[117].mxu1 }
 0x1df   : > { %v4191_v60 = vmax.f32 %v4093_v46, 0.0  ;;  %v3795_v31 = vmax.f32 %v6913_v35, %v2674_v25  ;;  %v3893_v13 = vmax.f32 %v6915_v36, %v3458_v2  ;;  %v6046_v39 = vpop.f32.mrb[118].mxu0  ;;  %v6242_v11 = vpop.f32.mrb[118].mxu1  ;;  %v7898_v2 = vld [vmem:[#allocation12_spill] sm:$0xff] }
 0x1e0   : > { %v5466_v12 = vpack.c.bf16 %v4193_v1, %v4192_v32  ;;  %v3993_v14 = vmax.f32 %v3797_v29, %v3895_v30  ;;  %v3798_v40 = vmax.f32 %v6953_v7, %v6046_v39  ;;  %v3896_v49 = vmax.f32 %v6955_v8, %v6242_v11  ;;  %v2677_v33 = vpop.f32.mrb[119].mxu0  ;;  %v3461_v50 = vpop.f32.mrb[119].mxu1  ;;  %v7897_v30 = vld [vmem:[#allocation11_spill] sm:$0xff]  ;;  %v7899_v11 = vld [vmem:[#allocation4_spill] sm:$0xff] }
 0x1e1   : > { %v5461_v34 = vpack.c.bf16 %v4191_v60, %v4190_v26  ;;  %v3991_v51 = vmax.f32 %v3795_v31, %v3893_v13  ;;  %v3796_v28 = vmax.f32 %v6923_v41, %v2677_v33  ;;  %v3894_v52 = vmax.f32 %v6925_v42, %v3461_v50 }
 0x1e2   : > { %5675 = vst [vmem:[%s7399_s8 + $0x40] sm:$0xff] %v5466_v12   ;;  %v4098_v35 = vadd.f32 %v7384_v56, %v3993_v14  ;;  %v3994_v36 = vmax.f32 %v3798_v40, %v3896_v49  ;;  %v7900_v14 = vld [vmem:[#allocation5_spill] sm:$0xff] }
 0x1e3   : > { %5674 = vst [vmem:[%s7399_s8 + $0x38] sm:$0xff] %v5461_v34   ;;  %v4096_v63 = vadd.f32 %v7384_v56, %v3991_v51  ;;  %v3992_v17 = vmax.f32 %v3796_v28, %v3894_v52  ;;  %v7901_v51 = vld [vmem:[#allocation15_spill] sm:$0xff]  ;;  %v7902_v52 = vld [vmem:[#allocation16_spill] sm:$0xff] }
 0x1e4   : > { %v4099_v7 = vadd.f32 %v7384_v56, %v3994_v36  ;;  %v4196_v62 = vmax.f32 %v4098_v35, 0.0 }
 0x1e5   : > { %v4097_v8 = vadd.f32 %v7384_v56, %v3992_v17  ;;  %v6049_v18 = vpop.f32.mrb[120].mxu0  ;;  %v6245_v0 = vpop.f32.mrb[120].mxu1  ;;  %v4194_v9 = vmax.f32 %v4096_v63, 0.0 }
 0x1e6   : > { %v4197_v59 = vmax.f32 %v4099_v7, 0.0  ;;  %v3801_v41 = vmax.f32 %v6965_v19, %v6049_v18  ;;  %v3899_v42 = vmax.f32 %v6967_v20, %v6245_v0  ;;  %v2690_v21 = vpop.f32.mrb[121].mxu0  ;;  %v3474_v22 = vpop.f32.mrb[121].mxu1  ;;  %v7904_v0 = vld [vmem:[#allocation7_spill] sm:$0xff] }
 0x1e7   : > { %v4195_v44 = vmax.f32 %v4097_v8, 0.0  ;;  %v3799_v10 = vmax.f32 %v6937_v47, %v2690_v21  ;;  %v3897_v15 = vmax.f32 %v6939_v48, %v3474_v22  ;;  %v6050_v5 = vpop.f32.mrb[122].mxu0  ;;  %v6246_v6 = vpop.f32.mrb[122].mxu1  ;;  %v7903_v8 = vld [vmem:[#allocation6_spill] sm:$0xff] }
 0x1e8   : > { %v5476_v37 = vpack.c.bf16 %v4197_v59, %v4196_v62  ;;  %v3997_v61 = vmax.f32 %v3801_v41, %v3899_v42  ;;  %v3802_v38 = vmax.f32 %v6977_v43, %v6050_v5  ;;  %v3900_v19 = vmax.f32 %v7894_v16, %v6246_v6  ;;  %v2693_v57 = vpop.f32.mrb[123].mxu0  ;;  %v3477_v20 = vpop.f32.mrb[123].mxu1  ;;  %v7905_v6 = vld [vmem:[#allocation19_spill] sm:$0xff] }
 0x1e9   : > { %v5471_v58 = vpack.c.bf16 %v4195_v44, %v4194_v9  ;;  %v3995_v55 = vmax.f32 %v3799_v10, %v3897_v15  ;;  %v3800_v24 = vmax.f32 %v7895_v23, %v2693_v57  ;;  %v3898_v4 = vmax.f32 %v7896_v27, %v3477_v20  ;;  %v7908_v23 = vld [vmem:[#allocation10_spill] sm:$0xff] }
 0x1ea   : > { %5677 = vst [vmem:[%s7399_s8 + $0x50] sm:$0xff] %v5476_v37   ;;  %v4102_v47 = vadd.f32 %v7384_v56, %v3997_v61  ;;  %v3998_v48 = vmax.f32 %v3802_v38, %v3900_v19  ;;  %v7906_v61 = vld [vmem:[#allocation20_spill] sm:$0xff] }
 0x1eb   : > { %5676 = vst [vmem:[%s7399_s8 + $0x48] sm:$0xff] %v5471_v58   ;;  %v4100_v45 = vadd.f32 %v7384_v56, %v3995_v55  ;;  %v3996_v46 = vmax.f32 %v3800_v24, %v3898_v4  ;;  %v7907_v58 = vld [vmem:[#allocation9_spill] sm:$0xff] }
 0x1ec   : > { %v4103_v43 = vadd.f32 %v7384_v56, %v3998_v48  ;;  %v4200_v1 = vmax.f32 %v4102_v47, 0.0 }
 0x1ed   : > { %v4101_v3 = vadd.f32 %v7384_v56, %v3996_v46  ;;  %v6053_v54 = vpop.f32.mrb[124].mxu0  ;;  %v6249_v32 = vpop.f32.mrb[124].mxu1  ;;  %v4198_v13 = vmax.f32 %v4100_v45, 0.0  ;;  %v7909_v45 = vld [vmem:[#allocation23_spill] sm:$0xff] }
 0x1ee   : > { %v4201_v29 = vmax.f32 %v4103_v43, 0.0  ;;  %v3805_v25 = vmax.f32 %v7897_v30, %v6053_v54  ;;  %v3903_v26 = vmax.f32 %v7898_v2, %v6249_v32  ;;  %v2706_v60 = vpop.f32.mrb[125].mxu0  ;;  %v3490_v31 = vpop.f32.mrb[125].mxu1  ;;  %v7910_v43 = vld [vmem:[#allocation24_spill] sm:$0xff]  ;;  %v7911_v30 = vld [vmem:[#allocation13_spill] sm:$0xff]  ;;  %v7912_v2 = vld [vmem:[#allocation14_spill] sm:$0xff] }
 0x1ef   : > { %v4199_v39 = vmax.f32 %v4101_v3, 0.0  ;;  %v3803_v12 = vmax.f32 %v7899_v11, %v2706_v60  ;;  %v3901_v40 = vmax.f32 %v7900_v14, %v3490_v31  ;;  %v6054_v49 = vpop.f32.mrb[126].mxu0  ;;  %v6250_v33 = vpop.f32.mrb[126].mxu1 }
 0x1f0   : > { %v5486_v50 = vpack.c.bf16 %v4201_v29, %v4200_v1  ;;  %v4001_v34 = vmax.f32 %v3805_v25, %v3903_v26  ;;  %v3806_v28 = vmax.f32 %v7901_v51, %v6054_v49  ;;  %v3904_v35 = vmax.f32 %v7902_v52, %v6250_v33  ;;  %v2709_v36 = vpop.f32.mrb[127].mxu0  ;;  %v3493_v63 = vpop.f32.mrb[127].mxu1  ;;  %v7914_v51 = vld [vmem:[#allocation28_spill] sm:$0xff] }
 0x1f1   : > { %v5481_v17 = vpack.c.bf16 %v4199_v39, %v4198_v13  ;;  %v3999_v7 = vmax.f32 %v3803_v12, %v3901_v40  ;;  %v3804_v18 = vmax.f32 %v7903_v8, %v2709_v36  ;;  %v3902_v62 = vmax.f32 %v7904_v0, %v3493_v63  ;;  %v7916_v8 = vld [vmem:[#allocation18_spill] sm:$0xff] }
 0x1f2   : > { %5679 = vst [vmem:[%s7399_s8 + $0x60] sm:$0xff] %v5486_v50   ;;  %v4106_v59 = vadd.f32 %v7384_v56, %v4001_v34  ;;  %v4002_v41 = vmax.f32 %v3806_v28, %v3904_v35  ;;  %v7913_v50 = vld [vmem:[#allocation27_spill] sm:$0xff] }
 0x1f3   : > { %5678 = vst [vmem:[%s7399_s8 + $0x58] sm:$0xff] %v5481_v17   ;;  %v4104_v42 = vadd.f32 %v7384_v56, %v3999_v7  ;;  %v4000_v21 = vmax.f32 %v3804_v18, %v3902_v62  ;;  %v7915_v17 = vld [vmem:[#allocation17_spill] sm:$0xff] }
 0x1f4   : > { %v4107_v22 = vadd.f32 %v7384_v56, %v4002_v41  ;;  %v4204_v15 = vmax.f32 %v4106_v59, 0.0 }
 0x1f5   : > { %v4105_v9 = vadd.f32 %v7384_v56, %v4000_v21  ;;  %v6057_v44 = vpop.f32.mrb[128].mxu0  ;;  %v6253_v10 = vpop.f32.mrb[128].mxu1  ;;  %v4202_v57 = vmax.f32 %v4104_v42, 0.0  ;;  %v7917_v42 = vld [vmem:[#allocation31_spill] sm:$0xff] }
 0x1f6   : > { %v4205_v5 = vmax.f32 %v4107_v22, 0.0  ;;  %v3809_v37 = vmax.f32 %v7905_v6, %v6057_v44  ;;  %v3907_v38 = vmax.f32 %v7906_v61, %v6253_v10  ;;  %v2722_v16 = vpop.f32.mrb[129].mxu0  ;;  %v3506_v19 = vpop.f32.mrb[129].mxu1  ;;  %v7918_v22 = vld [vmem:[#allocation32_spill] sm:$0xff]  ;;  %v7919_v6 = vld [vmem:[#allocation21_spill] sm:$0xff]  ;;  %v7920_v61 = vld [vmem:[#allocation22_spill] sm:$0xff] }
 0x1f7   : > { %v4203_v20 = vmax.f32 %v4105_v9, 0.0  ;;  %v3807_v55 = vmax.f32 %v7907_v58, %v2722_v16  ;;  %v3905_v24 = vmax.f32 %v7908_v23, %v3506_v19  ;;  %v6058_v27 = vpop.f32.mrb[130].mxu0  ;;  %v6254_v4 = vpop.f32.mrb[130].mxu1 }
 0x1f8   : > { %v5496_v47 = vpack.c.bf16 %v4205_v5, %v4204_v15  ;;  %v4005_v48 = vmax.f32 %v3809_v37, %v3907_v38  ;;  %v3810_v46 = vmax.f32 %v7909_v45, %v6058_v27  ;;  %v3908_v3 = vmax.f32 %v7910_v43, %v6254_v4  ;;  %v2725_v54 = vpop.f32.mrb[131].mxu0  ;;  %v3509_v32 = vpop.f32.mrb[131].mxu1  ;;  %v7922_v45 = vld [vmem:[#allocation36_spill] sm:$0xff] }
 0x1f9   : > { %v5491_v1 = vpack.c.bf16 %v4203_v20, %v4202_v57  ;;  %v4003_v29 = vmax.f32 %v3807_v55, %v3905_v24  ;;  %v3808_v25 = vmax.f32 %v7911_v30, %v2725_v54  ;;  %v3906_v26 = vmax.f32 %v7912_v2, %v3509_v32  ;;  %v7924_v30 = vld [vmem:[#allocation26_spill] sm:$0xff] }
 0x1fa   : > { %5681 = vst [vmem:[%s7399_s8 + $0x70] sm:$0xff] %v5496_v47   ;;  %v4110_v60 = vadd.f32 %v7384_v56, %v4005_v48  ;;  %v4006_v31 = vmax.f32 %v3810_v46, %v3908_v3  ;;  %v7921_v47 = vld [vmem:[#allocation35_spill] sm:$0xff] }
 0x1fb   : > { %5680 = vst [vmem:[%s7399_s8 + $0x68] sm:$0xff] %v5491_v1   ;;  %v4108_v13 = vadd.f32 %v7384_v56, %v4003_v29  ;;  %v4004_v39 = vmax.f32 %v3808_v25, %v3906_v26  ;;  %v7923_v1 = vld [vmem:[#allocation25_spill] sm:$0xff] }
 0x1fc   : > { %v4111_v11 = vadd.f32 %v7384_v56, %v4006_v31  ;;  %v4208_v49 = vmax.f32 %v4110_v60, 0.0 }
 0x1fd   : > { %v4109_v12 = vadd.f32 %v7384_v56, %v4004_v39  ;;  %v6061_v14 = vpop.f32.mrb[132].mxu0  ;;  %v6257_v40 = vpop.f32.mrb[132].mxu1  ;;  %v4206_v36 = vmax.f32 %v4108_v13, 0.0  ;;  %v7925_v13 = vld [vmem:[#allocation39_spill] sm:$0xff] }
 0x1fe   : > { %v4209_v33 = vmax.f32 %v4111_v11, 0.0  ;;  %v3813_v34 = vmax.f32 %v7913_v50, %v6061_v14  ;;  %v3911_v28 = vmax.f32 %v7914_v51, %v6257_v40  ;;  %v2738_v52 = vpop.f32.mrb[133].mxu0  ;;  %v3522_v35 = vpop.f32.mrb[133].mxu1  ;;  %v7926_v11 = vld [vmem:[#allocation40_spill] sm:$0xff]  ;;  %v7927_v50 = vld [vmem:[#allocation29_spill] sm:$0xff]  ;;  %v7928_v51 = vld [vmem:[#allocation30_spill] sm:$0xff] }
 0x1ff   : > { %v4207_v63 = vmax.f32 %v4109_v12, 0.0  ;;  %v3811_v7 = vmax.f32 %v7915_v17, %v2738_v52  ;;  %v3909_v18 = vmax.f32 %v7916_v8, %v3522_v35  ;;  %v6062_v0 = vpop.f32.mrb[134].mxu0  ;;  %v6258_v62 = vpop.f32.mrb[134].mxu1 }
 0x200   : > { %v5506_v59 = vpack.c.bf16 %v4209_v33, %v4208_v49  ;;  %v4009_v41 = vmax.f32 %v3813_v34, %v3911_v28  ;;  %v3814_v21 = vmax.f32 %v7917_v42, %v6062_v0  ;;  %v3912_v9 = vmax.f32 %v7918_v22, %v6258_v62  ;;  %v2741_v44 = vpop.f32.mrb[135].mxu0  ;;  %v3525_v10 = vpop.f32.mrb[135].mxu1  ;;  %v7930_v42 = vld [vmem:[#allocation44_spill] sm:$0xff] }
 0x201   : > { %v5501_v15 = vpack.c.bf16 %v4207_v63, %v4206_v36  ;;  %v4007_v5 = vmax.f32 %v3811_v7, %v3909_v18  ;;  %v3812_v37 = vmax.f32 %v7919_v6, %v2741_v44  ;;  %v3910_v38 = vmax.f32 %v7920_v61, %v3525_v10  ;;  %v7932_v6 = vld [vmem:[#allocation34_spill] sm:$0xff] }
 0x202   : > { %5683 = vst [vmem:[%s7399_s8 + $0x80] sm:$0xff] %v5506_v59   ;;  %v4114_v16 = vadd.f32 %v7384_v56, %v4009_v41  ;;  %v4010_v19 = vmax.f32 %v3814_v21, %v3912_v9  ;;  %v7929_v59 = vld [vmem:[#allocation43_spill] sm:$0xff] }
 0x203   : > { %5682 = vst [vmem:[%s7399_s8 + $0x78] sm:$0xff] %v5501_v15   ;;  %v4112_v57 = vadd.f32 %v7384_v56, %v4007_v5  ;;  %v4008_v20 = vmax.f32 %v3812_v37, %v3910_v38  ;;  %v7931_v15 = vld [vmem:[#allocation33_spill] sm:$0xff] }
 0x204   : > { %v4115_v58 = vadd.f32 %v7384_v56, %v4010_v19  ;;  %v4212_v27 = vmax.f32 %v4114_v16, 0.0 }
 0x205   : > { %v4113_v55 = vadd.f32 %v7384_v56, %v4008_v20  ;;  %v6065_v23 = vpop.f32.mrb[136].mxu0  ;;  %v6261_v24 = vpop.f32.mrb[136].mxu1  ;;  %v4210_v54 = vmax.f32 %v4112_v57, 0.0  ;;  %v7933_v57 = vld [vmem:[#allocation47_spill] sm:$0xff] }
 0x206   : > { %v4213_v4 = vmax.f32 %v4115_v58, 0.0  ;;  %v3817_v48 = vmax.f32 %v7921_v47, %v6065_v23  ;;  %v3915_v46 = vmax.f32 %v7922_v45, %v6261_v24  ;;  %v2754_v43 = vpop.f32.mrb[137].mxu0  ;;  %v3538_v3 = vpop.f32.mrb[137].mxu1  ;;  %v7934_v58 = vld [vmem:[#allocation48_spill] sm:$0xff]  ;;  %v7935_v47 = vld [vmem:[#allocation37_spill] sm:$0xff]  ;;  %v7936_v45 = vld [vmem:[#allocation38_spill] sm:$0xff] }
 0x207   : > { %v4211_v32 = vmax.f32 %v4113_v55, 0.0  ;;  %v3815_v29 = vmax.f32 %v7923_v1, %v2754_v43  ;;  %v3913_v25 = vmax.f32 %v7924_v30, %v3538_v3  ;;  %v6066_v2 = vpop.f32.mrb[138].mxu0  ;;  %v6262_v26 = vpop.f32.mrb[138].mxu1 }
 0x208   : > { %v5516_v60 = vpack.c.bf16 %v4213_v4, %v4212_v27  ;;  %v4013_v31 = vmax.f32 %v3817_v48, %v3915_v46  ;;  %v3818_v39 = vmax.f32 %v7925_v13, %v6066_v2  ;;  %v3916_v12 = vmax.f32 %v7926_v11, %v6262_v26  ;;  %v2757_v14 = vpop.f32.mrb[139].mxu0  ;;  %v3541_v40 = vpop.f32.mrb[139].mxu1  ;;  %v7938_v13 = vld [vmem:[#allocation52_spill] sm:$0xff] }
 0x209   : > { %v5511_v49 = vpack.c.bf16 %v4211_v32, %v4210_v54  ;;  %v4011_v33 = vmax.f32 %v3815_v29, %v3913_v25  ;;  %v3816_v34 = vmax.f32 %v7927_v50, %v2757_v14  ;;  %v3914_v28 = vmax.f32 %v7928_v51, %v3541_v40  ;;  %v7940_v50 = vld [vmem:[#allocation42_spill] sm:$0xff] }
 0x20a   : > { %5685 = vst [vmem:[%s7399_s8 + $0x90] sm:$0xff] %v5516_v60   ;;  %v4118_v52 = vadd.f32 %v7384_v56, %v4013_v31  ;;  %v4014_v35 = vmax.f32 %v3818_v39, %v3916_v12  ;;  %v7937_v60 = vld [vmem:[#allocation51_spill] sm:$0xff] }
 0x20b   : > { %5684 = vst [vmem:[%s7399_s8 + $0x88] sm:$0xff] %v5511_v49   ;;  %v4116_v36 = vadd.f32 %v7384_v56, %v4011_v33  ;;  %v4012_v63 = vmax.f32 %v3816_v34, %v3914_v28  ;;  %v7939_v49 = vld [vmem:[#allocation41_spill] sm:$0xff] }
 0x20c   : > { %v4119_v17 = vadd.f32 %v7384_v56, %v4014_v35  ;;  %v4216_v0 = vmax.f32 %v4118_v52, 0.0 }
 0x20d   : > { %v4117_v7 = vadd.f32 %v7384_v56, %v4012_v63  ;;  %v6069_v8 = vpop.f32.mrb[140].mxu0  ;;  %v6265_v18 = vpop.f32.mrb[140].mxu1  ;;  %v4214_v44 = vmax.f32 %v4116_v36, 0.0  ;;  %v7941_v36 = vld [vmem:[#allocation55_spill] sm:$0xff] }
 0x20e   : > { %v4217_v62 = vmax.f32 %v4119_v17, 0.0  ;;  %v3821_v41 = vmax.f32 %v7929_v59, %v6069_v8  ;;  %v3919_v21 = vmax.f32 %v7930_v42, %v6265_v18  ;;  %v2770_v22 = vpop.f32.mrb[141].mxu0  ;;  %v3554_v9 = vpop.f32.mrb[141].mxu1  ;;  %v7942_v17 = vld [vmem:[#allocation56_spill] sm:$0xff]  ;;  %v7943_v59 = vld [vmem:[#allocation45_spill] sm:$0xff]  ;;  %v7944_v42 = vld [vmem:[#allocation46_spill] sm:$0xff] }
 0x20f   : > { %v4215_v10 = vmax.f32 %v4117_v7, 0.0  ;;  %v3819_v5 = vmax.f32 %v7931_v15, %v2770_v22  ;;  %v3917_v37 = vmax.f32 %v7932_v6, %v3554_v9  ;;  %v6070_v61 = vpop.f32.mrb[142].mxu0  ;;  %v6266_v38 = vpop.f32.mrb[142].mxu1 }
 0x210   : > { %v5526_v16 = vpack.c.bf16 %v4217_v62, %v4216_v0  ;;  %v4017_v19 = vmax.f32 %v3821_v41, %v3919_v21  ;;  %v3822_v20 = vmax.f32 %v7933_v57, %v6070_v61  ;;  %v3920_v55 = vmax.f32 %v7934_v58, %v6266_v38  ;;  %v2773_v23 = vpop.f32.mrb[143].mxu0  ;;  %v3557_v24 = vpop.f32.mrb[143].mxu1  ;;  %v7946_v57 = vld [vmem:[#allocation60_spill] sm:$0xff] }
 0x211   : > { %v5521_v27 = vpack.c.bf16 %v4215_v10, %v4214_v44  ;;  %v4015_v4 = vmax.f32 %v3819_v5, %v3917_v37  ;;  %v3820_v48 = vmax.f32 %v7935_v47, %v2773_v23  ;;  %v3918_v46 = vmax.f32 %v7936_v45, %v3557_v24  ;;  %v7948_v47 = vld [vmem:[#allocation50_spill] sm:$0xff] }
 0x212   : > { %5687 = vst [vmem:[%s7399_s8 + $0xa0] sm:$0xff] %v5526_v16   ;;  %v4122_v43 = vadd.f32 %v7384_v56, %v4017_v19  ;;  %v4018_v3 = vmax.f32 %v3822_v20, %v3920_v55  ;;  %v7945_v16 = vld [vmem:[#allocation59_spill] sm:$0xff] }
 0x213   : > { %5686 = vst [vmem:[%s7399_s8 + $0x98] sm:$0xff] %v5521_v27   ;;  %v4120_v54 = vadd.f32 %v7384_v56, %v4015_v4  ;;  %v4016_v32 = vmax.f32 %v3820_v48, %v3918_v46  ;;  %v7947_v27 = vld [vmem:[#allocation49_spill] sm:$0xff] }
 0x214   : > { %v4123_v1 = vadd.f32 %v7384_v56, %v4018_v3  ;;  %v4220_v2 = vmax.f32 %v4122_v43, 0.0 }
 0x215   : > { %v4121_v29 = vadd.f32 %v7384_v56, %v4016_v32  ;;  %v6073_v30 = vpop.f32.mrb[144].mxu0  ;;  %v6269_v25 = vpop.f32.mrb[144].mxu1  ;;  %v4218_v14 = vmax.f32 %v4120_v54, 0.0  ;;  %v7949_v54 = vld [vmem:[#allocation63_spill] sm:$0xff] }
 0x216   : > { %v4221_v26 = vmax.f32 %v4123_v1, 0.0  ;;  %v3825_v31 = vmax.f32 %v7937_v60, %v6073_v30  ;;  %v3923_v39 = vmax.f32 %v7938_v13, %v6269_v25  ;;  %v2786_v11 = vpop.f32.mrb[145].mxu0  ;;  %v3570_v12 = vpop.f32.mrb[145].mxu1  ;;  %v7950_v1 = vld [vmem:[#allocation64_spill] sm:$0xff]  ;;  %v7951_v60 = vld [vmem:[#allocation53_spill] sm:$0xff]  ;;  %v7952_v13 = vld [vmem:[#allocation54_spill] sm:$0xff] }
 0x217   : > { %v4219_v40 = vmax.f32 %v4121_v29, 0.0  ;;  %v3823_v33 = vmax.f32 %v7939_v49, %v2786_v11  ;;  %v3921_v34 = vmax.f32 %v7940_v50, %v3570_v12  ;;  %v6074_v51 = vpop.f32.mrb[146].mxu0  ;;  %v6270_v28 = vpop.f32.mrb[146].mxu1 }
 0x218   : > { %v5536_v52 = vpack.c.bf16 %v4221_v26, %v4220_v2  ;;  %v4021_v35 = vmax.f32 %v3825_v31, %v3923_v39  ;;  %v3826_v63 = vmax.f32 %v7941_v36, %v6074_v51  ;;  %v3924_v7 = vmax.f32 %v7942_v17, %v6270_v28  ;;  %v2789_v8 = vpop.f32.mrb[147].mxu0  ;;  %v3573_v18 = vpop.f32.mrb[147].mxu1  ;;  %v7954_v36 = vld [vmem:[#allocation68_spill] sm:$0xff] }
 0x219   : > { %v5531_v0 = vpack.c.bf16 %v4219_v40, %v4218_v14  ;;  %v4019_v62 = vmax.f32 %v3823_v33, %v3921_v34  ;;  %v3824_v41 = vmax.f32 %v7943_v59, %v2789_v8  ;;  %v3922_v21 = vmax.f32 %v7944_v42, %v3573_v18  ;;  %v7956_v59 = vld [vmem:[#allocation58_spill] sm:$0xff] }
 0x21a   : > { %5689 = vst [vmem:[%s7399_s8 + $0xb0] sm:$0xff] %v5536_v52   ;;  %v4126_v22 = vadd.f32 %v7384_v56, %v4021_v35  ;;  %v4022_v9 = vmax.f32 %v3826_v63, %v3924_v7  ;;  %v7953_v52 = vld [vmem:[#allocation67_spill] sm:$0xff] }
 0x21b   : > { %5688 = vst [vmem:[%s7399_s8 + $0xa8] sm:$0xff] %v5531_v0   ;;  %v4124_v44 = vadd.f32 %v7384_v56, %v4019_v62  ;;  %v4020_v10 = vmax.f32 %v3824_v41, %v3922_v21  ;;  %v7955_v0 = vld [vmem:[#allocation57_spill] sm:$0xff] }
 0x21c   : > { %v4127_v15 = vadd.f32 %v7384_v56, %v4022_v9  ;;  %v4224_v61 = vmax.f32 %v4126_v22, 0.0 }
 0x21d   : > { %v4125_v5 = vadd.f32 %v7384_v56, %v4020_v10  ;;  %v6077_v6 = vpop.f32.mrb[148].mxu0  ;;  %v6273_v37 = vpop.f32.mrb[148].mxu1  ;;  %v4222_v23 = vmax.f32 %v4124_v44, 0.0  ;;  %v7957_v44 = vld [vmem:[#allocation71_spill] sm:$0xff] }
 0x21e   : > { %v4225_v38 = vmax.f32 %v4127_v15, 0.0  ;;  %v3829_v19 = vmax.f32 %v7945_v16, %v6077_v6  ;;  %v3927_v20 = vmax.f32 %v7946_v57, %v6273_v37  ;;  %v2802_v58 = vpop.f32.mrb[149].mxu0  ;;  %v3586_v55 = vpop.f32.mrb[149].mxu1  ;;  %v7958_v15 = vld [vmem:[#allocation72_spill] sm:$0xff]  ;;  %v7959_v16 = vld [vmem:[#allocation61_spill] sm:$0xff]  ;;  %v7960_v57 = vld [vmem:[#allocation62_spill] sm:$0xff] }
 0x21f   : > { %v4223_v24 = vmax.f32 %v4125_v5, 0.0  ;;  %v3827_v4 = vmax.f32 %v7947_v27, %v2802_v58  ;;  %v3925_v48 = vmax.f32 %v7948_v47, %v3586_v55  ;;  %v6078_v45 = vpop.f32.mrb[150].mxu0  ;;  %v6274_v46 = vpop.f32.mrb[150].mxu1 }
 0x220   : > { %v5546_v43 = vpack.c.bf16 %v4225_v38, %v4224_v61  ;;  %v4025_v3 = vmax.f32 %v3829_v19, %v3927_v20  ;;  %v3830_v32 = vmax.f32 %v7949_v54, %v6078_v45  ;;  %v3928_v29 = vmax.f32 %v7950_v1, %v6274_v46  ;;  %v2805_v30 = vpop.f32.mrb[151].mxu0  ;;  %v3589_v25 = vpop.f32.mrb[151].mxu1  ;;  %v7962_v54 = vld [vmem:[#allocation76_spill] sm:$0xff] }
 0x221   : > { %v5541_v2 = vpack.c.bf16 %v4223_v24, %v4222_v23  ;;  %v4023_v26 = vmax.f32 %v3827_v4, %v3925_v48  ;;  %v3828_v31 = vmax.f32 %v7951_v60, %v2805_v30  ;;  %v3926_v39 = vmax.f32 %v7952_v13, %v3589_v25  ;;  %v7964_v60 = vld [vmem:[#allocation66_spill] sm:$0xff] }
 0x222   : > { %5691 = vst [vmem:[%s7399_s8 + $0xc0] sm:$0xff] %v5546_v43   ;;  %v4130_v11 = vadd.f32 %v7384_v56, %v4025_v3  ;;  %v4026_v12 = vmax.f32 %v3830_v32, %v3928_v29  ;;  %v7961_v43 = vld [vmem:[#allocation75_spill] sm:$0xff] }
 0x223   : > { %5690 = vst [vmem:[%s7399_s8 + $0xb8] sm:$0xff] %v5541_v2   ;;  %v4128_v14 = vadd.f32 %v7384_v56, %v4023_v26  ;;  %v4024_v40 = vmax.f32 %v3828_v31, %v3926_v39  ;;  %v7963_v2 = vld [vmem:[#allocation65_spill] sm:$0xff] }
 0x224   : > { %v4131_v49 = vadd.f32 %v7384_v56, %v4026_v12  ;;  %v4228_v51 = vmax.f32 %v4130_v11, 0.0 }
 0x225   : > { %v4129_v33 = vadd.f32 %v7384_v56, %v4024_v40  ;;  %v6081_v50 = vpop.f32.mrb[152].mxu0  ;;  %v6277_v34 = vpop.f32.mrb[152].mxu1  ;;  %v4226_v8 = vmax.f32 %v4128_v14, 0.0  ;;  %v7965_v14 = vld [vmem:[#allocation79_spill] sm:$0xff] }
 0x226   : > { %v4229_v28 = vmax.f32 %v4131_v49, 0.0  ;;  %v3833_v35 = vmax.f32 %v7953_v52, %v6081_v50  ;;  %v3931_v63 = vmax.f32 %v7954_v36, %v6277_v34  ;;  %v2818_v17 = vpop.f32.mrb[153].mxu0  ;;  %v3602_v7 = vpop.f32.mrb[153].mxu1  ;;  %v7966_v49 = vld [vmem:[#allocation80_spill] sm:$0xff]  ;;  %v7967_v52 = vld [vmem:[#allocation69_spill] sm:$0xff]  ;;  %v7968_v36 = vld [vmem:[#allocation70_spill] sm:$0xff] }
 0x227   : > { %v4227_v18 = vmax.f32 %v4129_v33, 0.0  ;;  %v3831_v62 = vmax.f32 %v7955_v0, %v2818_v17  ;;  %v3929_v41 = vmax.f32 %v7956_v59, %v3602_v7  ;;  %v6082_v42 = vpop.f32.mrb[154].mxu0  ;;  %v6278_v21 = vpop.f32.mrb[154].mxu1 }
 0x228   : > { %v5556_v22 = vpack.c.bf16 %v4229_v28, %v4228_v51  ;;  %v4029_v9 = vmax.f32 %v3833_v35, %v3931_v63  ;;  %v3834_v10 = vmax.f32 %v7957_v44, %v6082_v42  ;;  %v3932_v5 = vmax.f32 %v7958_v15, %v6278_v21  ;;  %v2821_v6 = vpop.f32.mrb[155].mxu0  ;;  %v3605_v37 = vpop.f32.mrb[155].mxu1  ;;  %v7970_v44 = vld [vmem:[#allocation84_spill] sm:$0xff] }
 0x229   : > { %v5551_v61 = vpack.c.bf16 %v4227_v18, %v4226_v8  ;;  %v4027_v38 = vmax.f32 %v3831_v62, %v3929_v41  ;;  %v3832_v19 = vmax.f32 %v7959_v16, %v2821_v6  ;;  %v3930_v20 = vmax.f32 %v7960_v57, %v3605_v37  ;;  %v7972_v16 = vld [vmem:[#allocation74_spill] sm:$0xff] }
 0x22a   : > { %5693 = vst [vmem:[%s7399_s8 + $0xd0] sm:$0xff] %v5556_v22   ;;  %v4134_v58 = vadd.f32 %v7384_v56, %v4029_v9  ;;  %v4030_v55 = vmax.f32 %v3834_v10, %v3932_v5  ;;  %v7969_v22 = vld [vmem:[#allocation83_spill] sm:$0xff] }
 0x22b   : > { %5692 = vst [vmem:[%s7399_s8 + $0xc8] sm:$0xff] %v5551_v61   ;;  %v4132_v23 = vadd.f32 %v7384_v56, %v4027_v38  ;;  %v4028_v24 = vmax.f32 %v3832_v19, %v3930_v20  ;;  %v7971_v61 = vld [vmem:[#allocation73_spill] sm:$0xff] }
 0x22c   : > { %v4135_v27 = vadd.f32 %v7384_v56, %v4030_v55  ;;  %v4232_v45 = vmax.f32 %v4134_v58, 0.0  ;;  %v7973_v55 = vld [vmem:[#allocation87_spill] sm:$0xff] }
 0x22d   : > { %v4133_v4 = vadd.f32 %v7384_v56, %v4028_v24  ;;  %v6085_v47 = vpop.f32.mrb[156].mxu0  ;;  %v6281_v48 = vpop.f32.mrb[156].mxu1  ;;  %v4230_v30 = vmax.f32 %v4132_v23, 0.0  ;;  %v7974_v24 = vld [vmem:[#allocation88_spill] sm:$0xff] }
 0x22e   : > { %v4233_v46 = vmax.f32 %v4135_v27, 0.0  ;;  %v3837_v3 = vmax.f32 %v7961_v43, %v6085_v47  ;;  %v3935_v32 = vmax.f32 %v7962_v54, %v6281_v48  ;;  %v2834_v1 = vpop.f32.mrb[157].mxu0  ;;  %v3618_v29 = vpop.f32.mrb[157].mxu1 }
 0x22f   : > { %v4231_v25 = vmax.f32 %v4133_v4, 0.0  ;;  %v3835_v26 = vmax.f32 %v7963_v2, %v2834_v1  ;;  %v3933_v31 = vmax.f32 %v7964_v60, %v3618_v29  ;;  %v6086_v13 = vpop.f32.mrb[158].mxu0  ;;  %v6282_v39 = vpop.f32.mrb[158].mxu1 }
 0x230   : > { %v5566_v11 = vpack.c.bf16 %v4233_v46, %v4232_v45  ;;  %v4033_v12 = vmax.f32 %v3837_v3, %v3935_v32  ;;  %v3838_v40 = vmax.f32 %v7965_v14, %v6086_v13  ;;  %v3936_v33 = vmax.f32 %v7966_v49, %v6282_v39  ;;  %v2837_v50 = vpop.f32.mrb[159].mxu0  ;;  %v3621_v34 = vpop.f32.mrb[159].mxu1  ;;  %v7975_v46 = vld [vmem:[#allocation77_spill] sm:$0xff]  ;;  %v7976_v3 = vld [vmem:[#allocation78_spill] sm:$0xff]  ;;  %v7978_v14 = vld [vmem:[#allocation92_spill] sm:$0xff] }
 0x231   : > { %v5561_v51 = vpack.c.bf16 %v4231_v25, %v4230_v30  ;;  %v4031_v28 = vmax.f32 %v3835_v26, %v3933_v31  ;;  %v3836_v35 = vmax.f32 %v7967_v52, %v2837_v50  ;;  %v3934_v63 = vmax.f32 %v7968_v36, %v3621_v34  ;;  %v7620_v32 = vld [vmem:[%s7746_s2] ss:$0 sm:$0xff] }
 0x232   : > { %5695 = vst [vmem:[%s7399_s8 + $0xe0] sm:$0xff] %v5566_v11   ;;  %v4138_v17 = vadd.f32 %v7384_v56, %v4033_v12  ;;  %v4034_v7 = vmax.f32 %v3838_v40, %v3936_v33  ;;  %v7977_v11 = vld [vmem:[#allocation91_spill] sm:$0xff]  ;;  %v7980_v52 = vld [vmem:[#allocation82_spill] sm:$0xff] }
 0x233   : > { %5694 = vst [vmem:[%s7399_s8 + $0xd8] sm:$0xff] %v5561_v51   ;;  %v4136_v8 = vadd.f32 %v7384_v56, %v4031_v28  ;;  %v4032_v18 = vmax.f32 %v3836_v35, %v3934_v63  ;;  %v7979_v51 = vld [vmem:[#allocation81_spill] sm:$0xff] }
 0x234   : > { %v4139_v0 = vadd.f32 %v7384_v56, %v4034_v7  ;;  %v4236_v42 = vmax.f32 %v4138_v17, 0.0 }
 0x235   : > { %v4137_v62 = vadd.f32 %v7384_v56, %v4032_v18  ;;  %v6089_v59 = vpop.f32.mrb[160].mxu0  ;;  %v6285_v41 = vpop.f32.mrb[160].mxu1  ;;  %v4234_v6 = vmax.f32 %v4136_v8, 0.0  ;;  %v7981_v8 = vld [vmem:[#allocation95_spill] sm:$0xff] }
 0x236   : > { %v4237_v21 = vmax.f32 %v4139_v0, 0.0  ;;  %v3841_v9 = vmax.f32 %v7969_v22, %v6089_v59  ;;  %v3939_v10 = vmax.f32 %v7970_v44, %v6285_v41  ;;  %v2850_v15 = vpop.f32.mrb[161].mxu0  ;;  %v3634_v5 = vpop.f32.mrb[161].mxu1  ;;  %v7982_v0 = vld [vmem:[#allocation96_spill] sm:$0xff]  ;;  %v7983_v22 = vld [vmem:[#allocation85_spill] sm:$0xff]  ;;  %v7984_v44 = vld [vmem:[#allocation86_spill] sm:$0xff] }
 0x237   : > { %v4235_v37 = vmax.f32 %v4137_v62, 0.0  ;;  %v3839_v38 = vmax.f32 %v7971_v61, %v2850_v15  ;;  %v3937_v19 = vmax.f32 %v7972_v16, %v3634_v5  ;;  %v6090_v57 = vpop.f32.mrb[162].mxu0  ;;  %v6286_v56 = vpop.f32.mrb[162].mxu1 }
 0x238   : > { %v5576_v20 = vpack.c.bf16 %v4237_v21, %v4236_v42  ;;  %v4037_v58 = vmax.f32 %v3841_v9, %v3939_v10  ;;  %v3842_v23 = vmax.f32 %v7973_v55, %v6090_v57  ;;  %v3940_v27 = vmax.f32 %v7974_v24, %v6286_v56  ;;  %v2853_v4 = vpop.f32.mrb[163].mxu0  ;;  %v3637_v47 = vpop.f32.mrb[163].mxu1  ;;  %v7986_v55 = vld [vmem:[#allocation100_spill] sm:$0xff] }
 0x239   : > { %v5571_v48 = vpack.c.bf16 %v4235_v37, %v4234_v6  ;;  %v4035_v45 = vmax.f32 %v3839_v38, %v3937_v19  ;;  %v3840_v43 = vmax.f32 %v7975_v46, %v2853_v4  ;;  %v3938_v54 = vmax.f32 %v7976_v3, %v3637_v47  ;;  %v7988_v46 = vld [vmem:[#allocation90_spill] sm:$0xff] }
 0x23a   : > { %5697 = vst [vmem:[%s7399_s8 + $0xf0] sm:$0xff] %v5576_v20   ;;  %v4142_v1 = vadd.f32 %v7620_v32, %v4037_v58  ;;  %v4038_v29 = vmax.f32 %v3842_v23, %v3940_v27  ;;  %v7985_v20 = vld [vmem:[#allocation99_spill] sm:$0xff] }
 0x23b   : > { %5696 = vst [vmem:[%s7399_s8 + $0xe8] sm:$0xff] %v5571_v48   ;;  %v4140_v30 = vadd.f32 %v7620_v32, %v4035_v45  ;;  %v4036_v25 = vmax.f32 %v3840_v43, %v3938_v54  ;;  %v7987_v48 = vld [vmem:[#allocation89_spill] sm:$0xff] }
 0x23c   : > { %v4143_v2 = vadd.f32 %v7620_v32, %v4038_v29  ;;  %v4240_v13 = vmax.f32 %v4142_v1, 0.0 }
 0x23d   : > { %v4141_v26 = vadd.f32 %v7620_v32, %v4036_v25  ;;  %v6093_v60 = vpop.f32.mrb[164].mxu0  ;;  %v6289_v31 = vpop.f32.mrb[164].mxu1  ;;  %v4238_v50 = vmax.f32 %v4140_v30, 0.0  ;;  %v7989_v30 = vld [vmem:[#allocation103_spill] sm:$0xff] }
 0x23e   : > { %v4241_v39 = vmax.f32 %v4143_v2, 0.0  ;;  %v3845_v12 = vmax.f32 %v7977_v11, %v6093_v60  ;;  %v3943_v40 = vmax.f32 %v7978_v14, %v6289_v31  ;;  %v2866_v49 = vpop.f32.mrb[165].mxu0  ;;  %v3650_v33 = vpop.f32.mrb[165].mxu1  ;;  %v7990_v2 = vld [vmem:[#allocation104_spill] sm:$0xff]  ;;  %v7991_v11 = vld [vmem:[#allocation93_spill] sm:$0xff]  ;;  %v7992_v14 = vld [vmem:[#allocation94_spill] sm:$0xff] }
 0x23f   : > { %v4239_v34 = vmax.f32 %v4141_v26, 0.0  ;;  %v3843_v28 = vmax.f32 %v7979_v51, %v2866_v49  ;;  %v3941_v35 = vmax.f32 %v7980_v52, %v3650_v33  ;;  %v6094_v36 = vpop.f32.mrb[166].mxu0  ;;  %v6290_v63 = vpop.f32.mrb[166].mxu1 }
 0x240   : > { %v5586_v17 = vpack.c.bf16 %v4241_v39, %v4240_v13  ;;  %v4041_v7 = vmax.f32 %v3845_v12, %v3943_v40  ;;  %v3846_v18 = vmax.f32 %v7981_v8, %v6094_v36  ;;  %v3944_v62 = vmax.f32 %v7982_v0, %v6290_v63  ;;  %v2869_v59 = vpop.f32.mrb[167].mxu0  ;;  %v3653_v41 = vpop.f32.mrb[167].mxu1  ;;  %v7994_v8 = vld [vmem:[#allocation108_spill] sm:$0xff] }
 0x241   : > { %v5581_v42 = vpack.c.bf16 %v4239_v34, %v4238_v50  ;;  %v4039_v21 = vmax.f32 %v3843_v28, %v3941_v35  ;;  %v3844_v9 = vmax.f32 %v7983_v22, %v2869_v59  ;;  %v3942_v10 = vmax.f32 %v7984_v44, %v3653_v41  ;;  %v7996_v22 = vld [vmem:[#allocation98_spill] sm:$0xff] }
 0x242   : > { %5699 = vst [vmem:[%s7399_s8 + $0x100] sm:$0xff] %v5586_v17   ;;  %v4146_v15 = vadd.f32 %v7620_v32, %v4041_v7  ;;  %v4042_v5 = vmax.f32 %v3846_v18, %v3944_v62  ;;  %v7993_v17 = vld [vmem:[#allocation107_spill] sm:$0xff] }
 0x243   : > { %5698 = vst [vmem:[%s7399_s8 + $0xf8] sm:$0xff] %v5581_v42   ;;  %v4144_v6 = vadd.f32 %v7620_v32, %v4039_v21  ;;  %v4040_v37 = vmax.f32 %v3844_v9, %v3942_v10  ;;  %v7995_v42 = vld [vmem:[#allocation97_spill] sm:$0xff] }
 0x244   : > { %v4147_v61 = vadd.f32 %v7620_v32, %v4042_v5  ;;  %v4244_v57 = vmax.f32 %v4146_v15, 0.0 }
 0x245   : > { %v4145_v38 = vadd.f32 %v7620_v32, %v4040_v37  ;;  %v6097_v16 = vpop.f32.mrb[168].mxu0  ;;  %v6293_v19 = vpop.f32.mrb[168].mxu1  ;;  %v4242_v4 = vmax.f32 %v4144_v6, 0.0  ;;  %v7997_v6 = vld [vmem:[#allocation111_spill] sm:$0xff] }
 0x246   : > { %v4245_v56 = vmax.f32 %v4147_v61, 0.0  ;;  %v3849_v58 = vmax.f32 %v7985_v20, %v6097_v16  ;;  %v3947_v23 = vmax.f32 %v7986_v55, %v6293_v19  ;;  %v2882_v24 = vpop.f32.mrb[169].mxu0  ;;  %v3666_v27 = vpop.f32.mrb[169].mxu1  ;;  %v7998_v61 = vld [vmem:[#allocation112_spill] sm:$0xff]  ;;  %v7999_v20 = vld [vmem:[#allocation101_spill] sm:$0xff]  ;;  %v8000_v55 = vld [vmem:[#allocation102_spill] sm:$0xff] }
 0x247   : > { %v4243_v47 = vmax.f32 %v4145_v38, 0.0  ;;  %v3847_v45 = vmax.f32 %v7987_v48, %v2882_v24  ;;  %v3945_v43 = vmax.f32 %v7988_v46, %v3666_v27  ;;  %v6098_v3 = vpop.f32.mrb[170].mxu0  ;;  %v6294_v54 = vpop.f32.mrb[170].mxu1 }
 0x248   : > { %v5596_v1 = vpack.c.bf16 %v4245_v56, %v4244_v57  ;;  %v4045_v29 = vmax.f32 %v3849_v58, %v3947_v23  ;;  %v3850_v25 = vmax.f32 %v7989_v30, %v6098_v3  ;;  %v3948_v26 = vmax.f32 %v7990_v2, %v6294_v54  ;;  %v2885_v60 = vpop.f32.mrb[171].mxu0  ;;  %v3669_v31 = vpop.f32.mrb[171].mxu1  ;;  %v8002_v30 = vld [vmem:[#allocation116_spill] sm:$0xff] }
 0x249   : > { %v5591_v13 = vpack.c.bf16 %v4243_v47, %v4242_v4  ;;  %v4043_v39 = vmax.f32 %v3847_v45, %v3945_v43  ;;  %v3848_v12 = vmax.f32 %v7991_v11, %v2885_v60  ;;  %v3946_v40 = vmax.f32 %v7992_v14, %v3669_v31  ;;  %v8004_v11 = vld [vmem:[#allocation106_spill] sm:$0xff] }
 0x24a   : > { %5701 = vst [vmem:[%s7399_s8 + $0x110] sm:$0xff] %v5596_v1   ;;  %v4150_v49 = vadd.f32 %v7620_v32, %v4045_v29  ;;  %v4046_v33 = vmax.f32 %v3850_v25, %v3948_v26  ;;  %v8001_v1 = vld [vmem:[#allocation115_spill] sm:$0xff] }
 0x24b   : > { %5700 = vst [vmem:[%s7399_s8 + $0x108] sm:$0xff] %v5591_v13   ;;  %v4148_v50 = vadd.f32 %v7620_v32, %v4043_v39  ;;  %v4044_v34 = vmax.f32 %v3848_v12, %v3946_v40  ;;  %v8003_v13 = vld [vmem:[#allocation105_spill] sm:$0xff] }
 0x24c   : > { %v4151_v51 = vadd.f32 %v7620_v32, %v4046_v33  ;;  %v4248_v36 = vmax.f32 %v4150_v49, 0.0 }
 0x24d   : > { %v4149_v28 = vadd.f32 %v7620_v32, %v4044_v34  ;;  %v6101_v52 = vpop.f32.mrb[172].mxu0  ;;  %v6297_v35 = vpop.f32.mrb[172].mxu1  ;;  %v4246_v59 = vmax.f32 %v4148_v50, 0.0  ;;  %v8005_v50 = vld [vmem:[#allocation119_spill] sm:$0xff] }
 0x24e   : > { %v4249_v63 = vmax.f32 %v4151_v51, 0.0  ;;  %v3853_v7 = vmax.f32 %v7993_v17, %v6101_v52  ;;  %v3951_v18 = vmax.f32 %v7994_v8, %v6297_v35  ;;  %v2898_v0 = vpop.f32.mrb[173].mxu0  ;;  %v3682_v62 = vpop.f32.mrb[173].mxu1  ;;  %v8006_v51 = vld [vmem:[#allocation120_spill] sm:$0xff]  ;;  %v8007_v17 = vld [vmem:[#allocation109_spill] sm:$0xff]  ;;  %v8008_v8 = vld [vmem:[#allocation110_spill] sm:$0xff] }
 0x24f   : > { %v4247_v41 = vmax.f32 %v4149_v28, 0.0  ;;  %v3851_v21 = vmax.f32 %v7995_v42, %v2898_v0  ;;  %v3949_v9 = vmax.f32 %v7996_v22, %v3682_v62  ;;  %v6102_v44 = vpop.f32.mrb[174].mxu0  ;;  %v6298_v10 = vpop.f32.mrb[174].mxu1 }
 0x250   : > { %v5606_v15 = vpack.c.bf16 %v4249_v63, %v4248_v36  ;;  %v4049_v5 = vmax.f32 %v3853_v7, %v3951_v18  ;;  %v3854_v37 = vmax.f32 %v7997_v6, %v6102_v44  ;;  %v3952_v38 = vmax.f32 %v7998_v61, %v6298_v10  ;;  %v2901_v16 = vpop.f32.mrb[175].mxu0  ;;  %v3685_v19 = vpop.f32.mrb[175].mxu1  ;;  %v8010_v6 = vld [vmem:[#allocation124_spill] sm:$0xff] }
 0x251   : > { %v5601_v57 = vpack.c.bf16 %v4247_v41, %v4246_v59  ;;  %v4047_v56 = vmax.f32 %v3851_v21, %v3949_v9  ;;  %v3852_v58 = vmax.f32 %v7999_v20, %v2901_v16  ;;  %v3950_v23 = vmax.f32 %v8000_v55, %v3685_v19  ;;  %v8012_v20 = vld [vmem:[#allocation114_spill] sm:$0xff] }
 0x252   : > { %5703 = vst [vmem:[%s7399_s8 + $0x120] sm:$0xff] %v5606_v15   ;;  %v4154_v24 = vadd.f32 %v7620_v32, %v4049_v5  ;;  %v4050_v27 = vmax.f32 %v3854_v37, %v3952_v38  ;;  %v8009_v15 = vld [vmem:[#allocation123_spill] sm:$0xff] }
 0x253   : > { %5702 = vst [vmem:[%s7399_s8 + $0x118] sm:$0xff] %v5601_v57   ;;  %v4152_v4 = vadd.f32 %v7620_v32, %v4047_v56  ;;  %v4048_v47 = vmax.f32 %v3852_v58, %v3950_v23  ;;  %v8011_v57 = vld [vmem:[#allocation113_spill] sm:$0xff] }
 0x254   : > { %v4155_v48 = vadd.f32 %v7620_v32, %v4050_v27  ;;  %v4252_v3 = vmax.f32 %v4154_v24, 0.0 }
 0x255   : > { %v4153_v45 = vadd.f32 %v7620_v32, %v4048_v47  ;;  %v6105_v46 = vpop.f32.mrb[176].mxu0  ;;  %v6301_v43 = vpop.f32.mrb[176].mxu1  ;;  %v4250_v60 = vmax.f32 %v4152_v4, 0.0  ;;  %v8013_v4 = vld [vmem:[#allocation127_spill] sm:$0xff] }
 0x256   : > { %v4253_v54 = vmax.f32 %v4155_v48, 0.0  ;;  %v3857_v29 = vmax.f32 %v8001_v1, %v6105_v46  ;;  %v3955_v25 = vmax.f32 %v8002_v30, %v6301_v43  ;;  %v2914_v2 = vpop.f32.mrb[177].mxu0  ;;  %v3698_v26 = vpop.f32.mrb[177].mxu1  ;;  %v8014_v48 = vld [vmem:[#allocation128_spill] sm:$0xff]  ;;  %v8015_v1 = vld [vmem:[#allocation117_spill] sm:$0xff]  ;;  %v8016_v30 = vld [vmem:[#allocation118_spill] sm:$0xff] }
 0x257   : > { %v4251_v31 = vmax.f32 %v4153_v45, 0.0  ;;  %v3855_v39 = vmax.f32 %v8003_v13, %v2914_v2  ;;  %v3953_v12 = vmax.f32 %v8004_v11, %v3698_v26  ;;  %v6106_v14 = vpop.f32.mrb[178].mxu0  ;;  %v6302_v40 = vpop.f32.mrb[178].mxu1 }
 0x258   : > { %v5616_v49 = vpack.c.bf16 %v4253_v54, %v4252_v3  ;;  %v4053_v33 = vmax.f32 %v3857_v29, %v3955_v25  ;;  %v3858_v34 = vmax.f32 %v8005_v50, %v6106_v14  ;;  %v3956_v28 = vmax.f32 %v8006_v51, %v6302_v40  ;;  %v2917_v52 = vpop.f32.mrb[179].mxu0  ;;  %v3701_v35 = vpop.f32.mrb[179].mxu1  ;;  %v8018_v50 = vld [vmem:[#allocation132_spill] sm:$0xff] }
 0x259   : > { %v5611_v36 = vpack.c.bf16 %v4251_v31, %v4250_v60  ;;  %v4051_v63 = vmax.f32 %v3855_v39, %v3953_v12  ;;  %v3856_v7 = vmax.f32 %v8007_v17, %v2917_v52  ;;  %v3954_v18 = vmax.f32 %v8008_v8, %v3701_v35  ;;  %v8020_v17 = vld [vmem:[#allocation122_spill] sm:$0xff] }
 0x25a   : > { %5705 = vst [vmem:[%s7399_s8 + $0x130] sm:$0xff] %v5616_v49   ;;  %v4158_v0 = vadd.f32 %v7620_v32, %v4053_v33  ;;  %v4054_v62 = vmax.f32 %v3858_v34, %v3956_v28  ;;  %v8017_v49 = vld [vmem:[#allocation131_spill] sm:$0xff] }
 0x25b   : > { %5704 = vst [vmem:[%s7399_s8 + $0x128] sm:$0xff] %v5611_v36   ;;  %v4156_v59 = vadd.f32 %v7620_v32, %v4051_v63  ;;  %v4052_v41 = vmax.f32 %v3856_v7, %v3954_v18  ;;  %v8019_v36 = vld [vmem:[#allocation121_spill] sm:$0xff] }
 0x25c   : > { %v4159_v42 = vadd.f32 %v7620_v32, %v4054_v62  ;;  %v4256_v44 = vmax.f32 %v4158_v0, 0.0 }
 0x25d   : > { %v4157_v21 = vadd.f32 %v7620_v32, %v4052_v41  ;;  %v6109_v22 = vpop.f32.mrb[180].mxu0  ;;  %v6305_v9 = vpop.f32.mrb[180].mxu1  ;;  %v4254_v16 = vmax.f32 %v4156_v59, 0.0  ;;  %v8021_v59 = vld [vmem:[#allocation135_spill] sm:$0xff] }
 0x25e   : > { %v4257_v10 = vmax.f32 %v4159_v42, 0.0  ;;  %v3861_v5 = vmax.f32 %v8009_v15, %v6109_v22  ;;  %v3959_v37 = vmax.f32 %v8010_v6, %v6305_v9  ;;  %v2930_v61 = vpop.f32.mrb[181].mxu0  ;;  %v3714_v38 = vpop.f32.mrb[181].mxu1  ;;  %v8022_v42 = vld [vmem:[#allocation136_spill] sm:$0xff]  ;;  %v8023_v15 = vld [vmem:[#allocation125_spill] sm:$0xff]  ;;  %v8024_v6 = vld [vmem:[#allocation126_spill] sm:$0xff] }
 0x25f   : > { %v4255_v19 = vmax.f32 %v4157_v21, 0.0  ;;  %v3859_v56 = vmax.f32 %v8011_v57, %v2930_v61  ;;  %v3957_v58 = vmax.f32 %v8012_v20, %v3714_v38  ;;  %v6110_v55 = vpop.f32.mrb[182].mxu0  ;;  %v6306_v23 = vpop.f32.mrb[182].mxu1 }
 0x260   : > { %v5626_v24 = vpack.c.bf16 %v4257_v10, %v4256_v44  ;;  %v4057_v27 = vmax.f32 %v3861_v5, %v3959_v37  ;;  %v3862_v47 = vmax.f32 %v8013_v4, %v6110_v55  ;;  %v3960_v45 = vmax.f32 %v8014_v48, %v6306_v23  ;;  %v2933_v46 = vpop.f32.mrb[183].mxu0  ;;  %v3717_v43 = vpop.f32.mrb[183].mxu1  ;;  %v8026_v4 = vld [vmem:[#allocation140_spill] sm:$0xff] }
 0x261   : > { %v5621_v3 = vpack.c.bf16 %v4255_v19, %v4254_v16  ;;  %v4055_v54 = vmax.f32 %v3859_v56, %v3957_v58  ;;  %v3860_v29 = vmax.f32 %v8015_v1, %v2933_v46  ;;  %v3958_v25 = vmax.f32 %v8016_v30, %v3717_v43  ;;  %v8028_v1 = vld [vmem:[#allocation130_spill] sm:$0xff] }
 0x262   : > { %5707 = vst [vmem:[%s7399_s8 + $0x140] sm:$0xff] %v5626_v24   ;;  %v4162_v2 = vadd.f32 %v7620_v32, %v4057_v27  ;;  %v4058_v26 = vmax.f32 %v3862_v47, %v3960_v45  ;;  %v8025_v24 = vld [vmem:[#allocation139_spill] sm:$0xff] }
 0x263   : > { %5706 = vst [vmem:[%s7399_s8 + $0x138] sm:$0xff] %v5621_v3   ;;  %v4160_v60 = vadd.f32 %v7620_v32, %v4055_v54  ;;  %v4056_v31 = vmax.f32 %v3860_v29, %v3958_v25  ;;  %v8027_v3 = vld [vmem:[#allocation129_spill] sm:$0xff] }
 0x264   : > { %v4163_v13 = vadd.f32 %v7620_v32, %v4058_v26  ;;  %v4260_v14 = vmax.f32 %v4162_v2, 0.0 }
 0x265   : > { %v4161_v39 = vadd.f32 %v7620_v32, %v4056_v31  ;;  %v6113_v11 = vpop.f32.mrb[184].mxu0  ;;  %v6309_v12 = vpop.f32.mrb[184].mxu1  ;;  %v4258_v52 = vmax.f32 %v4160_v60, 0.0  ;;  %v8029_v60 = vld [vmem:[#allocation143_spill] sm:$0xff] }
 0x266   : > { %v4261_v40 = vmax.f32 %v4163_v13, 0.0  ;;  %v3865_v33 = vmax.f32 %v8017_v49, %v6113_v11  ;;  %v3963_v34 = vmax.f32 %v8018_v50, %v6309_v12  ;;  %v2946_v51 = vpop.f32.mrb[185].mxu0  ;;  %v3730_v28 = vpop.f32.mrb[185].mxu1  ;;  %v8030_v13 = vld [vmem:[#allocation144_spill] sm:$0xff]  ;;  %v8031_v49 = vld [vmem:[#allocation133_spill] sm:$0xff]  ;;  %v8032_v50 = vld [vmem:[#allocation134_spill] sm:$0xff] }
 0x267   : > { %v4259_v35 = vmax.f32 %v4161_v39, 0.0  ;;  %v3863_v63 = vmax.f32 %v8019_v36, %v2946_v51  ;;  %v3961_v7 = vmax.f32 %v8020_v17, %v3730_v28  ;;  %v6114_v8 = vpop.f32.mrb[186].mxu0  ;;  %v6310_v18 = vpop.f32.mrb[186].mxu1 }
 0x268   : > { %v5636_v0 = vpack.c.bf16 %v4261_v40, %v4260_v14  ;;  %v4061_v62 = vmax.f32 %v3865_v33, %v3963_v34  ;;  %v3866_v41 = vmax.f32 %v8021_v59, %v6114_v8  ;;  %v3964_v21 = vmax.f32 %v8022_v42, %v6310_v18  ;;  %v2949_v22 = vpop.f32.mrb[187].mxu0  ;;  %v3733_v9 = vpop.f32.mrb[187].mxu1  ;;  %v8034_v59 = vld [vmem:[#allocation146_spill] sm:$0xff] }
 0x269   : > { %v5631_v44 = vpack.c.bf16 %v4259_v35, %v4258_v52  ;;  %v4059_v10 = vmax.f32 %v3863_v63, %v3961_v7  ;;  %v3864_v5 = vmax.f32 %v8023_v15, %v2949_v22  ;;  %v3962_v37 = vmax.f32 %v8024_v6, %v3733_v9  ;;  %v8036_v15 = vld [vmem:[#allocation138_spill] sm:$0xff] }
 0x26a   : > { %5709 = vst [vmem:[%s7399_s8 + $0x150] sm:$0xff] %v5636_v0   ;;  %v4166_v61 = vadd.f32 %v7620_v32, %v4061_v62  ;;  %v4062_v38 = vmax.f32 %v3866_v41, %v3964_v21  ;;  %v8033_v0 = vld [vmem:[#allocation145_spill] sm:$0xff] }
 0x26b   : > { %5708 = vst [vmem:[%s7399_s8 + $0x148] sm:$0xff] %v5631_v44   ;;  %v4164_v16 = vadd.f32 %v7620_v32, %v4059_v10  ;;  %v4060_v19 = vmax.f32 %v3864_v5, %v3962_v37  ;;  %v8035_v44 = vld [vmem:[#allocation137_spill] sm:$0xff] }
 0x26c   : > { %v4167_v57 = vadd.f32 %v7620_v32, %v4062_v38  ;;  %v4264_v55 = vmax.f32 %v4166_v61, 0.0 }
 0x26d   : > { %v4165_v56 = vadd.f32 %v7620_v32, %v4060_v19  ;;  %v6117_v20 = vpop.f32.mrb[188].mxu0  ;;  %v6313_v58 = vpop.f32.mrb[188].mxu1  ;;  %v4262_v46 = vmax.f32 %v4164_v16, 0.0  ;;  %v8037_v19 = vld [vmem:[#allocation147_spill] sm:$0xff] }
 0x26e   : > { %v4265_v23 = vmax.f32 %v4167_v57, 0.0  ;;  %v3869_v27 = vmax.f32 %v8025_v24, %v6117_v20  ;;  %v3967_v47 = vmax.f32 %v8026_v4, %v6313_v58  ;;  %v2962_v48 = vpop.f32.mrb[189].mxu0  ;;  %v3746_v45 = vpop.f32.mrb[189].mxu1 }
 0x26f   : > { %v4263_v43 = vmax.f32 %v4165_v56, 0.0  ;;  %v3867_v54 = vmax.f32 %v8027_v3, %v2962_v48  ;;  %v3965_v29 = vmax.f32 %v8028_v1, %v3746_v45  ;;  %v6118_v30 = vpop.f32.mrb[190].mxu0  ;;  %v6314_v25 = vpop.f32.mrb[190].mxu1 }
 0x270   : > { %v5646_v2 = vpack.c.bf16 %v4265_v23, %v4264_v55  ;;  %v4065_v26 = vmax.f32 %v3869_v27, %v3967_v47  ;;  %v3870_v31 = vmax.f32 %v8029_v60, %v6118_v30  ;;  %v3968_v39 = vmax.f32 %v8030_v13, %v6314_v25  ;;  %v2965_v11 = vpop.f32.mrb[191].mxu0  ;;  %v3749_v12 = vpop.f32.mrb[191].mxu1  ;;  %v8038_v23 = vld [vmem:[#allocation141_spill] sm:$0xff]  ;;  %v8039_v27 = vld [vmem:[#allocation142_spill] sm:$0xff] }
 0x271   : > { %v5641_v14 = vpack.c.bf16 %v4263_v43, %v4262_v46  ;;  %v4063_v40 = vmax.f32 %v3867_v54, %v3965_v29  ;;  %v3868_v33 = vmax.f32 %v8031_v49, %v2965_v11  ;;  %v3966_v34 = vmax.f32 %v8032_v50, %v3749_v12 }
 0x272   : > { %5711 = vst [vmem:[%s7399_s8 + $0x160] sm:$0xff] %v5646_v2   ;;  %v4170_v51 = vadd.f32 %v7620_v32, %v4065_v26  ;;  %v4066_v28 = vmax.f32 %v3870_v31, %v3968_v39 }
 0x273   : > { %5710 = vst [vmem:[%s7399_s8 + $0x158] sm:$0xff] %v5641_v14   ;;  %v4168_v52 = vadd.f32 %v7620_v32, %v4063_v40  ;;  %v4064_v35 = vmax.f32 %v3868_v33, %v3966_v34 }
 0x274   : > { %v4171_v36 = vadd.f32 %v7620_v32, %v4066_v28  ;;  %v4268_v8 = vmax.f32 %v4170_v51, 0.0 }
 0x275   : > { %v4169_v63 = vadd.f32 %v7620_v32, %v4064_v35  ;;  %v6121_v17 = vpop.f32.mrb[192].mxu0  ;;  %v6317_v7 = vpop.f32.mrb[192].mxu1  ;;  %v4266_v22 = vmax.f32 %v4168_v52, 0.0 }
 0x276   : > { %v4269_v18 = vmax.f32 %v4171_v36, 0.0  ;;  %v3873_v62 = vmax.f32 %v8033_v0, %v6121_v17  ;;  %v3971_v41 = vmax.f32 %v8034_v59, %v6317_v7  ;;  %v2978_v42 = vpop.f32.mrb[193].mxu0  ;;  %v3762_v21 = vpop.f32.mrb[193].mxu1 }
 0x277   : > { %v4267_v9 = vmax.f32 %v4169_v63, 0.0  ;;  %v3871_v10 = vmax.f32 %v8035_v44, %v2978_v42  ;;  %v3969_v5 = vmax.f32 %v8036_v15, %v3762_v21  ;;  %v6122_v6 = vpop.f32.mrb[194].mxu0  ;;  %v6318_v37 = vpop.f32.mrb[194].mxu1 }
 0x278   : > { %v5656_v61 = vpack.c.bf16 %v4269_v18, %v4268_v8  ;;  %v4069_v38 = vmax.f32 %v3873_v62, %v3971_v41  ;;  %v3874_v16 = vmax.f32 %v7388_v53, %v6122_v6  ;;  %v3972_v57 = vmax.f32 %v8037_v19, %v6318_v37  ;;  %v2981_v56 = vpop.f32.mrb[195].mxu0  ;;  %v3765_v20 = vpop.f32.mrb[195].mxu1 }
 0x279   : > { %v5651_v58 = vpack.c.bf16 %v4267_v9, %v4266_v22  ;;  %v4067_v55 = vmax.f32 %v3871_v10, %v3969_v5  ;;  %v3872_v24 = vmax.f32 %v8038_v23, %v2981_v56  ;;  %v3970_v4 = vmax.f32 %v8039_v27, %v3765_v20 }
 0x27a   : > { %5713 = vst [vmem:[%s7399_s8 + $0x170] sm:$0xff] %v5656_v61   ;;  %v4174_v47 = vadd.f32 %v7620_v32, %v4069_v38  ;;  %v4070_v48 = vmax.f32 %v3874_v16, %v3972_v57 }
 0x27b   : > { %5712 = vst [vmem:[%s7399_s8 + $0x168] sm:$0xff] %v5651_v58   ;;  %v4172_v45 = vadd.f32 %v7620_v32, %v4067_v55  ;;  %v4068_v53 = vmax.f32 %v3872_v24, %v3970_v4 }
 0x27c   : > { %v4175_v46 = vadd.f32 %v7620_v32, %v4070_v48  ;;  %v4272_v3 = vmax.f32 %v4174_v47, 0.0 }
 0x27d   : > { %v4173_v43 = vadd.f32 %v7620_v32, %v4068_v53  ;;  %v4270_v1 = vmax.f32 %v4172_v45, 0.0 }
 0x27e   : > { %v4273_v54 = vmax.f32 %v4175_v46, 0.0 }
 0x27f   : > { %v4271_v29 = vmax.f32 %v4173_v43, 0.0 }
 0x280   : > { %v5666_v30 = vpack.c.bf16 %v4273_v54, %v4272_v3 }
 0x281   : > { %v5661_v25 = vpack.c.bf16 %v4271_v29, %v4270_v1 }
 0x282   : > { %5715 = vst [vmem:[%s7399_s8 + $0x180] sm:$0xff] %v5666_v30  }
 0x283   : > { %5714 = vst [vmem:[%s7399_s8 + $0x178] sm:$0xff] %v5661_v25  }
 0x284 PF: > { %s13_s12 = sadd.s32 1, %s6545_s12  }
 0x285   : > { %p10_p5 = scmp.ge.s32.totalorder %s13_s12, 4  }
 0x287   :  { %12 = sbr.rel (!%p10_p5) target bundleno = 1 (0x1), region = 62 }

// kernel: net_forward.4
= control target key start
LH: loop header
LB: loop body
LE: loop exit
PB: predicated region body
PF: predicated region fallthrough
CT: control target
= control target key end

     0   :  { %v1954_v0 = vmov 0   ;;  %vm645_vm0 = vcmask 261120   ;;  %s2574_s1 = inlined_call_operand.vmem [shape: bf16[160,128], index: 1, kind: input, shape index: {}]   ;;  %s2575_s0 = inlined_call_operand.vmem [shape: bf16[800,160], index: 0, kind: input, shape index: {}]   ;;  %s2576_s2 = inlined_call_operand.vmem [shape: f32[1,128], index: 2, kind: input, shape index: {}]   ;;  %s2577_s3 = inlined_call_operand.vmem [shape: bf16[200,128], index: 3, kind: output, shape index: {}]  }
   0x1   :  { %796 = vmatprep.subr.bf16.mxu0 %v1954_v0  ;;  %1773 = vmatprep.subr.bf16.mxu1 %v1954_v0  ;;  %v1794_v1 = vld [vmem:[%s2574_s1] sm:$0xff]   ;;  %v1795_v2 = vld [vmem:[%s2574_s1 + $0x8] sm:$0xff]   ;;  %v1796_v3 = vld [vmem:[%s2574_s1 + $0x10] sm:$0xff]  }
   0x2   :  { %797 = vmatpush1.bf16.msra.mxu0 %v1794_v1  ;;  %1783 = vmatpush1.bf16.msra.mxu1 %v1794_v1  ;;  %v1797_v4 = vld [vmem:[%s2574_s1 + $0x18] sm:$0xff]   ;;  %v1806_v5 = vld [vmem:[%s2575_s0 + $0x4] ss:$8 sps:$4 sm:$0xff]   ;;  %v1800_v9 = vld [vmem:[%s2574_s1 + $0x30] sm:$0xff]  }
   0x3   :  { %798 = vmatprep.subr.bf16.mxu0 %v1954_v0  ;;  %1774 = vmatprep.subr.bf16.mxu1 %v1954_v0  ;;  %v1809_v6 = vld [vmem:[%s2575_s0 + $0x194] ss:$8 sps:$4 sm:$0xff]   ;;  %v1798_v7 = vld [vmem:[%s2574_s1 + $0x20] sm:$0xff]   ;;  %v1799_v8 = vld [vmem:[%s2574_s1 + $0x28] sm:$0xff]  }
   0x4   :  { %1601 = vmatprep.mubr.msk.bf16.mxu0 %vm645_vm0, %v1806_v5  ;;  %1626 = vmatprep.mubr.msk.bf16.mxu1 %vm645_vm0, %v1809_v6  ;;  %v1801_v10 = vld [vmem:[%s2574_s1 + $0x38] sm:$0xff]   ;;  %v1802_v11 = vld [vmem:[%s2574_s1 + $0x40] sm:$0xff]   ;;  %v1803_v12 = vld [vmem:[%s2574_s1 + $0x48] sm:$0xff]  }
   0x5   :  { %v1804_v13 = vld [vmem:[%s2575_s0] ss:$8 sps:$4 sm:$0xff]   ;;  %v1807_v14 = vld [vmem:[%s2575_s0 + $0x190] ss:$8 sps:$4 sm:$0xff]   ;;  %v1810_v15 = vld [vmem:[%s2575_s0 + $0x14] ss:$8 sps:$4 sm:$0xff]  }
   0x6   :  { %799 = vmatpush1.bf16.msra.mxu0 %v1795_v2  ;;  %1784 = vmatpush1.bf16.msra.mxu1 %v1795_v2  ;;  %v1812_v16 = vld [vmem:[%s2575_s0 + $0x1a4] ss:$8 sps:$4 sm:$0xff]   ;;  %v1814_v17 = vld [vmem:[%s2575_s0 + $0x10] ss:$8 sps:$4 sm:$0xff]   ;;  %v1815_v18 = vld [vmem:[%s2575_s0 + $0x1a0] ss:$8 sps:$4 sm:$0xff]  }
   0x7   :  { %800 = vmatprep.subr.bf16.mxu0 %v1954_v0  ;;  %1775 = vmatprep.subr.bf16.mxu1 %v1954_v0  ;;  %v1816_v19 = vld [vmem:[%s2575_s0 + $0x24] ss:$8 sps:$4 sm:$0xff]   ;;  %v1818_v20 = vld [vmem:[%s2575_s0 + $0x1b4] ss:$8 sps:$4 sm:$0xff]   ;;  %v1820_v21 = vld [vmem:[%s2575_s0 + $0x20] ss:$8 sps:$4 sm:$0xff]  }
   0x8   :  { %v1821_v22 = vld [vmem:[%s2575_s0 + $0x1b0] ss:$8 sps:$4 sm:$0xff]   ;;  %v1822_v23 = vld [vmem:[%s2575_s0 + $0x34] ss:$8 sps:$4 sm:$0xff]   ;;  %v1824_v24 = vld [vmem:[%s2575_s0 + $0x1c4] ss:$8 sps:$4 sm:$0xff]  }
   0x9   :  { %v1826_v25 = vld [vmem:[%s2575_s0 + $0x30] ss:$8 sps:$4 sm:$0xff]   ;;  %v1827_v26 = vld [vmem:[%s2575_s0 + $0x1c0] ss:$8 sps:$4 sm:$0xff]   ;;  %v1828_v27 = vld [vmem:[%s2575_s0 + $0x44] ss:$8 sps:$4 sm:$0xff]  }
   0xa   :  { %801 = vmatpush1.bf16.msra.mxu0 %v1796_v3  ;;  %1785 = vmatpush1.bf16.msra.mxu1 %v1796_v3  ;;  %v1830_v28 = vld [vmem:[%s2575_s0 + $0x1d4] ss:$8 sps:$4 sm:$0xff]   ;;  %v1832_v29 = vld [vmem:[%s2575_s0 + $0x40] ss:$8 sps:$4 sm:$0xff]   ;;  %v1833_v30 = vld [vmem:[%s2575_s0 + $0x1d0] ss:$8 sps:$4 sm:$0xff]  }
   0xb   :  { %802 = vmatprep.subr.bf16.mxu0 %v1954_v0  ;;  %1776 = vmatprep.subr.bf16.mxu1 %v1954_v0  ;;  %v1834_v31 = vld [vmem:[%s2575_s0 + $0x54] ss:$8 sps:$4 sm:$0xff]   ;;  %v1836_v32 = vld [vmem:[%s2575_s0 + $0x1e4] ss:$8 sps:$4 sm:$0xff]   ;;  %v1838_v33 = vld [vmem:[%s2575_s0 + $0x50] ss:$8 sps:$4 sm:$0xff]  }
   0xc   :  { %v1839_v34 = vld [vmem:[%s2575_s0 + $0x1e0] ss:$8 sps:$4 sm:$0xff]   ;;  %v1840_v35 = vld [vmem:[%s2575_s0 + $0x64] ss:$8 sps:$4 sm:$0xff]   ;;  %v1842_v36 = vld [vmem:[%s2575_s0 + $0x1f4] ss:$8 sps:$4 sm:$0xff]  }
   0xd   :  { %v1844_v37 = vld [vmem:[%s2575_s0 + $0x60] ss:$8 sps:$4 sm:$0xff]   ;;  %v1845_v38 = vld [vmem:[%s2575_s0 + $0x1f0] ss:$8 sps:$4 sm:$0xff]   ;;  %v1846_v39 = vld [vmem:[%s2575_s0 + $0x74] ss:$8 sps:$4 sm:$0xff]  }
   0xe   :  { %803 = vmatpush1.bf16.msra.mxu0 %v1797_v4  ;;  %1786 = vmatpush1.bf16.msra.mxu1 %v1797_v4  ;;  %v1848_v40 = vld [vmem:[%s2575_s0 + $0x204] ss:$8 sps:$4 sm:$0xff]   ;;  %v1850_v41 = vld [vmem:[%s2575_s0 + $0x70] ss:$8 sps:$4 sm:$0xff]   ;;  %v1851_v42 = vld [vmem:[%s2575_s0 + $0x200] ss:$8 sps:$4 sm:$0xff]  }
   0xf   :  { %804 = vmatprep.subr.bf16.mxu0 %v1954_v0  ;;  %1777 = vmatprep.subr.bf16.mxu1 %v1954_v0  ;;  %v1852_v43 = vld [vmem:[%s2575_s0 + $0x84] ss:$8 sps:$4 sm:$0xff]   ;;  %v1854_v44 = vld [vmem:[%s2575_s0 + $0x214] ss:$8 sps:$4 sm:$0xff]   ;;  %v1856_v45 = vld [vmem:[%s2575_s0 + $0x80] ss:$8 sps:$4 sm:$0xff]  }
  0x10   :  { %v1857_v46 = vld [vmem:[%s2575_s0 + $0x210] ss:$8 sps:$4 sm:$0xff]   ;;  %v1858_v47 = vld [vmem:[%s2575_s0 + $0x94] ss:$8 sps:$4 sm:$0xff]   ;;  %v1860_v48 = vld [vmem:[%s2575_s0 + $0x224] ss:$8 sps:$4 sm:$0xff]  }
  0x11   :  { %v1862_v49 = vld [vmem:[%s2575_s0 + $0x90] ss:$8 sps:$4 sm:$0xff]   ;;  %v1863_v50 = vld [vmem:[%s2575_s0 + $0x220] ss:$8 sps:$4 sm:$0xff]   ;;  %v1864_v51 = vld [vmem:[%s2575_s0 + $0xa4] ss:$8 sps:$4 sm:$0xff]  }
  0x12   :  { %805 = vmatpush1.bf16.msra.mxu0 %v1798_v7  ;;  %1787 = vmatpush1.bf16.msra.mxu1 %v1798_v7  ;;  %v1866_v52 = vld [vmem:[%s2575_s0 + $0x234] ss:$8 sps:$4 sm:$0xff]   ;;  %v1868_v53 = vld [vmem:[%s2575_s0 + $0xa0] ss:$8 sps:$4 sm:$0xff]   ;;  %v1869_v54 = vld [vmem:[%s2575_s0 + $0x230] ss:$8 sps:$4 sm:$0xff]  }
  0x13   :  { %806 = vmatprep.subr.bf16.mxu0 %v1954_v0  ;;  %1778 = vmatprep.subr.bf16.mxu1 %v1954_v0  ;;  %v1870_v55 = vld [vmem:[%s2575_s0 + $0xb4] ss:$8 sps:$4 sm:$0xff]   ;;  %v1872_v56 = vld [vmem:[%s2575_s0 + $0x244] ss:$8 sps:$4 sm:$0xff]   ;;  %v1874_v57 = vld [vmem:[%s2575_s0 + $0xb0] ss:$8 sps:$4 sm:$0xff]  }
  0x14   :  { %v1875_v58 = vld [vmem:[%s2575_s0 + $0x240] ss:$8 sps:$4 sm:$0xff]   ;;  %v1876_v59 = vld [vmem:[%s2575_s0 + $0xc4] ss:$8 sps:$4 sm:$0xff]   ;;  %v1878_v60 = vld [vmem:[%s2575_s0 + $0x254] ss:$8 sps:$4 sm:$0xff]  }
  0x15   :  { %v1880_v61 = vld [vmem:[%s2575_s0 + $0xc0] ss:$8 sps:$4 sm:$0xff]   ;;  %v1881_v62 = vld [vmem:[%s2575_s0 + $0x250] ss:$8 sps:$4 sm:$0xff]   ;;  %v1882_v63 = vld [vmem:[%s2575_s0 + $0xd4] ss:$8 sps:$4 sm:$0xff]  }
  0x16   :  { %807 = vmatpush1.bf16.msra.mxu0 %v1799_v8  ;;  %1788 = vmatpush1.bf16.msra.mxu1 %v1799_v8  ;;  %v1886_v1 = vld [vmem:[%s2575_s0 + $0xd0] ss:$8 sps:$4 sm:$0xff]   ;;  %v1887_v2 = vld [vmem:[%s2575_s0 + $0x260] ss:$8 sps:$4 sm:$0xff]   ;;  %v1888_v3 = vld [vmem:[%s2575_s0 + $0xe4] ss:$8 sps:$4 sm:$0xff]  }
  0x17   :  { %808 = vmatprep.subr.bf16.mxu0 %v1954_v0  ;;  %1779 = vmatprep.subr.bf16.mxu1 %v1954_v0  ;;  %v1890_v4 = vld [vmem:[%s2575_s0 + $0x274] ss:$8 sps:$4 sm:$0xff]   ;;  %v1892_v5 = vld [vmem:[%s2575_s0 + $0xe0] ss:$8 sps:$4 sm:$0xff]   ;;  %v1893_v6 = vld [vmem:[%s2575_s0 + $0x270] ss:$8 sps:$4 sm:$0xff]  }
  0x18   :  { %v1894_v7 = vld [vmem:[%s2575_s0 + $0xf4] ss:$8 sps:$4 sm:$0xff]   ;;  %v1896_v8 = vld [vmem:[%s2575_s0 + $0x284] ss:$8 sps:$4 sm:$0xff]  }
  0x1a   :  { %809 = vmatpush1.bf16.msra.mxu0 %v1800_v9  ;;  %1789 = vmatpush1.bf16.msra.mxu1 %v1800_v9  ;;  %v1898_v9 = vld [vmem:[%s2575_s0 + $0xf0] ss:$8 sps:$4 sm:$0xff]  }
  0x1b   :  { %810 = vmatprep.subr.bf16.mxu0 %v1954_v0  ;;  %1780 = vmatprep.subr.bf16.mxu1 %v1954_v0 }
  0x1e   :  { %811 = vmatpush1.bf16.msra.mxu0 %v1801_v10  ;;  %1790 = vmatpush1.bf16.msra.mxu1 %v1801_v10  ;;  %v1899_v10 = vld [vmem:[%s2575_s0 + $0x280] ss:$8 sps:$4 sm:$0xff]  }
  0x1f   :  { %812 = vmatprep.subr.bf16.mxu0 %v1954_v0  ;;  %1781 = vmatprep.subr.bf16.mxu1 %v1954_v0 }
  0x22   :  { %813 = vmatpush1.bf16.msra.mxu0 %v1802_v11  ;;  %1791 = vmatpush1.bf16.msra.mxu1 %v1802_v11  ;;  %v1900_v11 = vld [vmem:[%s2575_s0 + $0x104] ss:$8 sps:$4 sm:$0xff]  }
  0x23   :  { %814 = vmatprep.subr.bf16.mxu0 %v1954_v0  ;;  %1782 = vmatprep.subr.bf16.mxu1 %v1954_v0  ;;  %v1884_v0 = vld [vmem:[%s2575_s0 + $0x264] ss:$8 sps:$4 sm:$0xff]  }
  0x26   :  { %815 = vmatpush1.bf16.msra.mxu0 %v1803_v12  ;;  %1792 = vmatpush1.bf16.msra.mxu1 %v1803_v12  ;;  %v1902_v12 = vld [vmem:[%s2575_s0 + $0x294] ss:$8 sps:$4 sm:$0xff]  }
  0x29   :  { %829 = vmatmul.mubr.bf16.vlgmr.msra.gmra.mrb[0].mxu0 %v1804_v13  ;;  %1029 = vmatmul.mubr.bf16.vlgmr.msra.gmra.mrb[0].mxu1 %v1807_v14  ;;  %v1904_v13 = vld [vmem:[%s2575_s0 + $0x100] ss:$8 sps:$4 sm:$0xff]   ;;  %v1905_v14 = vld [vmem:[%s2575_s0 + $0x290] ss:$8 sps:$4 sm:$0xff]  }
  0x2a   :  { %1602 = vmatprep.mubr.msk.bf16.mxu0 %vm645_vm0, %v1810_v15  ;;  %1627 = vmatprep.mubr.msk.bf16.mxu1 %vm645_vm0, %v1812_v16  ;;  %v1906_v15 = vld [vmem:[%s2575_s0 + $0x114] ss:$8 sps:$4 sm:$0xff]   ;;  %v1908_v16 = vld [vmem:[%s2575_s0 + $0x2a4] ss:$8 sps:$4 sm:$0xff]  }
  0x31   :  { %837 = vmatmul.mubr.bf16.gmra.mrb[4].mxu0 %v1814_v17  ;;  %1037 = vmatmul.mubr.bf16.gmra.mrb[4].mxu1 %v1815_v18  ;;  %v1910_v17 = vld [vmem:[%s2575_s0 + $0x110] ss:$8 sps:$4 sm:$0xff]   ;;  %v1911_v18 = vld [vmem:[%s2575_s0 + $0x2a0] ss:$8 sps:$4 sm:$0xff]  }
  0x32   :  { %1603 = vmatprep.mubr.msk.bf16.mxu0 %vm645_vm0, %v1816_v19  ;;  %1628 = vmatprep.mubr.msk.bf16.mxu1 %vm645_vm0, %v1818_v20  ;;  %v1912_v19 = vld [vmem:[%s2575_s0 + $0x124] ss:$8 sps:$4 sm:$0xff]   ;;  %v1914_v20 = vld [vmem:[%s2575_s0 + $0x2b4] ss:$8 sps:$4 sm:$0xff]  }
  0x39   :  { %845 = vmatmul.mubr.bf16.gmra.mrb[8].mxu0 %v1820_v21  ;;  %1045 = vmatmul.mubr.bf16.gmra.mrb[8].mxu1 %v1821_v22  ;;  %v1916_v21 = vld [vmem:[%s2575_s0 + $0x120] ss:$8 sps:$4 sm:$0xff]   ;;  %v1917_v22 = vld [vmem:[%s2575_s0 + $0x2b0] ss:$8 sps:$4 sm:$0xff]  }
  0x3a   :  { %1604 = vmatprep.mubr.msk.bf16.mxu0 %vm645_vm0, %v1822_v23  ;;  %1629 = vmatprep.mubr.msk.bf16.mxu1 %vm645_vm0, %v1824_v24  ;;  %v1918_v23 = vld [vmem:[%s2575_s0 + $0x134] ss:$8 sps:$4 sm:$0xff]   ;;  %v1920_v24 = vld [vmem:[%s2575_s0 + $0x2c4] ss:$8 sps:$4 sm:$0xff]  }
  0x41   :  { %853 = vmatmul.mubr.bf16.gmra.mrb[12].mxu0 %v1826_v25  ;;  %1053 = vmatmul.mubr.bf16.gmra.mrb[12].mxu1 %v1827_v26  ;;  %v1922_v25 = vld [vmem:[%s2575_s0 + $0x130] ss:$8 sps:$4 sm:$0xff]   ;;  %v1923_v26 = vld [vmem:[%s2575_s0 + $0x2c0] ss:$8 sps:$4 sm:$0xff]  }
  0x42   :  { %1605 = vmatprep.mubr.msk.bf16.mxu0 %vm645_vm0, %v1828_v27  ;;  %1630 = vmatprep.mubr.msk.bf16.mxu1 %vm645_vm0, %v1830_v28  ;;  %v1924_v27 = vld [vmem:[%s2575_s0 + $0x144] ss:$8 sps:$4 sm:$0xff]   ;;  %v1926_v28 = vld [vmem:[%s2575_s0 + $0x2d4] ss:$8 sps:$4 sm:$0xff]  }
  0x49   :  { %861 = vmatmul.mubr.bf16.gmra.mrb[16].mxu0 %v1832_v29  ;;  %1061 = vmatmul.mubr.bf16.gmra.mrb[16].mxu1 %v1833_v30  ;;  %v1928_v29 = vld [vmem:[%s2575_s0 + $0x140] ss:$8 sps:$4 sm:$0xff]   ;;  %v1929_v30 = vld [vmem:[%s2575_s0 + $0x2d0] ss:$8 sps:$4 sm:$0xff]  }
  0x4a   :  { %1606 = vmatprep.mubr.msk.bf16.mxu0 %vm645_vm0, %v1834_v31  ;;  %1631 = vmatprep.mubr.msk.bf16.mxu1 %vm645_vm0, %v1836_v32  ;;  %v1930_v31 = vld [vmem:[%s2575_s0 + $0x154] ss:$8 sps:$4 sm:$0xff]   ;;  %v1932_v32 = vld [vmem:[%s2575_s0 + $0x2e4] ss:$8 sps:$4 sm:$0xff]  }
  0x51   :  { %869 = vmatmul.mubr.bf16.gmra.mrb[20].mxu0 %v1838_v33  ;;  %1069 = vmatmul.mubr.bf16.gmra.mrb[20].mxu1 %v1839_v34  ;;  %v1934_v33 = vld [vmem:[%s2575_s0 + $0x150] ss:$8 sps:$4 sm:$0xff]   ;;  %v1935_v34 = vld [vmem:[%s2575_s0 + $0x2e0] ss:$8 sps:$4 sm:$0xff]  }
  0x52   :  { %1607 = vmatprep.mubr.msk.bf16.mxu0 %vm645_vm0, %v1840_v35  ;;  %1632 = vmatprep.mubr.msk.bf16.mxu1 %vm645_vm0, %v1842_v36  ;;  %v1936_v35 = vld [vmem:[%s2575_s0 + $0x164] ss:$8 sps:$4 sm:$0xff]   ;;  %v1938_v36 = vld [vmem:[%s2575_s0 + $0x2f4] ss:$8 sps:$4 sm:$0xff]  }
  0x59   :  { %877 = vmatmul.mubr.bf16.gmra.mrb[24].mxu0 %v1844_v37  ;;  %1077 = vmatmul.mubr.bf16.gmra.mrb[24].mxu1 %v1845_v38  ;;  %v1940_v37 = vld [vmem:[%s2575_s0 + $0x160] ss:$8 sps:$4 sm:$0xff]   ;;  %v1941_v38 = vld [vmem:[%s2575_s0 + $0x2f0] ss:$8 sps:$4 sm:$0xff]  }
  0x5a   :  { %1608 = vmatprep.mubr.msk.bf16.mxu0 %vm645_vm0, %v1846_v39  ;;  %1633 = vmatprep.mubr.msk.bf16.mxu1 %vm645_vm0, %v1848_v40  ;;  %v1942_v39 = vld [vmem:[%s2575_s0 + $0x174] ss:$8 sps:$4 sm:$0xff]   ;;  %v1944_v40 = vld [vmem:[%s2575_s0 + $0x304] ss:$8 sps:$4 sm:$0xff]  }
  0x61   :  { %885 = vmatmul.mubr.bf16.gmra.mrb[28].mxu0 %v1850_v41  ;;  %1085 = vmatmul.mubr.bf16.gmra.mrb[28].mxu1 %v1851_v42  ;;  %v1946_v41 = vld [vmem:[%s2575_s0 + $0x170] ss:$8 sps:$4 sm:$0xff]   ;;  %v1947_v42 = vld [vmem:[%s2575_s0 + $0x300] ss:$8 sps:$4 sm:$0xff]  }
  0x62   :  { %1609 = vmatprep.mubr.msk.bf16.mxu0 %vm645_vm0, %v1852_v43  ;;  %1634 = vmatprep.mubr.msk.bf16.mxu1 %vm645_vm0, %v1854_v44  ;;  %v1948_v43 = vld [vmem:[%s2575_s0 + $0x184] ss:$8 sps:$4 sm:$0xff]   ;;  %v1950_v44 = vld [vmem:[%s2575_s0 + $0x314] ss:$8 sps:$4 sm:$0xff]  }
  0x69   :  { %893 = vmatmul.mubr.bf16.gmra.mrb[32].mxu0 %v1856_v45  ;;  %1093 = vmatmul.mubr.bf16.gmra.mrb[32].mxu1 %v1857_v46  ;;  %v1952_v45 = vld [vmem:[%s2575_s0 + $0x180] ss:$8 sps:$4 sm:$0xff]   ;;  %v1953_v46 = vld [vmem:[%s2575_s0 + $0x310] ss:$8 sps:$4 sm:$0xff]  }
  0x6a   :  { %1610 = vmatprep.mubr.msk.bf16.mxu0 %vm645_vm0, %v1858_v47  ;;  %1635 = vmatprep.mubr.msk.bf16.mxu1 %vm645_vm0, %v1860_v48 }
  0x71   :  { %901 = vmatmul.mubr.bf16.gmra.mrb[36].mxu0 %v1862_v49  ;;  %1101 = vmatmul.mubr.bf16.gmra.mrb[36].mxu1 %v1863_v50 }
  0x72   :  { %1611 = vmatprep.mubr.msk.bf16.mxu0 %vm645_vm0, %v1864_v51  ;;  %1636 = vmatprep.mubr.msk.bf16.mxu1 %vm645_vm0, %v1866_v52 }
  0x79   :  { %909 = vmatmul.mubr.bf16.gmra.mrb[40].mxu0 %v1868_v53  ;;  %1109 = vmatmul.mubr.bf16.gmra.mrb[40].mxu1 %v1869_v54 }
  0x7a   :  { %1612 = vmatprep.mubr.msk.bf16.mxu0 %vm645_vm0, %v1870_v55  ;;  %1637 = vmatprep.mubr.msk.bf16.mxu1 %vm645_vm0, %v1872_v56 }
  0x81   :  { %917 = vmatmul.mubr.bf16.gmra.mrb[44].mxu0 %v1874_v57  ;;  %1117 = vmatmul.mubr.bf16.gmra.mrb[44].mxu1 %v1875_v58 }
  0x82   :  { %1613 = vmatprep.mubr.msk.bf16.mxu0 %vm645_vm0, %v1876_v59  ;;  %1638 = vmatprep.mubr.msk.bf16.mxu1 %vm645_vm0, %v1878_v60 }
  0x89   :  { %925 = vmatmul.mubr.bf16.gmra.mrb[48].mxu0 %v1880_v61  ;;  %1125 = vmatmul.mubr.bf16.gmra.mrb[48].mxu1 %v1881_v62 }
  0x8a   :  { %1614 = vmatprep.mubr.msk.bf16.mxu0 %vm645_vm0, %v1882_v63  ;;  %1639 = vmatprep.mubr.msk.bf16.mxu1 %vm645_vm0, %v1884_v0 }
  0x91   :  { %933 = vmatmul.mubr.bf16.gmra.mrb[52].mxu0 %v1886_v1  ;;  %1133 = vmatmul.mubr.bf16.gmra.mrb[52].mxu1 %v1887_v2 }
  0x92   :  { %1615 = vmatprep.mubr.msk.bf16.mxu0 %vm645_vm0, %v1888_v3  ;;  %1640 = vmatprep.mubr.msk.bf16.mxu1 %vm645_vm0, %v1890_v4 }
  0x99   :  { %941 = vmatmul.mubr.bf16.gmra.mrb[56].mxu0 %v1892_v5  ;;  %1141 = vmatmul.mubr.bf16.gmra.mrb[56].mxu1 %v1893_v6 }
  0x9a   :  { %1616 = vmatprep.mubr.msk.bf16.mxu0 %vm645_vm0, %v1894_v7  ;;  %1641 = vmatprep.mubr.msk.bf16.mxu1 %vm645_vm0, %v1896_v8 }
  0xa1   :  { %949 = vmatmul.mubr.bf16.gmra.mrb[60].mxu0 %v1898_v9  ;;  %1149 = vmatmul.mubr.bf16.gmra.mrb[60].mxu1 %v1899_v10 }
  0xa2   :  { %1617 = vmatprep.mubr.msk.bf16.mxu0 %vm645_vm0, %v1900_v11  ;;  %1642 = vmatprep.mubr.msk.bf16.mxu1 %vm645_vm0, %v1902_v12 }
  0xa9   :  { %957 = vmatmul.mubr.bf16.gmra.mrb[64].mxu0 %v1904_v13  ;;  %1157 = vmatmul.mubr.bf16.gmra.mrb[64].mxu1 %v1905_v14 }
  0xaa   :  { %1618 = vmatprep.mubr.msk.bf16.mxu0 %vm645_vm0, %v1906_v15  ;;  %1643 = vmatprep.mubr.msk.bf16.mxu1 %vm645_vm0, %v1908_v16 }
  0xb1   :  { %965 = vmatmul.mubr.bf16.gmra.mrb[68].mxu0 %v1910_v17  ;;  %1165 = vmatmul.mubr.bf16.gmra.mrb[68].mxu1 %v1911_v18 }
  0xb2   :  { %1619 = vmatprep.mubr.msk.bf16.mxu0 %vm645_vm0, %v1912_v19  ;;  %1644 = vmatprep.mubr.msk.bf16.mxu1 %vm645_vm0, %v1914_v20 }
  0xb9   :  { %973 = vmatmul.mubr.bf16.gmra.mrb[72].mxu0 %v1916_v21  ;;  %1173 = vmatmul.mubr.bf16.gmra.mrb[72].mxu1 %v1917_v22 }
  0xba   :  { %1620 = vmatprep.mubr.msk.bf16.mxu0 %vm645_vm0, %v1918_v23  ;;  %1645 = vmatprep.mubr.msk.bf16.mxu1 %vm645_vm0, %v1920_v24 }
  0xc1   :  { %981 = vmatmul.mubr.bf16.gmra.mrb[76].mxu0 %v1922_v25  ;;  %1181 = vmatmul.mubr.bf16.gmra.mrb[76].mxu1 %v1923_v26 }
  0xc2   :  { %1621 = vmatprep.mubr.msk.bf16.mxu0 %vm645_vm0, %v1924_v27  ;;  %1646 = vmatprep.mubr.msk.bf16.mxu1 %vm645_vm0, %v1926_v28 }
  0xc9   :  { %989 = vmatmul.mubr.bf16.gmra.mrb[80].mxu0 %v1928_v29  ;;  %1189 = vmatmul.mubr.bf16.gmra.mrb[80].mxu1 %v1929_v30 }
  0xca   :  { %1622 = vmatprep.mubr.msk.bf16.mxu0 %vm645_vm0, %v1930_v31  ;;  %1647 = vmatprep.mubr.msk.bf16.mxu1 %vm645_vm0, %v1932_v32 }
  0xd1   :  { %997 = vmatmul.mubr.bf16.gmra.mrb[84].mxu0 %v1934_v33  ;;  %1197 = vmatmul.mubr.bf16.gmra.mrb[84].mxu1 %v1935_v34 }
  0xd2   :  { %1623 = vmatprep.mubr.msk.bf16.mxu0 %vm645_vm0, %v1936_v35  ;;  %1648 = vmatprep.mubr.msk.bf16.mxu1 %vm645_vm0, %v1938_v36 }
  0xd9   :  { %1005 = vmatmul.mubr.bf16.gmra.mrb[88].mxu0 %v1940_v37  ;;  %1205 = vmatmul.mubr.bf16.gmra.mrb[88].mxu1 %v1941_v38 }
  0xda   :  { %1624 = vmatprep.mubr.msk.bf16.mxu0 %vm645_vm0, %v1942_v39  ;;  %1649 = vmatprep.mubr.msk.bf16.mxu1 %vm645_vm0, %v1944_v40 }
  0xe1   :  { %1013 = vmatmul.mubr.bf16.gmra.mrb[92].mxu0 %v1946_v41  ;;  %1213 = vmatmul.mubr.bf16.gmra.mrb[92].mxu1 %v1947_v42 }
  0xe2   :  { %1625 = vmatprep.mubr.msk.bf16.mxu0 %vm645_vm0, %v1948_v43  ;;  %1650 = vmatprep.mubr.msk.bf16.mxu1 %vm645_vm0, %v1950_v44 }
  0xe9   :  { %1021 = vmatmul.mubr.bf16.gmra.mrb[96].mxu0 %v1952_v45  ;;  %1221 = vmatmul.mubr.bf16.gmra.mrb[96].mxu1 %v1953_v46 }
  0xfc   :  { %v2355_v47 = vpop.f32.mrb[0].mxu0  ;;  %v2357_v48 = vpop.f32.mrb[0].mxu1 }
  0xfd   :  { %v832_v49 = vpop.f32.mrb[1].mxu0  ;;  %v1032_v50 = vpop.f32.mrb[1].mxu1 }
  0xfe   :  { %v2359_v51 = vpop.f32.mrb[2].mxu0  ;;  %v2361_v52 = vpop.f32.mrb[2].mxu1 }
  0xff   :  { %v835_v53 = vpop.f32.mrb[3].mxu0  ;;  %v1035_v54 = vpop.f32.mrb[3].mxu1 }
 0x104   :  { %v2363_v55 = vpop.f32.mrb[4].mxu0  ;;  %v2365_v56 = vpop.f32.mrb[4].mxu1 }
 0x105   :  { %v840_v57 = vpop.f32.mrb[5].mxu0  ;;  %v1040_v58 = vpop.f32.mrb[5].mxu1 }
 0x106   :  { %v2367_v59 = vpop.f32.mrb[6].mxu0  ;;  %v2369_v60 = vpop.f32.mrb[6].mxu1 }
 0x107   :  { %v843_v61 = vpop.f32.mrb[7].mxu0  ;;  %v1043_v62 = vpop.f32.mrb[7].mxu1 }
 0x10c   :  { %v2371_v63 = vpop.f32.mrb[8].mxu0  ;;  %v2373_v0 = vpop.f32.mrb[8].mxu1 }
 0x10d   :  { %v848_v1 = vpop.f32.mrb[9].mxu0  ;;  %v1048_v2 = vpop.f32.mrb[9].mxu1 }
 0x10e   :  { %v2375_v3 = vpop.f32.mrb[10].mxu0  ;;  %v2377_v4 = vpop.f32.mrb[10].mxu1 }
 0x10f   :  { %v851_v5 = vpop.f32.mrb[11].mxu0  ;;  %v1051_v6 = vpop.f32.mrb[11].mxu1 }
 0x114   :  { %v2379_v7 = vpop.f32.mrb[12].mxu0  ;;  %v2381_v8 = vpop.f32.mrb[12].mxu1 }
 0x115   :  { %v856_v9 = vpop.f32.mrb[13].mxu0  ;;  %v1056_v10 = vpop.f32.mrb[13].mxu1 }
 0x116   :  { %v2383_v11 = vpop.f32.mrb[14].mxu0  ;;  %v2385_v12 = vpop.f32.mrb[14].mxu1 }
 0x117   :  { %v859_v13 = vpop.f32.mrb[15].mxu0  ;;  %v1059_v14 = vpop.f32.mrb[15].mxu1 }
 0x11c   :  { %v2387_v15 = vpop.f32.mrb[16].mxu0  ;;  %v2389_v16 = vpop.f32.mrb[16].mxu1 }
 0x11d   :  { %v864_v17 = vpop.f32.mrb[17].mxu0  ;;  %v1064_v18 = vpop.f32.mrb[17].mxu1 }
 0x11e   :  { %v2391_v19 = vpop.f32.mrb[18].mxu0  ;;  %v2393_v20 = vpop.f32.mrb[18].mxu1 }
 0x11f   :  { %v867_v21 = vpop.f32.mrb[19].mxu0  ;;  %v1067_v22 = vpop.f32.mrb[19].mxu1 }
 0x124   :  { %v2395_v23 = vpop.f32.mrb[20].mxu0  ;;  %v2397_v24 = vpop.f32.mrb[20].mxu1 }
 0x125   :  { %v872_v25 = vpop.f32.mrb[21].mxu0  ;;  %v1072_v26 = vpop.f32.mrb[21].mxu1 }
 0x126   :  { %v2399_v27 = vpop.f32.mrb[22].mxu0  ;;  %v2401_v28 = vpop.f32.mrb[22].mxu1 }
 0x127   :  { %v875_v29 = vpop.f32.mrb[23].mxu0  ;;  %v1075_v30 = vpop.f32.mrb[23].mxu1 }
 0x12c   :  { %v2403_v31 = vpop.f32.mrb[24].mxu0  ;;  %v2405_v32 = vpop.f32.mrb[24].mxu1 }
 0x12d   :  { %v880_v33 = vpop.f32.mrb[25].mxu0  ;;  %v1080_v34 = vpop.f32.mrb[25].mxu1 }
 0x12e   :  { %v2407_v35 = vpop.f32.mrb[26].mxu0  ;;  %v2409_v36 = vpop.f32.mrb[26].mxu1 }
 0x12f   :  { %v883_v37 = vpop.f32.mrb[27].mxu0  ;;  %v1083_v38 = vpop.f32.mrb[27].mxu1 }
 0x134   :  { %v2411_v39 = vpop.f32.mrb[28].mxu0  ;;  %v2413_v40 = vpop.f32.mrb[28].mxu1 }
 0x135   :  { %v888_v41 = vpop.f32.mrb[29].mxu0  ;;  %v1088_v42 = vpop.f32.mrb[29].mxu1 }
 0x136   :  { %v2415_v43 = vpop.f32.mrb[30].mxu0  ;;  %v2417_v44 = vpop.f32.mrb[30].mxu1 }
 0x137   :  { %v891_v45 = vpop.f32.mrb[31].mxu0  ;;  %v1091_v46 = vpop.f32.mrb[31].mxu1 }
 0x13c   :  { %v2419_v49 = vpop.f32.mrb[32].mxu0  ;;  %v2421_v50 = vpop.f32.mrb[32].mxu1 }
 0x13d   :  { %v896_v53 = vpop.f32.mrb[33].mxu0  ;;  %v1096_v54 = vpop.f32.mrb[33].mxu1 }
 0x13e   :  { %v2423_v57 = vpop.f32.mrb[34].mxu0  ;;  %v2425_v58 = vpop.f32.mrb[34].mxu1 }
 0x13f   :  { %v899_v61 = vpop.f32.mrb[35].mxu0  ;;  %v1099_v62 = vpop.f32.mrb[35].mxu1 }
 0x144   :  { %v2427_v1 = vpop.f32.mrb[36].mxu0  ;;  %v2429_v2 = vpop.f32.mrb[36].mxu1 }
 0x145   :  { %v904_v5 = vpop.f32.mrb[37].mxu0  ;;  %v1104_v6 = vpop.f32.mrb[37].mxu1 }
 0x146   :  { %v2431_v9 = vpop.f32.mrb[38].mxu0  ;;  %v2433_v10 = vpop.f32.mrb[38].mxu1 }
 0x147   :  { %v907_v13 = vpop.f32.mrb[39].mxu0  ;;  %v1107_v14 = vpop.f32.mrb[39].mxu1 }
 0x14c   :  { %v2435_v17 = vpop.f32.mrb[40].mxu0  ;;  %v2437_v18 = vpop.f32.mrb[40].mxu1 }
 0x14d   :  { %v912_v21 = vpop.f32.mrb[41].mxu0  ;;  %v1112_v22 = vpop.f32.mrb[41].mxu1 }
 0x14e   :  { %v2439_v25 = vpop.f32.mrb[42].mxu0  ;;  %v2441_v26 = vpop.f32.mrb[42].mxu1 }
 0x14f   :  { %v915_v29 = vpop.f32.mrb[43].mxu0  ;;  %v1115_v30 = vpop.f32.mrb[43].mxu1 }
 0x150   :  { %v2460_v30 = vld [vmem:[%s2576_s2] ss:$0 sm:$0xff] }
 0x154   :  { %v2443_v33 = vpop.f32.mrb[44].mxu0  ;;  %v2445_v34 = vpop.f32.mrb[44].mxu1 }
 0x155   :  { %v920_v37 = vpop.f32.mrb[45].mxu0  ;;  %v1120_v38 = vpop.f32.mrb[45].mxu1 }
 0x156   :  { %v2447_v41 = vpop.f32.mrb[46].mxu0  ;;  %v2449_v42 = vpop.f32.mrb[46].mxu1 }
 0x157   :  { %2578 = vst [vmem:[#allocation2_spill] sm:$0xff] %v2449_v42  ;;  %v923_v45 = vpop.f32.mrb[47].mxu0  ;;  %v1123_v46 = vpop.f32.mrb[47].mxu1 }
 0x15c   :  { %v2451_v53 = vpop.f32.mrb[48].mxu0  ;;  %v2453_v54 = vpop.f32.mrb[48].mxu1 }
 0x15d   :  { %2579 = vst [vmem:[#allocation3_spill] sm:$0xff] %v2451_v53  ;;  %2580 = vst [vmem:[#allocation4_spill] sm:$0xff] %v2453_v54  ;;  %v928_v61 = vpop.f32.mrb[49].mxu0  ;;  %v1128_v62 = vpop.f32.mrb[49].mxu1 }
 0x15e   :  { %v929_v5 = vpop.f32.mrb[50].mxu0  ;;  %v1129_v6 = vpop.f32.mrb[50].mxu1 }
 0x15f   :  { %v1229_v13 = vmax.f32 %v2355_v47, %v929_v5  ;;  %v1254_v14 = vmax.f32 %v2357_v48, %v1129_v6  ;;  %v931_v21 = vpop.f32.mrb[51].mxu0  ;;  %v1131_v22 = vpop.f32.mrb[51].mxu1 }
 0x161   :  { %v1279_v29 = vmax.f32 %v1229_v13, %v1254_v14 }
 0x163   :  { %v1311_v48 = vadd.f32 %v2460_v30, %v1279_v29 }
 0x164   :  { %v934_v37 = vpop.f32.mrb[52].mxu0  ;;  %v1134_v38 = vpop.f32.mrb[52].mxu1 }
 0x165   :  { %v1230_v45 = vmax.f32 %v2359_v51, %v934_v37  ;;  %v1255_v46 = vmax.f32 %v2361_v52, %v1134_v38  ;;  %v936_v61 = vpop.f32.mrb[53].mxu0  ;;  %v1136_v62 = vpop.f32.mrb[53].mxu1  ;;  %v1336_v42 = vmax.f32 %v1311_v48, 0.0 }
 0x166   :  { %v937_v54 = vpop.f32.mrb[54].mxu0  ;;  %v1137_v47 = vpop.f32.mrb[54].mxu1 }
 0x167   :  { %v1280_v5 = vmax.f32 %v1230_v45, %v1255_v46  ;;  %v1231_v6 = vmax.f32 %v2363_v55, %v937_v54  ;;  %v1256_v13 = vmax.f32 %v2365_v56, %v1137_v47  ;;  %v939_v14 = vpop.f32.mrb[55].mxu0  ;;  %v1139_v21 = vpop.f32.mrb[55].mxu1 }
 0x169   :  { %v1312_v22 = vadd.f32 %v2460_v30, %v1280_v5  ;;  %v1281_v53 = vmax.f32 %v1231_v6, %v1256_v13 }
 0x16b   :  { %v1337_v51 = vmax.f32 %v1312_v22, 0.0  ;;  %v1313_v56 = vadd.f32 %v2460_v30, %v1281_v53 }
 0x16c   :  { %v942_v37 = vpop.f32.mrb[56].mxu0  ;;  %v1142_v52 = vpop.f32.mrb[56].mxu1 }
 0x16d   :  { %v1705_v38 = vpack.c.bf16 %v1337_v51, %v1336_v42  ;;  %v1232_v61 = vmax.f32 %v2367_v59, %v942_v37  ;;  %v1257_v62 = vmax.f32 %v2369_v60, %v1142_v52  ;;  %v944_v29 = vpop.f32.mrb[57].mxu0  ;;  %v1144_v45 = vpop.f32.mrb[57].mxu1  ;;  %v1338_v6 = vmax.f32 %v1313_v56, 0.0 }
 0x16e   :  { %v945_v46 = vpop.f32.mrb[58].mxu0  ;;  %v1145_v55 = vpop.f32.mrb[58].mxu1 }
 0x16f   :  { %1706 = vst [vmem:[%s2577_s3] sm:$0xff] %v1705_v38   ;;  %v1282_v54 = vmax.f32 %v1232_v61, %v1257_v62  ;;  %v1233_v47 = vmax.f32 %v2371_v63, %v945_v46  ;;  %v1258_v48 = vmax.f32 %v2373_v0, %v1145_v55  ;;  %v947_v42 = vpop.f32.mrb[59].mxu0  ;;  %v1147_v5 = vpop.f32.mrb[59].mxu1 }
 0x171   :  { %v1314_v59 = vadd.f32 %v2460_v30, %v1282_v54  ;;  %v1283_v60 = vmax.f32 %v1233_v47, %v1258_v48 }
 0x173   :  { %v1339_v13 = vmax.f32 %v1314_v59, 0.0  ;;  %v1315_v0 = vadd.f32 %v2460_v30, %v1283_v60 }
 0x174   :  { %v950_v14 = vpop.f32.mrb[60].mxu0  ;;  %v1150_v21 = vpop.f32.mrb[60].mxu1 }
 0x175   :  { %v1710_v22 = vpack.c.bf16 %v1339_v13, %v1338_v6  ;;  %v1234_v51 = vmax.f32 %v2375_v3, %v950_v14  ;;  %v1259_v37 = vmax.f32 %v2377_v4, %v1150_v21  ;;  %v952_v53 = vpop.f32.mrb[61].mxu0  ;;  %v1152_v52 = vpop.f32.mrb[61].mxu1  ;;  %v1340_v55 = vmax.f32 %v1315_v0, 0.0 }
 0x176   :  { %v953_v38 = vpop.f32.mrb[62].mxu0  ;;  %v1153_v63 = vpop.f32.mrb[62].mxu1 }
 0x177   :  { %1762 = vst [vmem:[%s2577_s3 + $0x8] sm:$0xff] %v1710_v22   ;;  %v1284_v61 = vmax.f32 %v1234_v51, %v1259_v37  ;;  %v1235_v62 = vmax.f32 %v2379_v7, %v953_v38  ;;  %v1260_v29 = vmax.f32 %v2381_v8, %v1153_v63  ;;  %v955_v45 = vpop.f32.mrb[63].mxu0  ;;  %v1155_v46 = vpop.f32.mrb[63].mxu1 }
 0x179   :  { %v1316_v3 = vadd.f32 %v2460_v30, %v1284_v61  ;;  %v1285_v4 = vmax.f32 %v1235_v62, %v1260_v29 }
 0x17b   :  { %v1341_v56 = vmax.f32 %v1316_v3, 0.0  ;;  %v1317_v8 = vadd.f32 %v2460_v30, %v1285_v4 }
 0x17c   :  { %v958_v54 = vpop.f32.mrb[64].mxu0  ;;  %v1158_v47 = vpop.f32.mrb[64].mxu1 }
 0x17d   :  { %v1715_v48 = vpack.c.bf16 %v1341_v56, %v1340_v55  ;;  %v1236_v42 = vmax.f32 %v2383_v11, %v958_v54  ;;  %v1261_v5 = vmax.f32 %v2385_v12, %v1158_v47  ;;  %v960_v59 = vpop.f32.mrb[65].mxu0  ;;  %v1160_v60 = vpop.f32.mrb[65].mxu1  ;;  %v1342_v37 = vmax.f32 %v1317_v8, 0.0 }
 0x17e   :  { %v961_v6 = vpop.f32.mrb[66].mxu0  ;;  %v1161_v7 = vpop.f32.mrb[66].mxu1 }
 0x17f   :  { %1763 = vst [vmem:[%s2577_s3 + $0x10] sm:$0xff] %v1715_v48   ;;  %v1286_v13 = vmax.f32 %v1236_v42, %v1261_v5  ;;  %v1237_v14 = vmax.f32 %v2387_v15, %v961_v6  ;;  %v1262_v21 = vmax.f32 %v2389_v16, %v1161_v7  ;;  %v963_v22 = vpop.f32.mrb[67].mxu0  ;;  %v1163_v51 = vpop.f32.mrb[67].mxu1 }
 0x181   :  { %v1318_v11 = vadd.f32 %v2460_v30, %v1286_v13  ;;  %v1287_v12 = vmax.f32 %v1237_v14, %v1262_v21 }
 0x183   :  { %v1343_v53 = vmax.f32 %v1318_v11, 0.0  ;;  %v1319_v16 = vadd.f32 %v2460_v30, %v1287_v12 }
 0x184   :  { %v966_v52 = vpop.f32.mrb[68].mxu0  ;;  %v1166_v38 = vpop.f32.mrb[68].mxu1 }
 0x185   :  { %v1720_v63 = vpack.c.bf16 %v1343_v53, %v1342_v37  ;;  %v1238_v0 = vmax.f32 %v2391_v19, %v966_v52  ;;  %v1263_v61 = vmax.f32 %v2393_v20, %v1166_v38  ;;  %v968_v62 = vpop.f32.mrb[69].mxu0  ;;  %v1168_v29 = vpop.f32.mrb[69].mxu1  ;;  %v1344_v54 = vmax.f32 %v1319_v16, 0.0 }
 0x186   :  { %v969_v45 = vpop.f32.mrb[70].mxu0  ;;  %v1169_v15 = vpop.f32.mrb[70].mxu1 }
 0x187   :  { %1764 = vst [vmem:[%s2577_s3 + $0x18] sm:$0xff] %v1720_v63   ;;  %v1288_v46 = vmax.f32 %v1238_v0, %v1263_v61  ;;  %v1239_v3 = vmax.f32 %v2395_v23, %v969_v45  ;;  %v1264_v4 = vmax.f32 %v2397_v24, %v1169_v15  ;;  %v971_v55 = vpop.f32.mrb[71].mxu0  ;;  %v1171_v56 = vpop.f32.mrb[71].mxu1 }
 0x189   :  { %v1320_v19 = vadd.f32 %v2460_v30, %v1288_v46  ;;  %v1289_v20 = vmax.f32 %v1239_v3, %v1264_v4 }
 0x18b   :  { %v1345_v47 = vmax.f32 %v1320_v19, 0.0  ;;  %v1321_v24 = vadd.f32 %v2460_v30, %v1289_v20 }
 0x18c   :  { %v974_v48 = vpop.f32.mrb[72].mxu0  ;;  %v1174_v42 = vpop.f32.mrb[72].mxu1 }
 0x18d   :  { %v1725_v5 = vpack.c.bf16 %v1345_v47, %v1344_v54  ;;  %v1240_v59 = vmax.f32 %v2399_v27, %v974_v48  ;;  %v1265_v60 = vmax.f32 %v2401_v28, %v1174_v42  ;;  %v976_v6 = vpop.f32.mrb[73].mxu0  ;;  %v1176_v7 = vpop.f32.mrb[73].mxu1  ;;  %v1346_v11 = vmax.f32 %v1321_v24, 0.0 }
 0x18e   :  { %v977_v8 = vpop.f32.mrb[74].mxu0  ;;  %v1177_v23 = vpop.f32.mrb[74].mxu1 }
 0x18f   :  { %1765 = vst [vmem:[%s2577_s3 + $0x20] sm:$0xff] %v1725_v5   ;;  %v1290_v13 = vmax.f32 %v1240_v59, %v1265_v60  ;;  %v1241_v14 = vmax.f32 %v2403_v31, %v977_v8  ;;  %v1266_v21 = vmax.f32 %v2405_v32, %v1177_v23  ;;  %v979_v22 = vpop.f32.mrb[75].mxu0  ;;  %v1179_v51 = vpop.f32.mrb[75].mxu1 }
 0x191   :  { %v1322_v27 = vadd.f32 %v2460_v30, %v1290_v13  ;;  %v1291_v28 = vmax.f32 %v1241_v14, %v1266_v21 }
 0x193   :  { %v1347_v12 = vmax.f32 %v1322_v27, 0.0  ;;  %v1323_v32 = vadd.f32 %v2460_v30, %v1291_v28 }
 0x194   :  { %v982_v37 = vpop.f32.mrb[76].mxu0  ;;  %v1182_v53 = vpop.f32.mrb[76].mxu1 }
 0x195   :  { %v1730_v52 = vpack.c.bf16 %v1347_v12, %v1346_v11  ;;  %v1242_v38 = vmax.f32 %v2407_v35, %v982_v37  ;;  %v1267_v63 = vmax.f32 %v2409_v36, %v1182_v53  ;;  %v984_v0 = vpop.f32.mrb[77].mxu0  ;;  %v1184_v61 = vpop.f32.mrb[77].mxu1  ;;  %v1348_v3 = vmax.f32 %v1323_v32, 0.0 }
 0x196   :  { %v985_v62 = vpop.f32.mrb[78].mxu0  ;;  %v1185_v31 = vpop.f32.mrb[78].mxu1 }
 0x197   :  { %1766 = vst [vmem:[%s2577_s3 + $0x28] sm:$0xff] %v1730_v52   ;;  %v1292_v29 = vmax.f32 %v1242_v38, %v1267_v63  ;;  %v1243_v45 = vmax.f32 %v2411_v39, %v985_v62  ;;  %v1268_v15 = vmax.f32 %v2413_v40, %v1185_v31  ;;  %v987_v16 = vpop.f32.mrb[79].mxu0  ;;  %v1187_v46 = vpop.f32.mrb[79].mxu1 }
 0x199   :  { %v1324_v35 = vadd.f32 %v2460_v30, %v1292_v29  ;;  %v1293_v36 = vmax.f32 %v1243_v45, %v1268_v15 }
 0x19b   :  { %v1349_v4 = vmax.f32 %v1324_v35, 0.0  ;;  %v1325_v40 = vadd.f32 %v2460_v30, %v1293_v36 }
 0x19c   :  { %v990_v55 = vpop.f32.mrb[80].mxu0  ;;  %v1190_v56 = vpop.f32.mrb[80].mxu1 }
 0x19d   :  { %v1735_v19 = vpack.c.bf16 %v1349_v4, %v1348_v3  ;;  %v1244_v20 = vmax.f32 %v2415_v43, %v990_v55  ;;  %v1269_v54 = vmax.f32 %v2417_v44, %v1190_v56  ;;  %v992_v47 = vpop.f32.mrb[81].mxu0  ;;  %v1192_v48 = vpop.f32.mrb[81].mxu1  ;;  %v1350_v8 = vmax.f32 %v1325_v40, 0.0 }
 0x19e   :  { %v993_v42 = vpop.f32.mrb[82].mxu0  ;;  %v1193_v39 = vpop.f32.mrb[82].mxu1 }
 0x19f   :  { %1767 = vst [vmem:[%s2577_s3 + $0x30] sm:$0xff] %v1735_v19   ;;  %v1294_v5 = vmax.f32 %v1244_v20, %v1269_v54  ;;  %v1245_v59 = vmax.f32 %v2419_v49, %v993_v42  ;;  %v1270_v60 = vmax.f32 %v2421_v50, %v1193_v39  ;;  %v995_v6 = vpop.f32.mrb[83].mxu0  ;;  %v1195_v7 = vpop.f32.mrb[83].mxu1 }
 0x1a1   :  { %v1326_v43 = vadd.f32 %v2460_v30, %v1294_v5  ;;  %v1295_v44 = vmax.f32 %v1245_v59, %v1270_v60 }
 0x1a3   :  { %v1351_v23 = vmax.f32 %v1326_v43, 0.0  ;;  %v1327_v50 = vadd.f32 %v2460_v30, %v1295_v44 }
 0x1a4   :  { %v998_v24 = vpop.f32.mrb[84].mxu0  ;;  %v1198_v13 = vpop.f32.mrb[84].mxu1 }
 0x1a5   :  { %v1740_v14 = vpack.c.bf16 %v1351_v23, %v1350_v8  ;;  %v1246_v21 = vmax.f32 %v2423_v57, %v998_v24  ;;  %v1271_v22 = vmax.f32 %v2425_v58, %v1198_v13  ;;  %v1000_v51 = vpop.f32.mrb[85].mxu0  ;;  %v1200_v27 = vpop.f32.mrb[85].mxu1  ;;  %v1352_v38 = vmax.f32 %v1327_v50, 0.0  ;;  %v2581_v13 = vld [vmem:[#allocation2_spill] sm:$0xff]  ;;  %v2583_v50 = vld [vmem:[#allocation4_spill] sm:$0xff] }
 0x1a6   :  { %v1001_v28 = vpop.f32.mrb[86].mxu0  ;;  %v1201_v49 = vpop.f32.mrb[86].mxu1 }
 0x1a7   :  { %1768 = vst [vmem:[%s2577_s3 + $0x38] sm:$0xff] %v1740_v14   ;;  %v1296_v11 = vmax.f32 %v1246_v21, %v1271_v22  ;;  %v1247_v12 = vmax.f32 %v2427_v1, %v1001_v28  ;;  %v1272_v37 = vmax.f32 %v2429_v2, %v1201_v49  ;;  %v1003_v53 = vpop.f32.mrb[87].mxu0  ;;  %v1203_v52 = vpop.f32.mrb[87].mxu1  ;;  %v2582_v28 = vld [vmem:[#allocation3_spill] sm:$0xff] }
 0x1a9   :  { %v1328_v57 = vadd.f32 %v2460_v30, %v1296_v11  ;;  %v1297_v58 = vmax.f32 %v1247_v12, %v1272_v37 }
 0x1ab   :  { %v1353_v63 = vmax.f32 %v1328_v57, 0.0  ;;  %v1329_v2 = vadd.f32 %v2460_v30, %v1297_v58 }
 0x1ac   :  { %v1006_v0 = vpop.f32.mrb[88].mxu0  ;;  %v1206_v61 = vpop.f32.mrb[88].mxu1 }
 0x1ad   :  { %v1745_v62 = vpack.c.bf16 %v1353_v63, %v1352_v38  ;;  %v1248_v31 = vmax.f32 %v2431_v9, %v1006_v0  ;;  %v1273_v32 = vmax.f32 %v2433_v10, %v1206_v61  ;;  %v1008_v29 = vpop.f32.mrb[89].mxu0  ;;  %v1208_v45 = vpop.f32.mrb[89].mxu1  ;;  %v1354_v4 = vmax.f32 %v1329_v2, 0.0 }
 0x1ae   :  { %v1009_v15 = vpop.f32.mrb[90].mxu0  ;;  %v1209_v1 = vpop.f32.mrb[90].mxu1 }
 0x1af   :  { %1769 = vst [vmem:[%s2577_s3 + $0x40] sm:$0xff] %v1745_v62   ;;  %v1298_v16 = vmax.f32 %v1248_v31, %v1273_v32  ;;  %v1249_v46 = vmax.f32 %v2435_v17, %v1009_v15  ;;  %v1274_v35 = vmax.f32 %v2437_v18, %v1209_v1  ;;  %v1011_v36 = vpop.f32.mrb[91].mxu0  ;;  %v1211_v3 = vpop.f32.mrb[91].mxu1 }
 0x1b1   :  { %v1330_v9 = vadd.f32 %v2460_v30, %v1298_v16  ;;  %v1299_v10 = vmax.f32 %v1249_v46, %v1274_v35 }
 0x1b3   :  { %v1355_v55 = vmax.f32 %v1330_v9, 0.0  ;;  %v1331_v18 = vadd.f32 %v2460_v30, %v1299_v10 }
 0x1b4   :  { %v1014_v56 = vpop.f32.mrb[92].mxu0  ;;  %v1214_v19 = vpop.f32.mrb[92].mxu1 }
 0x1b5   :  { %v1750_v20 = vpack.c.bf16 %v1355_v55, %v1354_v4  ;;  %v1250_v54 = vmax.f32 %v2439_v25, %v1014_v56  ;;  %v1275_v47 = vmax.f32 %v2441_v26, %v1214_v19  ;;  %v1016_v48 = vpop.f32.mrb[93].mxu0  ;;  %v1216_v42 = vpop.f32.mrb[93].mxu1  ;;  %v1356_v7 = vmax.f32 %v1331_v18, 0.0 }
 0x1b6   :  { %v1017_v39 = vpop.f32.mrb[94].mxu0  ;;  %v1217_v17 = vpop.f32.mrb[94].mxu1 }
 0x1b7   :  { %1770 = vst [vmem:[%s2577_s3 + $0x48] sm:$0xff] %v1750_v20   ;;  %v1300_v40 = vmax.f32 %v1250_v54, %v1275_v47  ;;  %v1251_v5 = vmax.f32 %v2443_v33, %v1017_v39  ;;  %v1276_v59 = vmax.f32 %v2445_v34, %v1217_v17  ;;  %v1019_v60 = vpop.f32.mrb[95].mxu0  ;;  %v1219_v6 = vpop.f32.mrb[95].mxu1 }
 0x1b9   :  { %v1332_v25 = vadd.f32 %v2460_v30, %v1300_v40  ;;  %v1301_v26 = vmax.f32 %v1251_v5, %v1276_v59 }
 0x1bb   :  { %v1357_v43 = vmax.f32 %v1332_v25, 0.0  ;;  %v1333_v34 = vadd.f32 %v2460_v30, %v1301_v26 }
 0x1bc   :  { %v1022_v44 = vpop.f32.mrb[96].mxu0  ;;  %v1222_v8 = vpop.f32.mrb[96].mxu1 }
 0x1bd   :  { %v1755_v23 = vpack.c.bf16 %v1357_v43, %v1356_v7  ;;  %v1252_v24 = vmax.f32 %v2447_v41, %v1022_v44  ;;  %v1277_v14 = vmax.f32 %v2581_v13, %v1222_v8  ;;  %v1024_v21 = vpop.f32.mrb[97].mxu0  ;;  %v1224_v22 = vpop.f32.mrb[97].mxu1  ;;  %v1358_v52 = vmax.f32 %v1333_v34, 0.0 }
 0x1be   :  { %v1025_v51 = vpop.f32.mrb[98].mxu0  ;;  %v1225_v33 = vpop.f32.mrb[98].mxu1 }
 0x1bf   :  { %1771 = vst [vmem:[%s2577_s3 + $0x50] sm:$0xff] %v1755_v23   ;;  %v1302_v27 = vmax.f32 %v1252_v24, %v1277_v14  ;;  %v1253_v49 = vmax.f32 %v2582_v28, %v1025_v51  ;;  %v1278_v11 = vmax.f32 %v2583_v50, %v1225_v33  ;;  %v1027_v12 = vpop.f32.mrb[99].mxu0  ;;  %v1227_v37 = vpop.f32.mrb[99].mxu1 }
 0x1c1   :  { %v1334_v41 = vadd.f32 %v2460_v30, %v1302_v27  ;;  %v1303_v53 = vmax.f32 %v1253_v49, %v1278_v11 }
 0x1c3   :  { %v1359_v57 = vmax.f32 %v1334_v41, 0.0  ;;  %v1335_v58 = vadd.f32 %v2460_v30, %v1303_v53 }
 0x1c5   :  { %v1760_v38 = vpack.c.bf16 %v1359_v57, %v1358_v52  ;;  %v1360_v63 = vmax.f32 %v1335_v58, 0.0 }
 0x1c7   :  { %1772 = vst [vmem:[%s2577_s3 + $0x58] sm:$0xff] %v1760_v38   ;;  %v1701_v0 = vpack.c.bf16 %v1360_v63, %v1360_v63 }
 0x1c9   :  { %1486 = vst [vmem:[%s2577_s3 + $0x60] sm:$0xf] %v1701_v0 }

// kernel: net_forward.5
= control target key start
LH: loop header
LB: loop body
LE: loop exit
PB: predicated region body
PF: predicated region fallthrough
CT: control target
= control target key end

     0   :  { %v741_v0 = vmov 0   ;;  %vm249_vm0 = vcmask 130048   ;;  %v742_v32 = vmov 0.0   ;;  %vm743_vm1 = vmmov 0   ;;  %s952_s1 = inlined_call_operand.vmem [shape: bf16[400,128], index: 1, kind: input, shape index: {}]   ;;  %s953_s0 = inlined_call_operand.vmem [shape: bf16[8,400], index: 0, kind: input, shape index: {}]   ;;  %s954_s3 = inlined_call_operand.vmem [shape: bf16[128,128], index: 3, kind: input, shape index: {}]   ;;  %s955_s5 = inlined_call_operand.vmem [shape: bf16[128,128], index: 5, kind: input, shape index: {}]   ;;  %s956_s2 = inlined_call_operand.vmem [shape: f32[1,128], index: 2, kind: input, shape index: {}]   ;;  %s957_s4 = inlined_call_operand.vmem [shape: f32[1,128], index: 4, kind: input, shape index: {}]   ;;  %s958_s6 = inlined_call_operand.vmem [shape: f32[1,128], index: 6, kind: input, shape index: {}]   ;;  %s959_s7 = inlined_call_operand.vmem [shape: f32[8,128], index: 7, kind: output, shape index: {}]  }
   0x1   :  { %293 = vmatprep.subr.bf16.mxu1 %v741_v0  ;;  %v696_v1 = vld [vmem:[%s952_s1 + $0x40] sm:$0xff]   ;;  %v699_v4 = vld [vmem:[%s952_s1 + $0x48] sm:$0xff]   ;;  %v702_v7 = vld [vmem:[%s952_s1 + $0x50] sm:$0xff]  }
   0x2   :  { %v697_v2 = vld [vmem:[%s952_s1 + $0x80] sm:$0xff]   ;;  %613 = vmatprep.subr.bf16.mxu0 %v696_v1  ;;  %v700_v5 = vld [vmem:[%s952_s1 + $0x88] sm:$0xff]   ;;  %v703_v8 = vld [vmem:[%s952_s1 + $0x90] sm:$0xff]  }
   0x3   :  { %v698_v3 = vld [vmem:[%s952_s1] sm:$0xff]   ;;  %294 = vmatpush1.bf16.msra.mxu1 %v697_v2  ;;  %v701_v6 = vld [vmem:[%s952_s1 + $0x8] sm:$0xff]   ;;  %v704_v9 = vld [vmem:[%s952_s1 + $0x10] sm:$0xff]  }
   0x4   :  { %614 = vmatpush3.bf16.msra.mxu0 %v698_v3  ;;  %295 = vmatprep.subr.bf16.mxu1 %v741_v0  ;;  %v705_v10 = vld [vmem:[%s952_s1 + $0x58] sm:$0xff]   ;;  %v708_v13 = vld [vmem:[%s952_s1 + $0x60] sm:$0xff]   ;;  %v711_v16 = vld [vmem:[%s952_s1 + $0x68] sm:$0xff]  }
   0x5   :  { %615 = vmatprep.subr.bf16.mxu0 %v699_v4  ;;  %v706_v11 = vld [vmem:[%s952_s1 + $0x98] sm:$0xff]   ;;  %v709_v14 = vld [vmem:[%s952_s1 + $0xa0] sm:$0xff]   ;;  %v712_v17 = vld [vmem:[%s952_s1 + $0xa8] sm:$0xff]  }
   0x6   :  { %v707_v12 = vld [vmem:[%s952_s1 + $0x18] sm:$0xff]   ;;  %v710_v15 = vld [vmem:[%s952_s1 + $0x20] sm:$0xff]   ;;  %v713_v18 = vld [vmem:[%s952_s1 + $0x28] sm:$0xff]  }
   0x7   :  { %296 = vmatpush1.bf16.msra.mxu1 %v700_v5  ;;  %v714_v19 = vld [vmem:[%s952_s1 + $0x70] sm:$0xff]   ;;  %v27_v22 = vld [vmem:[%s953_s0] sm:$0xff]  ;;  %v717_v23 = vld [vmem:[%s952_s1 + $0x78] sm:$0xff]  }
   0x8   :  { %616 = vmatpush3.bf16.msra.mxu0 %v701_v6  ;;  %297 = vmatprep.subr.bf16.mxu1 %v741_v0  ;;  %v715_v20 = vld [vmem:[%s952_s1 + $0xb0] sm:$0xff]   ;;  %v566_v24 = vcombine.high %v27_v22, %v27_v22  ;;  %v28_v25 = vld [vmem:[%s953_s0 + $0x8] sm:$0xff]  ;;  %v718_v27 = vld [vmem:[%s952_s1 + $0xb8] sm:$0xff]   ;;  %v565_v30 = vcombine.low %v27_v22, %v27_v22 }
   0x9   :  { %617 = vmatprep.subr.bf16.mxu0 %v702_v7  ;;  %v716_v21 = vld [vmem:[%s952_s1 + $0x30] sm:$0xff]   ;;  %v568_v26 = vcombine.high %v28_v25, %v28_v25  ;;  %v719_v28 = vld [vmem:[%s952_s1 + $0x38] sm:$0xff]   ;;  %v722_v29 = vld [vmem:[%s952_s1 + $0xc0] sm:$0xff]   ;;  %v567_v33 = vcombine.low %v28_v25, %v28_v25 }
   0xa   :  { %285 = vmatprep.mubr.bf16.mxu0 %v566_v24  ;;  %v725_v31 = vld [vmem:[%s954_s3] sm:$0xff]   ;;  %v726_v34 = vld [vmem:[%s954_s3 + $0x8] sm:$0xff]   ;;  %v727_v35 = vld [vmem:[%s954_s3 + $0x10] sm:$0xff]  }
   0xb   :  { %298 = vmatpush1.bf16.msra.mxu1 %v703_v8  ;;  %594 = vmatprep.mubr.msk.bf16.mxu1 %vm249_vm0, %v568_v26  ;;  %v728_v36 = vld [vmem:[%s954_s3 + $0x18] sm:$0xff]   ;;  %v729_v37 = vld [vmem:[%s954_s3 + $0x20] sm:$0xff]   ;;  %v730_v38 = vld [vmem:[%s954_s3 + $0x28] sm:$0xff]  }
   0xc   :  { %618 = vmatpush3.bf16.msra.mxu0 %v704_v9  ;;  %299 = vmatprep.subr.bf16.mxu1 %v741_v0  ;;  %v731_v39 = vld [vmem:[%s954_s3 + $0x30] sm:$0xff]   ;;  %v732_v40 = vld [vmem:[%s954_s3 + $0x38] sm:$0xff]   ;;  %v733_v41 = vld [vmem:[%s955_s5] sm:$0xff]  }
   0xd   :  { %619 = vmatprep.subr.bf16.mxu0 %v705_v10  ;;  %v734_v42 = vld [vmem:[%s955_s5 + $0x8] sm:$0xff]   ;;  %v735_v43 = vld [vmem:[%s955_s5 + $0x10] sm:$0xff]   ;;  %v736_v44 = vld [vmem:[%s955_s5 + $0x18] sm:$0xff]  }
   0xe   :  { %v737_v45 = vld [vmem:[%s955_s5 + $0x20] sm:$0xff]   ;;  %v738_v46 = vld [vmem:[%s955_s5 + $0x28] sm:$0xff]   ;;  %v739_v61 = vld [vmem:[%s955_s5 + $0x30] sm:$0xff]  }
   0xf   :  { %300 = vmatpush1.bf16.msra.mxu1 %v706_v11  ;;  %v564_v49 = vld [vmem:[%s956_s2] ss:$0 sm:$0xff]  ;;  %v740_v62 = vld [vmem:[%s955_s5 + $0x38] sm:$0xff]  }
  0x10   :  { %620 = vmatpush3.bf16.msra.mxu0 %v707_v12  ;;  %301 = vmatprep.subr.bf16.mxu1 %v741_v0  ;;  %v595_v63 = vld [vmem:[%s957_s4] ss:$0 sm:$0xff] }
  0x11   :  { %621 = vmatprep.subr.bf16.mxu0 %v708_v13  ;;  %v604_v7 = vld [vmem:[%s958_s6] ss:$0 sm:$0xff] }
  0x13   :  { %302 = vmatpush1.bf16.msra.mxu1 %v709_v14 }
  0x14   :  { %622 = vmatpush3.bf16.msra.mxu0 %v710_v15  ;;  %303 = vmatprep.subr.bf16.mxu1 %v741_v0 }
  0x15   :  { %623 = vmatprep.subr.bf16.mxu0 %v711_v16 }
  0x17   :  { %304 = vmatpush1.bf16.msra.mxu1 %v712_v17 }
  0x18   :  { %624 = vmatpush3.bf16.msra.mxu0 %v713_v18  ;;  %305 = vmatprep.subr.bf16.mxu1 %v741_v0 }
  0x19   :  { %625 = vmatprep.subr.bf16.mxu0 %v714_v19 }
  0x1b   :  { %306 = vmatpush1.bf16.msra.mxu1 %v715_v20 }
  0x1c   :  { %626 = vmatpush3.bf16.msra.mxu0 %v716_v21  ;;  %307 = vmatprep.subr.bf16.mxu1 %v741_v0 }
  0x1d   :  { %627 = vmatprep.subr.bf16.mxu0 %v717_v23 }
  0x1f   :  { %308 = vmatpush1.bf16.msra.mxu1 %v718_v27 }
  0x20   :  { %628 = vmatpush3.bf16.msra.mxu0 %v719_v28  ;;  %309 = vmatprep.subr.bf16.mxu1 %v741_v0 }
  0x21   :  { %653 = vmatprep.subr.bf16.mxu0 %v742_v32 }
  0x23   :  { %286 = vmatmul.mubr.bf16.vlgmr.msra.gmra.mrb[0].mxu0 %v565_v30  ;;  %310 = vmatpush1.bf16.msra.mxu1 %v722_v29 }
  0x24   :  { %654 = vmatpush3.bf16.msra.mxu0 %v725_v31  ;;  %673 = vmatprep.subr.bf16.mxu1 %v742_v32 }
  0x25   :  { %655 = vmatprep.subr.bf16.mxu0 %v742_v32  ;;  %669 = vmatprep.mubr.msk.bf16.mxu0 %vm743_vm1, %v742_v32 }
  0x26   :  { %326 = vmatmul.mubr.bf16.vlgmr.msra.gmra.mrb[0].mxu1 %v567_v33 }
  0x27   :  { %689 = vmatprep.mubr.msk.bf16.mxu1 %vm743_vm1, %v742_v32  ;;  %674 = vmatpush3.bf16.msra.mxu1 %v733_v41 }
  0x28   :  { %656 = vmatpush3.bf16.msra.mxu0 %v726_v34  ;;  %675 = vmatprep.subr.bf16.mxu1 %v742_v32 }
  0x29   :  { %657 = vmatprep.subr.bf16.mxu0 %v742_v32 }
  0x2b   :  { %676 = vmatpush3.bf16.msra.mxu1 %v734_v42 }
  0x2c   :  { %658 = vmatpush3.bf16.msra.mxu0 %v727_v35  ;;  %677 = vmatprep.subr.bf16.mxu1 %v742_v32 }
  0x2d   :  { %659 = vmatprep.subr.bf16.mxu0 %v742_v32 }
  0x2f   :  { %678 = vmatpush3.bf16.msra.mxu1 %v735_v43 }
  0x30   :  { %660 = vmatpush3.bf16.msra.mxu0 %v728_v36  ;;  %679 = vmatprep.subr.bf16.mxu1 %v742_v32 }
  0x31   :  { %661 = vmatprep.subr.bf16.mxu0 %v742_v32 }
  0x33   :  { %680 = vmatpush3.bf16.msra.mxu1 %v736_v44 }
  0x34   :  { %662 = vmatpush3.bf16.msra.mxu0 %v729_v37  ;;  %681 = vmatprep.subr.bf16.mxu1 %v742_v32 }
  0x35   :  { %663 = vmatprep.subr.bf16.mxu0 %v742_v32 }
  0x37   :  { %682 = vmatpush3.bf16.msra.mxu1 %v737_v45 }
  0x38   :  { %664 = vmatpush3.bf16.msra.mxu0 %v730_v38  ;;  %683 = vmatprep.subr.bf16.mxu1 %v742_v32 }
  0x39   :  { %665 = vmatprep.subr.bf16.mxu0 %v742_v32 }
  0x3b   :  { %684 = vmatpush3.bf16.msra.mxu1 %v738_v46 }
  0x3c   :  { %666 = vmatpush3.bf16.msra.mxu0 %v731_v39  ;;  %685 = vmatprep.subr.bf16.mxu1 %v742_v32 }
  0x3d   :  { %667 = vmatprep.subr.bf16.mxu0 %v742_v32 }
  0x3f   :  { %686 = vmatpush3.bf16.msra.mxu1 %v739_v61 }
  0x40   :  { %668 = vmatpush3.bf16.msra.mxu0 %v732_v40  ;;  %687 = vmatprep.subr.bf16.mxu1 %v742_v32 }
  0x43   :  { %688 = vmatpush3.bf16.msra.mxu1 %v740_v62 }
  0xf6   :  { %v629_v47 = vpop.f32.mrb[0].mxu0 }
  0xf7   :  { %v630_v48 = vpop.f32.mrb[1].mxu0 }
  0xf8   :  { %v631_v50 = vadd.f32 %v630_v48, %v629_v47  ;;  %v632_v51 = vpop.f32.mrb[2].mxu0 }
  0xf9   :  { %v633_v52 = vpop.f32.mrb[3].mxu0  ;;  %v327_v53 = vpop.f32.mrb[0].mxu1 }
  0xfa   :  { %v288_v54 = vadd.f32 %v631_v50, %v564_v49  ;;  %v329_v55 = vpop.f32.mrb[1].mxu1 }
  0xfb   :  { %v330_v56 = vpop.f32.mrb[2].mxu1 }
  0xfc   :  { %v328_v57 = vadd.f32 %v327_v53, %v288_v54  ;;  %v331_v58 = vpop.f32.mrb[3].mxu1 }
  0xfe   :  { %v333_v59 = vmax.f32 %v328_v57, 0.0 }
 0x100   :  { %v334_v60 = vpack.c.bf16 %v333_v59, %v333_v59 }
 0x102   :  { %670 = vmatmul.mubr.bf16.vlgmr.msra.gmra.mrb[4].mxu0 %v334_v60 }
 0x1d5   :  { %v440_v0 = vpop.f32.mrb[4].mxu0 }
 0x1d6   :  { %v441_v1 = vadd.f32 %v595_v63, %v440_v0  ;;  %v671_v2 = vpop.f32.mrb[5].mxu0 }
 0x1d7   :  { %v443_v3 = vpop.f32.mrb[6].mxu0 }
 0x1d8   :  { %v446_v4 = vmax.f32 %v441_v1, 0.0  ;;  %v672_v5 = vpop.f32.mrb[7].mxu0 }
 0x1da   :  { %v447_v6 = vpack.c.bf16 %v446_v4, %v446_v4 }
 0x1dc   :  { %690 = vmatmul.mubr.bf16.vlgmr.msra.gmra.mrb[4].mxu1 %v447_v6 }
 0x2af   :  { %v553_v8 = vpop.f32.mrb[4].mxu1 }
 0x2b0   :  { %v554_v9 = vadd.f32 %v604_v7, %v553_v8  ;;  %v691_v10 = vpop.f32.mrb[5].mxu1 }
 0x2b1   :  { %v556_v11 = vpop.f32.mrb[6].mxu1 }
 0x2b2   :  { %559 = vst [vmem:[%s959_s7] sm:$0xff] %v554_v9  ;;  %v692_v12 = vpop.f32.mrb[7].mxu1 }

</bundles_post_ra>
